<compile_context>
chip_gen: v5e
topology: v5e:2x2
jax: 0.10.0
libtpu: 0.0.40
codegen_flags: <defaults>
</compile_context>

<pallas_src>
import jax
import jax.numpy as jnp
from jax import lax
from jax.experimental import pallas as pl
from jax.experimental.pallas import tpu as pltpu


def _res_block_kernel(x_ref, w1_ref, s1_ref, b1_ref, w2_ref, s2_ref, b2_ref,
                      fc1w_ref, fc1b_ref, fc2w_ref, fc2b_ref,
                      out_ref, pad_ref):
    """One block of `B` batch samples per grid step.

    x_ref    : (B, H, W, C)       f32   input tile (NHWC)
    w1_ref   : (9, C, C)          bf16  conv1 taps, [ky*3+kx, cin, cout]
    s1/b1    : (1, 1, C)          f32   folded BN1 scale / bias
    w2_ref   : (9, C, C)          bf16  conv2 taps
    s2/b2    : (1, 1, C)          f32   folded BN2 scale / bias
    fc1w_ref : (1, 1, Csq, C)     f32   SE fc1 weight (PyTorch (out, in) layout)
    fc1b_ref : (1, 1, Csq, 1)     f32
    fc2w_ref : (1, 1, Csq, C)     f32   SE fc2 weight transposed to (in, out)
    fc2b_ref : (1, 1, 1, C)       f32
    out_ref  : (B, H, W, C)       f32
    pad_ref  : (B, H+2, W+2, C)   f32   shared zero-padded scratch, both convs
    """
    B, H, W, C = x_ref.shape
    f32 = jnp.float32
    bf16 = jnp.bfloat16

    # Zero only the 1-pixel halo.  NOTE: done every step and NOT gated on
    # pl.program_id(0) == 0 -- with "parallel" batch semantics each TensorCore
    # starts at a different program id, so a step-0 gate would leave one
    # core's (private) scratch halo uninitialized.  Four thin strips, cheap.
    pad_ref[:, 0:1, :, :] = jnp.zeros((B, 1, W + 2, C), f32)
    pad_ref[:, H + 1:H + 2, :, :] = jnp.zeros((B, 1, W + 2, C), f32)
    pad_ref[:, 1:H + 1, 0:1, :] = jnp.zeros((B, H, 1, C), f32)
    pad_ref[:, 1:H + 1, W + 1:W + 2, :] = jnp.zeros((B, H, 1, C), f32)

    def conv3x3(w_ref):
        # 9 accumulating MXU matmuls on shifted views of the padded tile:
        # no im2col scratch, no tap-copy stores.  M = B*H*W, K = N = C.
        acc = None
        for t in range(9):
            dy, dx = t // 3, t % 3
            tap = pad_ref[:, dy:dy + H, dx:dx + W, :].astype(bf16)
            tap = tap.reshape(B * H, W, C)            # leading-dim merge (free)
            part = lax.dot_general(
                tap, w_ref[t],
                dimension_numbers=(((2,), (0,)), ((), ())),
                preferred_element_type=f32)            # (B*H, W, C) f32
            acc = part if acc is None else acc + part
        return acc

    # ---- conv1 -> BN1 -> ReLU ------------------------------------------------
    pad_ref[:, 1:H + 1, 1:W + 1, :] = x_ref[...]
    y1 = jnp.maximum(conv3x3(w1_ref) * s1_ref[...] + b1_ref[...], 0.0)

    # ---- conv2 -> BN2  (y1 goes straight into the shared padded scratch) -----
    pad_ref[:, 1:H + 1, 1:W + 1, :] = y1.reshape(B, H, W, C)
    y2 = (conv3x3(w2_ref) * s2_ref[...] + b2_ref[...]).reshape(B, H, W, C)

    # ---- SE: global avg pool -> fc1 -> ReLU -> fc2 -> sigmoid (tiny; VPU) ----
    avg = jnp.mean(y2, axis=(1, 2), keepdims=True)                   # (B,1,1,C)
    h = jnp.maximum(
        jnp.sum(avg * fc1w_ref[...], axis=3, keepdims=True) + fc1b_ref[...],
        0.0)                                                         # (B,1,Csq,1)
    se = jax.nn.sigmoid(
        jnp.sum(h * fc2w_ref[...], axis=2, keepdims=True) + fc2b_ref[...])  # (B,1,1,C)

    # ---- channel scale, residual add, final ReLU -------------------------------
    out_ref[...] = jnp.maximum(y2 * se + x_ref[...], 0.0)


def _vmem_limit_bytes():
    # Generation-aware scoped-VMEM limit: ~3/4 of physical, capped at 100 MiB
    # (=> ~48 MiB on v7x's 64 MiB VMEM, ~96 MiB on v5e/v6e's 128 MiB).
    try:
        cap = pltpu.get_tpu_info().vmem_capacity_bytes
    except Exception:
        cap = 128 * 1024 * 1024
    return int(min(cap * 3 // 4, 100 * 1024 * 1024))


def _pick_block_b(n, h, w):
    # Fold enough samples into the matmul M dim (target ~256 rows on v6e/v7x,
    # ~128 on v5e) while keeping >= 2 parallel grid steps when possible so
    # both TensorCores on v7x get work.
    divisors = [d for d in range(1, n + 1) if n % d == 0]
    cands = [d for d in divisors if n // d >= 2] or divisors
    for d in cands:
        if d * h * w >= 256:
            return d
    return cands[-1]


def res_block_forward_nhwc(x_nhwc, params, *, block_b=None):
    """NHWC in / NHWC out (stride=1, downsample=None).  Primary entry point --
    keep activations NHWC across layers to avoid HBM-round-trip transposes."""
    x = x_nhwc.astype(jnp.float32)
    N, H, W, C = x.shape

    w1 = params["w1_hwio"]                                  # (3, 3, Cin, Cout)
    w2 = params["w2_hwio"]
    assert w1.shape[2] == w1.shape[3] == C, "downsample=None requires Cin == Cout"
    csq = params["fc1_w"].shape[0]

    if block_b is None:
        block_b = _pick_block_b(N, H, W)
    assert N % block_b == 0, "block_b must divide the batch"

    # Conv weights as 9 per-tap (Cin, Cout) matmul operands, tap = ky*3 + kx;
    # bf16 for the MXU (accumulation stays f32 in-kernel).
    w1_taps = w1.reshape(9, C, C).astype(jnp.bfloat16)
    w2_taps = w2.reshape(9, C, C).astype(jnp.bfloat16)

    f32 = jnp.float32
    s1 = params["bn1_scale"].reshape(1, 1, C).astype(f32)
    b1 = params["bn1_bias"].reshape(1, 1, C).astype(f32)
    s2 = params["bn2_scale"].reshape(1, 1, C).astype(f32)
    b2 = params["bn2_bias"].reshape(1, 1, C).astype(f32)
    fc1w = params["fc1_w"].reshape(1, 1, csq, C).astype(f32)
    fc1b = params["fc1_b"].reshape(1, 1, csq, 1).astype(f32)
    fc2wt = params["fc2_w"].T.reshape(1, 1, csq, C).astype(f32)
    fc2b = params["fc2_b"].reshape(1, 1, 1, C).astype(f32)

    def _full(a):
        nd = a.ndim
        return pl.BlockSpec(a.shape, lambda b, _nd=nd: (0,) * _nd)

    act_spec = pl.BlockSpec((block_b, H, W, C), lambda b: (b, 0, 0, 0))

    out = pl.pallas_call(
        _res_block_kernel,
        out_shape=jax.ShapeDtypeStruct((N, H, W, C), f32),
        grid=(N // block_b,),
        in_specs=[
            act_spec,                                        # x
            _full(w1_taps), _full(s1), _full(b1),
            _full(w2_taps), _full(s2), _full(b2),
            _full(fc1w), _full(fc1b), _full(fc2wt), _full(fc2b),
        ],
        out_specs=act_spec,
        scratch_shapes=[
            pltpu.VMEM((block_b, H + 2, W + 2, C), f32),     # shared padded tile
        ],
        compiler_params=pltpu.CompilerParams(
            dimension_semantics=("parallel",),   # batch blocks shard across TCs
            vmem_limit_bytes=_vmem_limit_bytes(),
        ),
    )(x, w1_taps, s1, b1, w2_taps, s2, b2, fc1w, fc1b, fc2wt, fc2b)
    return out


def res_block_forward(x_nchw, params, *, block_b=None):
    """NCHW in / NCHW out, drop-in for the PyTorch module interface.
    TODO(synk): boundary glue only -- each transpose is a full HBM round trip of
    the activation; keep real pipelines NHWC end-to-end (use the _nhwc entry)."""
    x = jnp.transpose(x_nchw, (0, 2, 3, 1))
    y = res_block_forward_nhwc(x, params, block_b=block_b)
    return jnp.transpose(y, (0, 3, 1, 2))


# ------------------------------ pure-JAX reference ------------------------------
def _reference_forward_nhwc(x, p, conv_dtype=jnp.float32):
    """Reference.  conv_dtype=bfloat16 reproduces the kernel's MXU quantization
    (bf16 conv operands, f32 accumulation); float32 is the exact full-precision
    module semantics."""
    def conv(v, w_hwio):
        return lax.conv_general_dilated(
            v.astype(conv_dtype), w_hwio.astype(conv_dtype),
            window_strides=(1, 1), padding=((1, 1), (1, 1)),
            dimension_numbers=("NHWC", "HWIO", "NHWC"),
            preferred_element_type=jnp.float32)

    y1 = jnp.maximum(conv(x, p["w1_hwio"]) * p["bn1_scale"] + p["bn1_bias"], 0.0)
    y2 = conv(y1, p["w2_hwio"]) * p["bn2_scale"] + p["bn2_bias"]
    avg = jnp.mean(y2, axis=(1, 2))                                   # (N, C)
    h = jnp.maximum(avg @ p["fc1_w"].T + p["fc1_b"], 0.0)
    se = jax.nn.sigmoid(h @ p["fc2_w"].T + p["fc2_b"])                # (N, C)
    return jnp.maximum(y2 * se[:, None, None, :] + x, 0.0)


def _make_params(key, c):
    csq = round(c / 16)
    assert csq >= 1, "pick channels >= 8 so round(C/16) >= 1"
    ks = jax.random.split(key, 8)
    w1_oihw = jax.random.normal(ks[0], (c, c, 3, 3), jnp.float32) * 0.1
    w2_oihw = jax.random.normal(ks[1], (c, c, 3, 3), jnp.float32) * 0.1

    def bn(k):
        kg, kb, km, kv = jax.random.split(k, 4)
        gamma = jax.random.uniform(kg, (c,), jnp.float32, 0.5, 1.5)
        beta = jax.random.normal(kb, (c,), jnp.float32) * 0.1
        mean = jax.random.normal(km, (c,), jnp.float32) * 0.1
        var = jax.random.uniform(kv, (c,), jnp.float32, 0.5, 1.5)
        scale = gamma / jnp.sqrt(var + 1e-5)
        return scale, beta - mean * scale

    bn1_scale, bn1_bias = bn(ks[2])
    bn2_scale, bn2_bias = bn(ks[3])
    fc1_w = jax.random.normal(ks[4], (csq, c), jnp.float32) * 0.1    # PyTorch (out, in)
    fc1_b = jax.random.normal(ks[5], (csq,), jnp.float32) * 0.1
    fc2_w = jax.random.normal(ks[6], (c, csq), jnp.float32) * 0.1
    fc2_b = jax.random.normal(ks[7], (c,), jnp.float32) * 0.1
    return {
        "w1_oihw": w1_oihw, "w2_oihw": w2_oihw,
        "w1_hwio": jnp.transpose(w1_oihw, (2, 3, 1, 0)),             # (ky, kx, cin, cout)
        "w2_hwio": jnp.transpose(w2_oihw, (2, 3, 1, 0)),
        "bn1_scale": bn1_scale, "bn1_bias": bn1_bias,
        "bn2_scale": bn2_scale, "bn2_bias": bn2_bias,
        "fc1_w": fc1_w, "fc1_b": fc1_b,
        "fc2_w": fc2_w, "fc2_b": fc2_b,
    }


if __name__ == "__main__":
    key = jax.random.PRNGKey(0)
    kx, kp = jax.random.split(key)

    # ResBlock(32, 32, stride=1, resolution=8): batch=4, channels=32, spatial=8.
    # (channels must be >= 8 so that round(C/16) >= 1 in the SEBlock.)
    N, C, HW = 4, 32, 8
    params = _make_params(kp, C)
    x_nhwc = jax.random.normal(kx, (N, HW, HW, C), jnp.float32)

    out = jax.block_until_ready(res_block_forward_nhwc(x_nhwc, params))
    assert out.shape == (N, HW, HW, C)

    # Exact-semantics check with conv operands quantized to bf16 exactly as the
    # kernel's MXU path does (f32 accumulation in both).
    ref_bf16 = _reference_forward_nhwc(x_nhwc, params, conv_dtype=jnp.bfloat16)
    err = float(jnp.max(jnp.abs(out - ref_bf16)))
    assert jnp.allclose(out, ref_bf16, atol=5e-3, rtol=5e-3), \
        f"max abs err vs bf16-matched ref: {err}"

    # Loose check against the full-f32 reference; the only difference is the
    # bf16 MXU operand quantization requested for v6e/v7x.
    ref_f32 = _reference_forward_nhwc(x_nhwc, params, conv_dtype=jnp.float32)
    err32 = float(jnp.max(jnp.abs(out - ref_f32)))
    assert jnp.allclose(out, ref_f32, atol=0.3, rtol=0.1), \
        f"max abs err vs f32 ref: {err32}"

    # NCHW drop-in wrapper parity (PyTorch module interface).
    x_nchw = jnp.transpose(x_nhwc, (0, 3, 1, 2))
    out_nchw = jax.block_until_ready(res_block_forward(x_nchw, params))
    assert jnp.allclose(out_nchw, jnp.transpose(out, (0, 3, 1, 2)),
                        atol=1e-6, rtol=1e-6)

    print("KERNEL_OK")
</pallas_src>

<mosaic_0001>
module attributes {stable_mosaic.version = 11 : i64} {
  func.func @_res_block_kernel(%arg0: i32, %arg1: memref<2x8x8x32xf32, #tpu.memory_space<vmem>>, %arg2: memref<9x32x32xbf16, #tpu.memory_space<vmem>>, %arg3: memref<1x1x32xf32, #tpu.memory_space<vmem>>, %arg4: memref<1x1x32xf32, #tpu.memory_space<vmem>>, %arg5: memref<9x32x32xbf16, #tpu.memory_space<vmem>>, %arg6: memref<1x1x32xf32, #tpu.memory_space<vmem>>, %arg7: memref<1x1x32xf32, #tpu.memory_space<vmem>>, %arg8: memref<1x1x2x32xf32, #tpu.memory_space<vmem>>, %arg9: memref<1x1x2x1xf32, #tpu.memory_space<vmem>>, %arg10: memref<1x1x2x32xf32, #tpu.memory_space<vmem>>, %arg11: memref<1x1x1x32xf32, #tpu.memory_space<vmem>>, %arg12: memref<2x8x8x32xf32, #tpu.memory_space<vmem>>, %arg13: memref<2x10x10x32xf32, #tpu.memory_space<vmem>>) attributes {dimension_semantics = [#tpu.dimension_semantics<parallel>], iteration_bounds = array<i64: 2>, scalar_prefetch = 0 : i64, scratch_operands = 1 : i64, tpu.core_type = #tpu.core_type<tc>, window_params = [{transform_indices = @transform_0, window_bounds = array<i64: 2, 8, 8, 32>}, {pipeline_mode = #tpu.pipeline_mode<synchronous>, transform_indices = @transform_1, window_bounds = array<i64: 9, 32, 32>}, {pipeline_mode = #tpu.pipeline_mode<synchronous>, transform_indices = @transform_2, window_bounds = array<i64: 1, 1, 32>}, {pipeline_mode = #tpu.pipeline_mode<synchronous>, transform_indices = @transform_3, window_bounds = array<i64: 1, 1, 32>}, {pipeline_mode = #tpu.pipeline_mode<synchronous>, transform_indices = @transform_4, window_bounds = array<i64: 9, 32, 32>}, {pipeline_mode = #tpu.pipeline_mode<synchronous>, transform_indices = @transform_5, window_bounds = array<i64: 1, 1, 32>}, {pipeline_mode = #tpu.pipeline_mode<synchronous>, transform_indices = @transform_6, window_bounds = array<i64: 1, 1, 32>}, {pipeline_mode = #tpu.pipeline_mode<synchronous>, transform_indices = @transform_7, window_bounds = array<i64: 1, 1, 2, 32>}, {pipeline_mode = #tpu.pipeline_mode<synchronous>, transform_indices = @transform_8, window_bounds = array<i64: 1, 1, 2, 1>}, {pipeline_mode = #tpu.pipeline_mode<synchronous>, transform_indices = @transform_9, window_bounds = array<i64: 1, 1, 2, 32>}, {pipeline_mode = #tpu.pipeline_mode<synchronous>, transform_indices = @transform_10, window_bounds = array<i64: 1, 1, 1, 32>}, {transform_indices = @transform_11, window_bounds = array<i64: 2, 8, 8, 32>}]} {
    %cst = arith.constant 0.000000e+00 : f32
    %0 = vector.broadcast %cst : f32 to vector<2x1x10x32xf32>
    %c0 = arith.constant 0 : index
    %c0_0 = arith.constant 0 : index
    %c0_1 = arith.constant 0 : index
    %c0_2 = arith.constant 0 : index
    %1 = vector.load %arg13[%c0, %c0_0, %c0_1, %c0_2] : memref<2x10x10x32xf32, #tpu.memory_space<vmem>>, vector<2x1x10x32xf32>
    tpu.vector_store %arg13[%c0, %c0_0, %c0_1, %c0_2], %0 {strides = array<i32>} : memref<2x10x10x32xf32, #tpu.memory_space<vmem>>, vector<2x1x10x32xf32>,
    %cst_3 = arith.constant 0.000000e+00 : f32
    %2 = vector.broadcast %cst_3 : f32 to vector<2x1x10x32xf32>
    %c0_4 = arith.constant 0 : index
    %c9 = arith.constant 9 : index
    %c0_5 = arith.constant 0 : index
    %c0_6 = arith.constant 0 : index
    %3 = vector.load %arg13[%c0_4, %c9, %c0_5, %c0_6] : memref<2x10x10x32xf32, #tpu.memory_space<vmem>>, vector<2x1x10x32xf32>
    tpu.vector_store %arg13[%c0_4, %c9, %c0_5, %c0_6], %2 {strides = array<i32>} : memref<2x10x10x32xf32, #tpu.memory_space<vmem>>, vector<2x1x10x32xf32>,
    %cst_7 = arith.constant 0.000000e+00 : f32
    %4 = vector.broadcast %cst_7 : f32 to vector<2x8x1x32xf32>
    %c0_8 = arith.constant 0 : index
    %c1 = arith.constant 1 : index
    %c0_9 = arith.constant 0 : index
    %c0_10 = arith.constant 0 : index
    %5 = vector.load %arg13[%c0_8, %c1, %c0_9, %c0_10] : memref<2x10x10x32xf32, #tpu.memory_space<vmem>>, vector<2x8x1x32xf32>
    tpu.vector_store %arg13[%c0_8, %c1, %c0_9, %c0_10], %4 {strides = array<i32>} : memref<2x10x10x32xf32, #tpu.memory_space<vmem>>, vector<2x8x1x32xf32>,
    %cst_11 = arith.constant 0.000000e+00 : f32
    %6 = vector.broadcast %cst_11 : f32 to vector<2x8x1x32xf32>
    %c0_12 = arith.constant 0 : index
    %c1_13 = arith.constant 1 : index
    %c9_14 = arith.constant 9 : index
    %c0_15 = arith.constant 0 : index
    %7 = vector.load %arg13[%c0_12, %c1_13, %c9_14, %c0_15] : memref<2x10x10x32xf32, #tpu.memory_space<vmem>>, vector<2x8x1x32xf32>
    tpu.vector_store %arg13[%c0_12, %c1_13, %c9_14, %c0_15], %6 {strides = array<i32>} : memref<2x10x10x32xf32, #tpu.memory_space<vmem>>, vector<2x8x1x32xf32>,
    %c0_16 = arith.constant 0 : index
    %c0_17 = arith.constant 0 : index
    %c0_18 = arith.constant 0 : index
    %c0_19 = arith.constant 0 : index
    %8 = vector.load %arg1[%c0_16, %c0_17, %c0_18, %c0_19] : memref<2x8x8x32xf32, #tpu.memory_space<vmem>>, vector<2x8x8x32xf32>
    %c0_20 = arith.constant 0 : index
    %c1_21 = arith.constant 1 : index
    %c1_22 = arith.constant 1 : index
    %c0_23 = arith.constant 0 : index
    %9 = vector.load %arg13[%c0_20, %c1_21, %c1_22, %c0_23] : memref<2x10x10x32xf32, #tpu.memory_space<vmem>>, vector<2x8x8x32xf32>
    tpu.vector_store %arg13[%c0_20, %c1_21, %c1_22, %c0_23], %8 {strides = array<i32>} : memref<2x10x10x32xf32, #tpu.memory_space<vmem>>, vector<2x8x8x32xf32>,
    %c0_24 = arith.constant 0 : index
    %c0_25 = arith.constant 0 : index
    %c0_26 = arith.constant 0 : index
    %c0_27 = arith.constant 0 : index
    %10 = vector.load %arg13[%c0_24, %c0_25, %c0_26, %c0_27] : memref<2x10x10x32xf32, #tpu.memory_space<vmem>>, vector<2x8x8x32xf32>
    %11 = arith.truncf %10 : vector<2x8x8x32xf32> to vector<2x8x8x32xbf16>
    %12 = vector.shape_cast %11 : vector<2x8x8x32xbf16> to vector<16x8x32xbf16>
    %c0_28 = arith.constant 0 : index
    %c0_29 = arith.constant 0 : index
    %c0_30 = arith.constant 0 : index
    %13 = vector.load %arg2[%c0_28, %c0_29, %c0_30] : memref<9x32x32xbf16, #tpu.memory_space<vmem>>, vector<1x32x32xbf16>
    %14 = vector.shape_cast %13 : vector<1x32x32xbf16> to vector<32x32xbf16>
    %cst_31 = arith.constant dense<0.000000e+00> : vector<16x8x32xf32>
    %15 = tpu.matmul %12, %14, %cst_31 {dimension_numbers = #tpu.dot_dimension_numbers<[2], [0], [0, 1], [1], [0, 0, 0, 1, 1, 1], [], []>} : vector<16x8x32xbf16>, vector<32x32xbf16>, vector<16x8x32xf32> -> vector<16x8x32xf32>
    %c0_32 = arith.constant 0 : index
    %c0_33 = arith.constant 0 : index
    %c1_34 = arith.constant 1 : index
    %c0_35 = arith.constant 0 : index
    %16 = vector.load %arg13[%c0_32, %c0_33, %c1_34, %c0_35] : memref<2x10x10x32xf32, #tpu.memory_space<vmem>>, vector<2x8x8x32xf32>
    %17 = arith.truncf %16 : vector<2x8x8x32xf32> to vector<2x8x8x32xbf16>
    %18 = vector.shape_cast %17 : vector<2x8x8x32xbf16> to vector<16x8x32xbf16>
    %c1_36 = arith.constant 1 : index
    %c0_37 = arith.constant 0 : index
    %c0_38 = arith.constant 0 : index
    %19 = vector.load %arg2[%c1_36, %c0_37, %c0_38] : memref<9x32x32xbf16, #tpu.memory_space<vmem>>, vector<1x32x32xbf16>
    %20 = vector.shape_cast %19 : vector<1x32x32xbf16> to vector<32x32xbf16>
    %cst_39 = arith.constant dense<0.000000e+00> : vector<16x8x32xf32>
    %21 = tpu.matmul %18, %20, %cst_39 {dimension_numbers = #tpu.dot_dimension_numbers<[2], [0], [0, 1], [1], [0, 0, 0, 1, 1, 1], [], []>} : vector<16x8x32xbf16>, vector<32x32xbf16>, vector<16x8x32xf32> -> vector<16x8x32xf32>
    %22 = arith.addf %15, %21 : vector<16x8x32xf32>
    %c0_40 = arith.constant 0 : index
    %c0_41 = arith.constant 0 : index
    %c2 = arith.constant 2 : index
    %c0_42 = arith.constant 0 : index
    %23 = vector.load %arg13[%c0_40, %c0_41, %c2, %c0_42] : memref<2x10x10x32xf32, #tpu.memory_space<vmem>>, vector<2x8x8x32xf32>
    %24 = arith.truncf %23 : vector<2x8x8x32xf32> to vector<2x8x8x32xbf16>
    %25 = vector.shape_cast %24 : vector<2x8x8x32xbf16> to vector<16x8x32xbf16>
    %c2_43 = arith.constant 2 : index
    %c0_44 = arith.constant 0 : index
    %c0_45 = arith.constant 0 : index
    %26 = vector.load %arg2[%c2_43, %c0_44, %c0_45] : memref<9x32x32xbf16, #tpu.memory_space<vmem>>, vector<1x32x32xbf16>
    %27 = vector.shape_cast %26 : vector<1x32x32xbf16> to vector<32x32xbf16>
    %cst_46 = arith.constant dense<0.000000e+00> : vector<16x8x32xf32>
    %28 = tpu.matmul %25, %27, %cst_46 {dimension_numbers = #tpu.dot_dimension_numbers<[2], [0], [0, 1], [1], [0, 0, 0, 1, 1, 1], [], []>} : vector<16x8x32xbf16>, vector<32x32xbf16>, vector<16x8x32xf32> -> vector<16x8x32xf32>
    %29 = arith.addf %22, %28 : vector<16x8x32xf32>
    %c0_47 = arith.constant 0 : index
    %c1_48 = arith.constant 1 : index
    %c0_49 = arith.constant 0 : index
    %c0_50 = arith.constant 0 : index
    %30 = vector.load %arg13[%c0_47, %c1_48, %c0_49, %c0_50] : memref<2x10x10x32xf32, #tpu.memory_space<vmem>>, vector<2x8x8x32xf32>
    %31 = arith.truncf %30 : vector<2x8x8x32xf32> to vector<2x8x8x32xbf16>
    %32 = vector.shape_cast %31 : vector<2x8x8x32xbf16> to vector<16x8x32xbf16>
    %c3 = arith.constant 3 : index
    %c0_51 = arith.constant 0 : index
    %c0_52 = arith.constant 0 : index
    %33 = vector.load %arg2[%c3, %c0_51, %c0_52] : memref<9x32x32xbf16, #tpu.memory_space<vmem>>, vector<1x32x32xbf16>
    %34 = vector.shape_cast %33 : vector<1x32x32xbf16> to vector<32x32xbf16>
    %cst_53 = arith.constant dense<0.000000e+00> : vector<16x8x32xf32>
    %35 = tpu.matmul %32, %34, %cst_53 {dimension_numbers = #tpu.dot_dimension_numbers<[2], [0], [0, 1], [1], [0, 0, 0, 1, 1, 1], [], []>} : vector<16x8x32xbf16>, vector<32x32xbf16>, vector<16x8x32xf32> -> vector<16x8x32xf32>
    %36 = arith.addf %29, %35 : vector<16x8x32xf32>
    %c0_54 = arith.constant 0 : index
    %c1_55 = arith.constant 1 : index
    %c1_56 = arith.constant 1 : index
    %c0_57 = arith.constant 0 : index
    %37 = vector.load %arg13[%c0_54, %c1_55, %c1_56, %c0_57] : memref<2x10x10x32xf32, #tpu.memory_space<vmem>>, vector<2x8x8x32xf32>
    %38 = arith.truncf %37 : vector<2x8x8x32xf32> to vector<2x8x8x32xbf16>
    %39 = vector.shape_cast %38 : vector<2x8x8x32xbf16> to vector<16x8x32xbf16>
    %c4 = arith.constant 4 : index
    %c0_58 = arith.constant 0 : index
    %c0_59 = arith.constant 0 : index
    %40 = vector.load %arg2[%c4, %c0_58, %c0_59] : memref<9x32x32xbf16, #tpu.memory_space<vmem>>, vector<1x32x32xbf16>
    %41 = vector.shape_cast %40 : vector<1x32x32xbf16> to vector<32x32xbf16>
    %cst_60 = arith.constant dense<0.000000e+00> : vector<16x8x32xf32>
    %42 = tpu.matmul %39, %41, %cst_60 {dimension_numbers = #tpu.dot_dimension_numbers<[2], [0], [0, 1], [1], [0, 0, 0, 1, 1, 1], [], []>} : vector<16x8x32xbf16>, vector<32x32xbf16>, vector<16x8x32xf32> -> vector<16x8x32xf32>
    %43 = arith.addf %36, %42 : vector<16x8x32xf32>
    %c0_61 = arith.constant 0 : index
    %c1_62 = arith.constant 1 : index
    %c2_63 = arith.constant 2 : index
    %c0_64 = arith.constant 0 : index
    %44 = vector.load %arg13[%c0_61, %c1_62, %c2_63, %c0_64] : memref<2x10x10x32xf32, #tpu.memory_space<vmem>>, vector<2x8x8x32xf32>
    %45 = arith.truncf %44 : vector<2x8x8x32xf32> to vector<2x8x8x32xbf16>
    %46 = vector.shape_cast %45 : vector<2x8x8x32xbf16> to vector<16x8x32xbf16>
    %c5 = arith.constant 5 : index
    %c0_65 = arith.constant 0 : index
    %c0_66 = arith.constant 0 : index
    %47 = vector.load %arg2[%c5, %c0_65, %c0_66] : memref<9x32x32xbf16, #tpu.memory_space<vmem>>, vector<1x32x32xbf16>
    %48 = vector.shape_cast %47 : vector<1x32x32xbf16> to vector<32x32xbf16>
    %cst_67 = arith.constant dense<0.000000e+00> : vector<16x8x32xf32>
    %49 = tpu.matmul %46, %48, %cst_67 {dimension_numbers = #tpu.dot_dimension_numbers<[2], [0], [0, 1], [1], [0, 0, 0, 1, 1, 1], [], []>} : vector<16x8x32xbf16>, vector<32x32xbf16>, vector<16x8x32xf32> -> vector<16x8x32xf32>
    %50 = arith.addf %43, %49 : vector<16x8x32xf32>
    %c0_68 = arith.constant 0 : index
    %c2_69 = arith.constant 2 : index
    %c0_70 = arith.constant 0 : index
    %c0_71 = arith.constant 0 : index
    %51 = vector.load %arg13[%c0_68, %c2_69, %c0_70, %c0_71] : memref<2x10x10x32xf32, #tpu.memory_space<vmem>>, vector<2x8x8x32xf32>
    %52 = arith.truncf %51 : vector<2x8x8x32xf32> to vector<2x8x8x32xbf16>
    %53 = vector.shape_cast %52 : vector<2x8x8x32xbf16> to vector<16x8x32xbf16>
    %c6 = arith.constant 6 : index
    %c0_72 = arith.constant 0 : index
    %c0_73 = arith.constant 0 : index
    %54 = vector.load %arg2[%c6, %c0_72, %c0_73] : memref<9x32x32xbf16, #tpu.memory_space<vmem>>, vector<1x32x32xbf16>
    %55 = vector.shape_cast %54 : vector<1x32x32xbf16> to vector<32x32xbf16>
    %cst_74 = arith.constant dense<0.000000e+00> : vector<16x8x32xf32>
    %56 = tpu.matmul %53, %55, %cst_74 {dimension_numbers = #tpu.dot_dimension_numbers<[2], [0], [0, 1], [1], [0, 0, 0, 1, 1, 1], [], []>} : vector<16x8x32xbf16>, vector<32x32xbf16>, vector<16x8x32xf32> -> vector<16x8x32xf32>
    %57 = arith.addf %50, %56 : vector<16x8x32xf32>
    %c0_75 = arith.constant 0 : index
    %c2_76 = arith.constant 2 : index
    %c1_77 = arith.constant 1 : index
    %c0_78 = arith.constant 0 : index
    %58 = vector.load %arg13[%c0_75, %c2_76, %c1_77, %c0_78] : memref<2x10x10x32xf32, #tpu.memory_space<vmem>>, vector<2x8x8x32xf32>
    %59 = arith.truncf %58 : vector<2x8x8x32xf32> to vector<2x8x8x32xbf16>
    %60 = vector.shape_cast %59 : vector<2x8x8x32xbf16> to vector<16x8x32xbf16>
    %c7 = arith.constant 7 : index
    %c0_79 = arith.constant 0 : index
    %c0_80 = arith.constant 0 : index
    %61 = vector.load %arg2[%c7, %c0_79, %c0_80] : memref<9x32x32xbf16, #tpu.memory_space<vmem>>, vector<1x32x32xbf16>
    %62 = vector.shape_cast %61 : vector<1x32x32xbf16> to vector<32x32xbf16>
    %cst_81 = arith.constant dense<0.000000e+00> : vector<16x8x32xf32>
    %63 = tpu.matmul %60, %62, %cst_81 {dimension_numbers = #tpu.dot_dimension_numbers<[2], [0], [0, 1], [1], [0, 0, 0, 1, 1, 1], [], []>} : vector<16x8x32xbf16>, vector<32x32xbf16>, vector<16x8x32xf32> -> vector<16x8x32xf32>
    %64 = arith.addf %57, %63 : vector<16x8x32xf32>
    %c0_82 = arith.constant 0 : index
    %c2_83 = arith.constant 2 : index
    %c2_84 = arith.constant 2 : index
    %c0_85 = arith.constant 0 : index
    %65 = vector.load %arg13[%c0_82, %c2_83, %c2_84, %c0_85] : memref<2x10x10x32xf32, #tpu.memory_space<vmem>>, vector<2x8x8x32xf32>
    %66 = arith.truncf %65 : vector<2x8x8x32xf32> to vector<2x8x8x32xbf16>
    %67 = vector.shape_cast %66 : vector<2x8x8x32xbf16> to vector<16x8x32xbf16>
    %c8 = arith.constant 8 : index
    %c0_86 = arith.constant 0 : index
    %c0_87 = arith.constant 0 : index
    %68 = vector.load %arg2[%c8, %c0_86, %c0_87] : memref<9x32x32xbf16, #tpu.memory_space<vmem>>, vector<1x32x32xbf16>
    %69 = vector.shape_cast %68 : vector<1x32x32xbf16> to vector<32x32xbf16>
    %cst_88 = arith.constant dense<0.000000e+00> : vector<16x8x32xf32>
    %70 = tpu.matmul %67, %69, %cst_88 {dimension_numbers = #tpu.dot_dimension_numbers<[2], [0], [0, 1], [1], [0, 0, 0, 1, 1, 1], [], []>} : vector<16x8x32xbf16>, vector<32x32xbf16>, vector<16x8x32xf32> -> vector<16x8x32xf32>
    %71 = arith.addf %64, %70 : vector<16x8x32xf32>
    %c0_89 = arith.constant 0 : index
    %c0_90 = arith.constant 0 : index
    %c0_91 = arith.constant 0 : index
    %72 = vector.load %arg3[%c0_89, %c0_90, %c0_91] : memref<1x1x32xf32, #tpu.memory_space<vmem>>, vector<1x1x32xf32>
    %73 = vector.broadcast %72 : vector<1x1x32xf32> to vector<16x8x32xf32>
    %74 = arith.mulf %71, %73 : vector<16x8x32xf32>
    %c0_92 = arith.constant 0 : index
    %c0_93 = arith.constant 0 : index
    %c0_94 = arith.constant 0 : index
    %75 = vector.load %arg4[%c0_92, %c0_93, %c0_94] : memref<1x1x32xf32, #tpu.memory_space<vmem>>, vector<1x1x32xf32>
    %76 = vector.broadcast %75 : vector<1x1x32xf32> to vector<16x8x32xf32>
    %77 = arith.addf %74, %76 : vector<16x8x32xf32>
    %cst_95 = arith.constant 0.000000e+00 : f32
    %78 = vector.broadcast %cst_95 : f32 to vector<16x8x32xf32>
    %79 = arith.maximumf %77, %78 : vector<16x8x32xf32>
    %80 = vector.shape_cast %79 : vector<16x8x32xf32> to vector<2x8x8x32xf32>
    %c0_96 = arith.constant 0 : index
    %c1_97 = arith.constant 1 : index
    %c1_98 = arith.constant 1 : index
    %c0_99 = arith.constant 0 : index
    %81 = vector.load %arg13[%c0_96, %c1_97, %c1_98, %c0_99] : memref<2x10x10x32xf32, #tpu.memory_space<vmem>>, vector<2x8x8x32xf32>
    tpu.vector_store %arg13[%c0_96, %c1_97, %c1_98, %c0_99], %80 {strides = array<i32>} : memref<2x10x10x32xf32, #tpu.memory_space<vmem>>, vector<2x8x8x32xf32>,
    %c0_100 = arith.constant 0 : index
    %c0_101 = arith.constant 0 : index
    %c0_102 = arith.constant 0 : index
    %c0_103 = arith.constant 0 : index
    %82 = vector.load %arg13[%c0_100, %c0_101, %c0_102, %c0_103] : memref<2x10x10x32xf32, #tpu.memory_space<vmem>>, vector<2x8x8x32xf32>
    %83 = arith.truncf %82 : vector<2x8x8x32xf32> to vector<2x8x8x32xbf16>
    %84 = vector.shape_cast %83 : vector<2x8x8x32xbf16> to vector<16x8x32xbf16>
    %c0_104 = arith.constant 0 : index
    %c0_105 = arith.constant 0 : index
    %c0_106 = arith.constant 0 : index
    %85 = vector.load %arg5[%c0_104, %c0_105, %c0_106] : memref<9x32x32xbf16, #tpu.memory_space<vmem>>, vector<1x32x32xbf16>
    %86 = vector.shape_cast %85 : vector<1x32x32xbf16> to vector<32x32xbf16>
    %cst_107 = arith.constant dense<0.000000e+00> : vector<16x8x32xf32>
    %87 = tpu.matmul %84, %86, %cst_107 {dimension_numbers = #tpu.dot_dimension_numbers<[2], [0], [0, 1], [1], [0, 0, 0, 1, 1, 1], [], []>} : vector<16x8x32xbf16>, vector<32x32xbf16>, vector<16x8x32xf32> -> vector<16x8x32xf32>
    %c0_108 = arith.constant 0 : index
    %c0_109 = arith.constant 0 : index
    %c1_110 = arith.constant 1 : index
    %c0_111 = arith.constant 0 : index
    %88 = vector.load %arg13[%c0_108, %c0_109, %c1_110, %c0_111] : memref<2x10x10x32xf32, #tpu.memory_space<vmem>>, vector<2x8x8x32xf32>
    %89 = arith.truncf %88 : vector<2x8x8x32xf32> to vector<2x8x8x32xbf16>
    %90 = vector.shape_cast %89 : vector<2x8x8x32xbf16> to vector<16x8x32xbf16>
    %c1_112 = arith.constant 1 : index
    %c0_113 = arith.constant 0 : index
    %c0_114 = arith.constant 0 : index
    %91 = vector.load %arg5[%c1_112, %c0_113, %c0_114] : memref<9x32x32xbf16, #tpu.memory_space<vmem>>, vector<1x32x32xbf16>
    %92 = vector.shape_cast %91 : vector<1x32x32xbf16> to vector<32x32xbf16>
    %cst_115 = arith.constant dense<0.000000e+00> : vector<16x8x32xf32>
    %93 = tpu.matmul %90, %92, %cst_115 {dimension_numbers = #tpu.dot_dimension_numbers<[2], [0], [0, 1], [1], [0, 0, 0, 1, 1, 1], [], []>} : vector<16x8x32xbf16>, vector<32x32xbf16>, vector<16x8x32xf32> -> vector<16x8x32xf32>
    %94 = arith.addf %87, %93 : vector<16x8x32xf32>
    %c0_116 = arith.constant 0 : index
    %c0_117 = arith.constant 0 : index
    %c2_118 = arith.constant 2 : index
    %c0_119 = arith.constant 0 : index
    %95 = vector.load %arg13[%c0_116, %c0_117, %c2_118, %c0_119] : memref<2x10x10x32xf32, #tpu.memory_space<vmem>>, vector<2x8x8x32xf32>
    %96 = arith.truncf %95 : vector<2x8x8x32xf32> to vector<2x8x8x32xbf16>
    %97 = vector.shape_cast %96 : vector<2x8x8x32xbf16> to vector<16x8x32xbf16>
    %c2_120 = arith.constant 2 : index
    %c0_121 = arith.constant 0 : index
    %c0_122 = arith.constant 0 : index
    %98 = vector.load %arg5[%c2_120, %c0_121, %c0_122] : memref<9x32x32xbf16, #tpu.memory_space<vmem>>, vector<1x32x32xbf16>
    %99 = vector.shape_cast %98 : vector<1x32x32xbf16> to vector<32x32xbf16>
    %cst_123 = arith.constant dense<0.000000e+00> : vector<16x8x32xf32>
    %100 = tpu.matmul %97, %99, %cst_123 {dimension_numbers = #tpu.dot_dimension_numbers<[2], [0], [0, 1], [1], [0, 0, 0, 1, 1, 1], [], []>} : vector<16x8x32xbf16>, vector<32x32xbf16>, vector<16x8x32xf32> -> vector<16x8x32xf32>
    %101 = arith.addf %94, %100 : vector<16x8x32xf32>
    %c0_124 = arith.constant 0 : index
    %c1_125 = arith.constant 1 : index
    %c0_126 = arith.constant 0 : index
    %c0_127 = arith.constant 0 : index
    %102 = vector.load %arg13[%c0_124, %c1_125, %c0_126, %c0_127] : memref<2x10x10x32xf32, #tpu.memory_space<vmem>>, vector<2x8x8x32xf32>
    %103 = arith.truncf %102 : vector<2x8x8x32xf32> to vector<2x8x8x32xbf16>
    %104 = vector.shape_cast %103 : vector<2x8x8x32xbf16> to vector<16x8x32xbf16>
    %c3_128 = arith.constant 3 : index
    %c0_129 = arith.constant 0 : index
    %c0_130 = arith.constant 0 : index
    %105 = vector.load %arg5[%c3_128, %c0_129, %c0_130] : memref<9x32x32xbf16, #tpu.memory_space<vmem>>, vector<1x32x32xbf16>
    %106 = vector.shape_cast %105 : vector<1x32x32xbf16> to vector<32x32xbf16>
    %cst_131 = arith.constant dense<0.000000e+00> : vector<16x8x32xf32>
    %107 = tpu.matmul %104, %106, %cst_131 {dimension_numbers = #tpu.dot_dimension_numbers<[2], [0], [0, 1], [1], [0, 0, 0, 1, 1, 1], [], []>} : vector<16x8x32xbf16>, vector<32x32xbf16>, vector<16x8x32xf32> -> vector<16x8x32xf32>
    %108 = arith.addf %101, %107 : vector<16x8x32xf32>
    %c0_132 = arith.constant 0 : index
    %c1_133 = arith.constant 1 : index
    %c1_134 = arith.constant 1 : index
    %c0_135 = arith.constant 0 : index
    %109 = vector.load %arg13[%c0_132, %c1_133, %c1_134, %c0_135] : memref<2x10x10x32xf32, #tpu.memory_space<vmem>>, vector<2x8x8x32xf32>
    %110 = arith.truncf %109 : vector<2x8x8x32xf32> to vector<2x8x8x32xbf16>
    %111 = vector.shape_cast %110 : vector<2x8x8x32xbf16> to vector<16x8x32xbf16>
    %c4_136 = arith.constant 4 : index
    %c0_137 = arith.constant 0 : index
    %c0_138 = arith.constant 0 : index
    %112 = vector.load %arg5[%c4_136, %c0_137, %c0_138] : memref<9x32x32xbf16, #tpu.memory_space<vmem>>, vector<1x32x32xbf16>
    %113 = vector.shape_cast %112 : vector<1x32x32xbf16> to vector<32x32xbf16>
    %cst_139 = arith.constant dense<0.000000e+00> : vector<16x8x32xf32>
    %114 = tpu.matmul %111, %113, %cst_139 {dimension_numbers = #tpu.dot_dimension_numbers<[2], [0], [0, 1], [1], [0, 0, 0, 1, 1, 1], [], []>} : vector<16x8x32xbf16>, vector<32x32xbf16>, vector<16x8x32xf32> -> vector<16x8x32xf32>
    %115 = arith.addf %108, %114 : vector<16x8x32xf32>
    %c0_140 = arith.constant 0 : index
    %c1_141 = arith.constant 1 : index
    %c2_142 = arith.constant 2 : index
    %c0_143 = arith.constant 0 : index
    %116 = vector.load %arg13[%c0_140, %c1_141, %c2_142, %c0_143] : memref<2x10x10x32xf32, #tpu.memory_space<vmem>>, vector<2x8x8x32xf32>
    %117 = arith.truncf %116 : vector<2x8x8x32xf32> to vector<2x8x8x32xbf16>
    %118 = vector.shape_cast %117 : vector<2x8x8x32xbf16> to vector<16x8x32xbf16>
    %c5_144 = arith.constant 5 : index
    %c0_145 = arith.constant 0 : index
    %c0_146 = arith.constant 0 : index
    %119 = vector.load %arg5[%c5_144, %c0_145, %c0_146] : memref<9x32x32xbf16, #tpu.memory_space<vmem>>, vector<1x32x32xbf16>
    %120 = vector.shape_cast %119 : vector<1x32x32xbf16> to vector<32x32xbf16>
    %cst_147 = arith.constant dense<0.000000e+00> : vector<16x8x32xf32>
    %121 = tpu.matmul %118, %120, %cst_147 {dimension_numbers = #tpu.dot_dimension_numbers<[2], [0], [0, 1], [1], [0, 0, 0, 1, 1, 1], [], []>} : vector<16x8x32xbf16>, vector<32x32xbf16>, vector<16x8x32xf32> -> vector<16x8x32xf32>
    %122 = arith.addf %115, %121 : vector<16x8x32xf32>
    %c0_148 = arith.constant 0 : index
    %c2_149 = arith.constant 2 : index
    %c0_150 = arith.constant 0 : index
    %c0_151 = arith.constant 0 : index
    %123 = vector.load %arg13[%c0_148, %c2_149, %c0_150, %c0_151] : memref<2x10x10x32xf32, #tpu.memory_space<vmem>>, vector<2x8x8x32xf32>
    %124 = arith.truncf %123 : vector<2x8x8x32xf32> to vector<2x8x8x32xbf16>
    %125 = vector.shape_cast %124 : vector<2x8x8x32xbf16> to vector<16x8x32xbf16>
    %c6_152 = arith.constant 6 : index
    %c0_153 = arith.constant 0 : index
    %c0_154 = arith.constant 0 : index
    %126 = vector.load %arg5[%c6_152, %c0_153, %c0_154] : memref<9x32x32xbf16, #tpu.memory_space<vmem>>, vector<1x32x32xbf16>
    %127 = vector.shape_cast %126 : vector<1x32x32xbf16> to vector<32x32xbf16>
    %cst_155 = arith.constant dense<0.000000e+00> : vector<16x8x32xf32>
    %128 = tpu.matmul %125, %127, %cst_155 {dimension_numbers = #tpu.dot_dimension_numbers<[2], [0], [0, 1], [1], [0, 0, 0, 1, 1, 1], [], []>} : vector<16x8x32xbf16>, vector<32x32xbf16>, vector<16x8x32xf32> -> vector<16x8x32xf32>
    %129 = arith.addf %122, %128 : vector<16x8x32xf32>
    %c0_156 = arith.constant 0 : index
    %c2_157 = arith.constant 2 : index
    %c1_158 = arith.constant 1 : index
    %c0_159 = arith.constant 0 : index
    %130 = vector.load %arg13[%c0_156, %c2_157, %c1_158, %c0_159] : memref<2x10x10x32xf32, #tpu.memory_space<vmem>>, vector<2x8x8x32xf32>
    %131 = arith.truncf %130 : vector<2x8x8x32xf32> to vector<2x8x8x32xbf16>
    %132 = vector.shape_cast %131 : vector<2x8x8x32xbf16> to vector<16x8x32xbf16>
    %c7_160 = arith.constant 7 : index
    %c0_161 = arith.constant 0 : index
    %c0_162 = arith.constant 0 : index
    %133 = vector.load %arg5[%c7_160, %c0_161, %c0_162] : memref<9x32x32xbf16, #tpu.memory_space<vmem>>, vector<1x32x32xbf16>
    %134 = vector.shape_cast %133 : vector<1x32x32xbf16> to vector<32x32xbf16>
    %cst_163 = arith.constant dense<0.000000e+00> : vector<16x8x32xf32>
    %135 = tpu.matmul %132, %134, %cst_163 {dimension_numbers = #tpu.dot_dimension_numbers<[2], [0], [0, 1], [1], [0, 0, 0, 1, 1, 1], [], []>} : vector<16x8x32xbf16>, vector<32x32xbf16>, vector<16x8x32xf32> -> vector<16x8x32xf32>
    %136 = arith.addf %129, %135 : vector<16x8x32xf32>
    %c0_164 = arith.constant 0 : index
    %c2_165 = arith.constant 2 : index
    %c2_166 = arith.constant 2 : index
    %c0_167 = arith.constant 0 : index
    %137 = vector.load %arg13[%c0_164, %c2_165, %c2_166, %c0_167] : memref<2x10x10x32xf32, #tpu.memory_space<vmem>>, vector<2x8x8x32xf32>
    %138 = arith.truncf %137 : vector<2x8x8x32xf32> to vector<2x8x8x32xbf16>
    %139 = vector.shape_cast %138 : vector<2x8x8x32xbf16> to vector<16x8x32xbf16>
    %c8_168 = arith.constant 8 : index
    %c0_169 = arith.constant 0 : index
    %c0_170 = arith.constant 0 : index
    %140 = vector.load %arg5[%c8_168, %c0_169, %c0_170] : memref<9x32x32xbf16, #tpu.memory_space<vmem>>, vector<1x32x32xbf16>
    %141 = vector.shape_cast %140 : vector<1x32x32xbf16> to vector<32x32xbf16>
    %cst_171 = arith.constant dense<0.000000e+00> : vector<16x8x32xf32>
    %142 = tpu.matmul %139, %141, %cst_171 {dimension_numbers = #tpu.dot_dimension_numbers<[2], [0], [0, 1], [1], [0, 0, 0, 1, 1, 1], [], []>} : vector<16x8x32xbf16>, vector<32x32xbf16>, vector<16x8x32xf32> -> vector<16x8x32xf32>
    %143 = arith.addf %136, %142 : vector<16x8x32xf32>
    %c0_172 = arith.constant 0 : index
    %c0_173 = arith.constant 0 : index
    %c0_174 = arith.constant 0 : index
    %144 = vector.load %arg6[%c0_172, %c0_173, %c0_174] : memref<1x1x32xf32, #tpu.memory_space<vmem>>, vector<1x1x32xf32>
    %145 = vector.broadcast %144 : vector<1x1x32xf32> to vector<16x8x32xf32>
    %146 = arith.mulf %143, %145 : vector<16x8x32xf32>
    %c0_175 = arith.constant 0 : index
    %c0_176 = arith.constant 0 : index
    %c0_177 = arith.constant 0 : index
    %147 = vector.load %arg7[%c0_175, %c0_176, %c0_177] : memref<1x1x32xf32, #tpu.memory_space<vmem>>, vector<1x1x32xf32>
    %148 = vector.broadcast %147 : vector<1x1x32xf32> to vector<16x8x32xf32>
    %149 = arith.addf %146, %148 : vector<16x8x32xf32>
    %150 = vector.shape_cast %149 : vector<16x8x32xf32> to vector<2x8x8x32xf32>
    %cst_178 = arith.constant dense<0.000000e+00> : vector<2x32xf32>
    %151 = vector.multi_reduction <add>, %150, %cst_178 [1, 2] : vector<2x8x8x32xf32> to vector<2x32xf32>
    %152 = vector.shape_cast %151 : vector<2x32xf32> to vector<2x1x1x32xf32>
    %cst_179 = arith.constant 6.400000e+01 : f32
    %153 = vector.broadcast %cst_179 : f32 to vector<2x1x1x32xf32>
    %154 = arith.divf %152, %153 : vector<2x1x1x32xf32>
    %c0_180 = arith.constant 0 : index
    %c0_181 = arith.constant 0 : index
    %c0_182 = arith.constant 0 : index
    %c0_183 = arith.constant 0 : index
    %155 = vector.load %arg8[%c0_180, %c0_181, %c0_182, %c0_183] : memref<1x1x2x32xf32, #tpu.memory_space<vmem>>, vector<1x1x2x32xf32>
    %156 = vector.broadcast %154 : vector<2x1x1x32xf32> to vector<2x1x2x32xf32>
    %157 = vector.broadcast %155 : vector<1x1x2x32xf32> to vector<2x1x2x32xf32>
    %158 = arith.mulf %156, %157 : vector<2x1x2x32xf32>
    %cst_184 = arith.constant dense<0.000000e+00> : vector<2x1x2xf32>
    %159 = vector.multi_reduction <add>, %158, %cst_184 [3] : vector<2x1x2x32xf32> to vector<2x1x2xf32>
    %160 = vector.shape_cast %159 : vector<2x1x2xf32> to vector<2x1x2x1xf32>
    %c0_185 = arith.constant 0 : index
    %c0_186 = arith.constant 0 : index
    %c0_187 = arith.constant 0 : index
    %c0_188 = arith.constant 0 : index
    %161 = vector.load %arg9[%c0_185, %c0_186, %c0_187, %c0_188] : memref<1x1x2x1xf32, #tpu.memory_space<vmem>>, vector<1x1x2x1xf32>
    %162 = vector.broadcast %161 : vector<1x1x2x1xf32> to vector<2x1x2x1xf32>
    %163 = arith.addf %160, %162 : vector<2x1x2x1xf32>
    %cst_189 = arith.constant 0.000000e+00 : f32
    %164 = vector.broadcast %cst_189 : f32 to vector<2x1x2x1xf32>
    %165 = arith.maximumf %163, %164 : vector<2x1x2x1xf32>
    %c0_190 = arith.constant 0 : index
    %c0_191 = arith.constant 0 : index
    %c0_192 = arith.constant 0 : index
    %c0_193 = arith.constant 0 : index
    %166 = vector.load %arg10[%c0_190, %c0_191, %c0_192, %c0_193] : memref<1x1x2x32xf32, #tpu.memory_space<vmem>>, vector<1x1x2x32xf32>
    %167 = vector.broadcast %165 : vector<2x1x2x1xf32> to vector<2x1x2x32xf32>
    %168 = vector.broadcast %166 : vector<1x1x2x32xf32> to vector<2x1x2x32xf32>
    %169 = arith.mulf %167, %168 : vector<2x1x2x32xf32>
    %cst_194 = arith.constant dense<0.000000e+00> : vector<2x1x32xf32>
    %170 = vector.multi_reduction <add>, %169, %cst_194 [2] : vector<2x1x2x32xf32> to vector<2x1x32xf32>
    %171 = vector.shape_cast %170 : vector<2x1x32xf32> to vector<2x1x1x32xf32>
    %c0_195 = arith.constant 0 : index
    %c0_196 = arith.constant 0 : index
    %c0_197 = arith.constant 0 : index
    %c0_198 = arith.constant 0 : index
    %172 = vector.load %arg11[%c0_195, %c0_196, %c0_197, %c0_198] : memref<1x1x1x32xf32, #tpu.memory_space<vmem>>, vector<1x1x1x32xf32>
    %173 = vector.broadcast %172 : vector<1x1x1x32xf32> to vector<2x1x1x32xf32>
    %174 = arith.addf %171, %173 : vector<2x1x1x32xf32>
    %175 = arith.negf %174 : vector<2x1x1x32xf32>
    %176 = math.exp %175 : vector<2x1x1x32xf32>
    %cst_199 = arith.constant 1.000000e+00 : f32
    %177 = vector.broadcast %cst_199 : f32 to vector<2x1x1x32xf32>
    %178 = arith.addf %177, %176 : vector<2x1x1x32xf32>
    %179 = arith.divf %177, %178 : vector<2x1x1x32xf32>
    %180 = vector.broadcast %179 : vector<2x1x1x32xf32> to vector<2x8x8x32xf32>
    %181 = arith.mulf %150, %180 : vector<2x8x8x32xf32>
    %c0_200 = arith.constant 0 : index
    %c0_201 = arith.constant 0 : index
    %c0_202 = arith.constant 0 : index
    %c0_203 = arith.constant 0 : index
    %182 = vector.load %arg1[%c0_200, %c0_201, %c0_202, %c0_203] : memref<2x8x8x32xf32, #tpu.memory_space<vmem>>, vector<2x8x8x32xf32>
    %183 = arith.addf %181, %182 : vector<2x8x8x32xf32>
    %cst_204 = arith.constant 0.000000e+00 : f32
    %184 = vector.broadcast %cst_204 : f32 to vector<2x8x8x32xf32>
    %185 = arith.maximumf %183, %184 : vector<2x8x8x32xf32>
    %c0_205 = arith.constant 0 : index
    %c0_206 = arith.constant 0 : index
    %c0_207 = arith.constant 0 : index
    %c0_208 = arith.constant 0 : index
    %186 = vector.load %arg12[%c0_205, %c0_206, %c0_207, %c0_208] : memref<2x8x8x32xf32, #tpu.memory_space<vmem>>, vector<2x8x8x32xf32>
    tpu.vector_store %arg12[%c0_205, %c0_206, %c0_207, %c0_208], %185 {strides = array<i32>} : memref<2x8x8x32xf32, #tpu.memory_space<vmem>>, vector<2x8x8x32xf32>,
    return
  }
  func.func @transform_0(%arg0: i32) -> (i32, i32, i32, i32) {
    %c0_i32 = arith.constant 0 : i32
    %c0_i32_0 = arith.constant 0 : i32
    %c0_i32_1 = arith.constant 0 : i32
    %c0_i32_2 = arith.constant 0 : i32
    return %arg0, %c0_i32, %c0_i32_0, %c0_i32_1 : i32, i32, i32, i32
  }
  func.func @transform_1(%arg0: i32) -> (i32, i32, i32) {
    %c0_i32 = arith.constant 0 : i32
    %c0_i32_0 = arith.constant 0 : i32
    %c0_i32_1 = arith.constant 0 : i32
    %c0_i32_2 = arith.constant 0 : i32
    return %c0_i32, %c0_i32_0, %c0_i32_1 : i32, i32, i32
  }
  func.func @transform_2(%arg0: i32) -> (i32, i32, i32) {
    %c0_i32 = arith.constant 0 : i32
    %c0_i32_0 = arith.constant 0 : i32
    %c0_i32_1 = arith.constant 0 : i32
    %c0_i32_2 = arith.constant 0 : i32
    return %c0_i32, %c0_i32_0, %c0_i32_1 : i32, i32, i32
  }
  func.func @transform_3(%arg0: i32) -> (i32, i32, i32) {
    %c0_i32 = arith.constant 0 : i32
    %c0_i32_0 = arith.constant 0 : i32
    %c0_i32_1 = arith.constant 0 : i32
    %c0_i32_2 = arith.constant 0 : i32
    return %c0_i32, %c0_i32_0, %c0_i32_1 : i32, i32, i32
  }
  func.func @transform_4(%arg0: i32) -> (i32, i32, i32) {
    %c0_i32 = arith.constant 0 : i32
    %c0_i32_0 = arith.constant 0 : i32
    %c0_i32_1 = arith.constant 0 : i32
    %c0_i32_2 = arith.constant 0 : i32
    return %c0_i32, %c0_i32_0, %c0_i32_1 : i32, i32, i32
  }
  func.func @transform_5(%arg0: i32) -> (i32, i32, i32) {
    %c0_i32 = arith.constant 0 : i32
    %c0_i32_0 = arith.constant 0 : i32
    %c0_i32_1 = arith.constant 0 : i32
    %c0_i32_2 = arith.constant 0 : i32
    return %c0_i32, %c0_i32_0, %c0_i32_1 : i32, i32, i32
  }
  func.func @transform_6(%arg0: i32) -> (i32, i32, i32) {
    %c0_i32 = arith.constant 0 : i32
    %c0_i32_0 = arith.constant 0 : i32
    %c0_i32_1 = arith.constant 0 : i32
    %c0_i32_2 = arith.constant 0 : i32
    return %c0_i32, %c0_i32_0, %c0_i32_1 : i32, i32, i32
  }
  func.func @transform_7(%arg0: i32) -> (i32, i32, i32, i32) {
    %c0_i32 = arith.constant 0 : i32
    %c0_i32_0 = arith.constant 0 : i32
    %c0_i32_1 = arith.constant 0 : i32
    %c0_i32_2 = arith.constant 0 : i32
    %c0_i32_3 = arith.constant 0 : i32
    return %c0_i32, %c0_i32_0, %c0_i32_1, %c0_i32_2 : i32, i32, i32, i32
  }
  func.func @transform_8(%arg0: i32) -> (i32, i32, i32, i32) {
    %c0_i32 = arith.constant 0 : i32
    %c0_i32_0 = arith.constant 0 : i32
    %c0_i32_1 = arith.constant 0 : i32
    %c0_i32_2 = arith.constant 0 : i32
    %c0_i32_3 = arith.constant 0 : i32
    return %c0_i32, %c0_i32_0, %c0_i32_1, %c0_i32_2 : i32, i32, i32, i32
  }
  func.func @transform_9(%arg0: i32) -> (i32, i32, i32, i32) {
    %c0_i32 = arith.constant 0 : i32
    %c0_i32_0 = arith.constant 0 : i32
    %c0_i32_1 = arith.constant 0 : i32
    %c0_i32_2 = arith.constant 0 : i32
    %c0_i32_3 = arith.constant 0 : i32
    return %c0_i32, %c0_i32_0, %c0_i32_1, %c0_i32_2 : i32, i32, i32, i32
  }
  func.func @transform_10(%arg0: i32) -> (i32, i32, i32, i32) {
    %c0_i32 = arith.constant 0 : i32
    %c0_i32_0 = arith.constant 0 : i32
    %c0_i32_1 = arith.constant 0 : i32
    %c0_i32_2 = arith.constant 0 : i32
    %c0_i32_3 = arith.constant 0 : i32
    return %c0_i32, %c0_i32_0, %c0_i32_1, %c0_i32_2 : i32, i32, i32, i32
  }
  func.func @transform_11(%arg0: i32) -> (i32, i32, i32, i32) {
    %c0_i32 = arith.constant 0 : i32
    %c0_i32_0 = arith.constant 0 : i32
    %c0_i32_1 = arith.constant 0 : i32
    %c0_i32_2 = arith.constant 0 : i32
    return %arg0, %c0_i32, %c0_i32_0, %c0_i32_1 : i32, i32, i32, i32
  }
}

</mosaic_0001>

<bundles_post_ra>
// kernel: tpu_custom_call.1
= control target key start
LH: loop header
LB: loop body
LE: loop exit
PB: predicated region body
PF: predicated region fallthrough
CT: control target
= control target key end

     0   :  { %s6157_s0 = inlined_call_operand.hbm [shape: f32[4,8,8,32], index: 0, kind: input, shape index: {}]   ;;  %s6158_s1 = inlined_call_operand.hbm [shape: bf16[9,32,32], index: 1, kind: input, shape index: {}]   ;;  %s6159_s2 = inlined_call_operand.vmem [shape: f32[1,1,32], index: 2, kind: input, shape index: {}]   ;;  %s6160_s3 = inlined_call_operand.hbm [shape: f32[1,1,32], index: 3, kind: input, shape index: {}]   ;;  %s6161_s4 = inlined_call_operand.hbm [shape: bf16[9,32,32], index: 4, kind: input, shape index: {}]   ;;  %s6162_s5 = inlined_call_operand.vmem [shape: f32[1,1,32], index: 5, kind: input, shape index: {}]   ;;  %s6163_s6 = inlined_call_operand.vmem [shape: f32[1,1,32], index: 6, kind: input, shape index: {}]   ;;  %s6164_s7 = inlined_call_operand.vmem [shape: f32[1,1,2,32], index: 7, kind: input, shape index: {}]   ;;  %s6165_s8 = inlined_call_operand.vmem [shape: f32[1,1,2,1], index: 8, kind: input, shape index: {}]   ;;  %s6166_s9 = inlined_call_operand.vmem [shape: f32[1,1,2,32], index: 9, kind: input, shape index: {}]   ;;  %s6167_s10 = inlined_call_operand.vmem [shape: f32[1,1,1,32], index: 10, kind: input, shape index: {}]   ;;  %s6168_s11 = inlined_call_operand.hbm [shape: f32[4,8,8,32], index: 11, kind: output, shape index: {}]  }
   0x1   :  { %6170 = sst [smem:[#allocation18_spill]] %s6158_s1 }
   0x2   :  { %6171 = sst [smem:[#allocation19_spill]] %s6160_s3 }
   0x3   :  { %6172 = sst [smem:[#allocation20_spill]] %s6161_s4 }
   0x4   :  { %16 = vsyncpa [#allocation4], 0 }
   0x5   :  { %18 = vsyncpa [#allocation4 + $0x1], 0 }
   0x6   :  { %19 = vsyncpa [#allocation7], 0 }
   0x7   :  { %20 = vsyncpa [#allocation10], 0 }
   0x8   :  { %21 = vsyncpa [#allocation5], 0 }
   0x9   :  { %23 = vsyncpa [#allocation5 + $0x1], 0  ;;  %s4847_s17 = smov 0   ;;  %s4849_s18 = smov 0  }
   0xa   :  { %s4851_s19 = smov 0   ;;  %s4853_s20 = smov 0  }
   0xb LB: > { %6173 = sst [smem:[#allocation16_spill]] %s4769_s19  ;;  %s4868_s21 = sadd.s32 4294967295, %s4773_s20   ;;  %s4773_s20 = sphi %s4853_s20, %s6191_s20   ;;  %s4769_s19 = sphi %s4851_s19, %s6188_s19   ;;  %s4765_s18 = sphi %s4849_s18, %s6190_s18   ;;  %s4761_s17 = sphi %s4847_s17, %s6189_s17  }
   0xc   : > { %s4121_s22 = sadd.s32 4294967294, %s4773_s20   ;;  %p49_p0 = scmp.ne.s32.totalorder %s4765_s18, %s4761_s17 }
   0xd   : > { %p50_p1 = scmp.eq.s32.totalorder %s4868_s21, 0  ;;  %p283_p2 = scmp.eq.s32.totalorder %s4868_s21, 1 }
   0xe   : > { %p289_p3 = scmp.eq.s32.totalorder %s4121_s22, 1  ;;  %p4122_p5 = scmp.ge.s32.totalorder %s4773_s20, 1 }
   0xf   : > { %p4877_p4 = por %p50_p1, %p49_p0  ;;  %p296_p7 = scmp.lt.s32.totalorder %s4773_s20, 3 }
  0x10   : > { %p4882_p6 = por %p289_p3, %p49_p0  ;;  %s6176_s1 = sld [smem:[#allocation18_spill]] }
  0x11   : > { %p4890_p8 = pnand %p4122_p5, %p296_p7  ;;  %s4775_s29 = smov [#allocation6]  }
  0x12   : > { %s309_s30 = sshll.u32 %s4775_s29, 4  ;;  %s6179_s3 = sld [smem:[#allocation19_spill]]  ;;  %s310_s30 = int_to_ptr.vmem [resolvable:$true] %s309_s30 }
  0x13   : > { %p4493_p9 = pneg %p4890_p8  ;;  %s4776_s16 = smov 64  }
  0x14   : > { %s4777_s22 = smov 4   ;;  %s4778_s25 = smov [#allocation8]  }
  0x15   : > { %p4898_p10 = pnand %p4493_p9, %p50_p1  ;;  %s327_s26 = sshll.u32 %s4778_s25, 4  ;;  %s328_s26 = int_to_ptr.vmem [resolvable:$true] %s327_s26 }
  0x16   : > { %s307_s27 = sshll.u32 %s6176_s1, 4  ;;  %s6180_s4 = sld [smem:[#allocation20_spill]]  ;;  %s308_s27 = int_to_ptr.hbm [resolvable:$true] %s307_s27 }
  0x17   : > { %4496 = dma.hbm_to_vmem [thread:$0]  (!%p4898_p10), %s308_s27, 2304, %s310_s30, [#allocation7], %s4776_s16, %s4776_s16, %s4777_s22  }
  0x18   : > { %s325_s15 = sshll.u32 %s6179_s3, 4  ;;  %s4779_s14 = smov [#allocation9]   ;;  %s326_s15 = int_to_ptr.hbm [resolvable:$true] %s325_s15 }
  0x19   : > { %4499 = dma.hbm_to_vmem [thread:$0]  (!%p4898_p10), %s326_s15, 16, %s328_s26, [#allocation7]  }
  0x1a   : > { %s338_s3 = sshll.u32 %s4779_s14, 4  ;;  %s4914_s27 = sadd.s32 1, %s4773_s20   ;;  %s339_s3 = int_to_ptr.vmem [resolvable:$true] %s338_s3 }
  0x1b   : > { %s33_s30 = ssub.s32 %s4773_s20, %s4914_s27  ;;  %s36_s25 = sadd.s32 1, %s4769_s19 }
  0x1c   : > { %s336_s13 = sshll.u32 %s6180_s4, 4  ;;  %p34_p12 = scmp.eq.s32.totalorder %s33_s30, 0  ;;  %s337_s13 = int_to_ptr.hbm [resolvable:$true] %s336_s13 }
  0x1d   : > { %4502 = dma.hbm_to_vmem [thread:$0]  (!%p4898_p10), %s337_s13, 2304, %s339_s3, [#allocation10], %s4776_s16, %s4776_s16, %s4777_s22  }
  0x1e   : > { %p43_p13 = scmp.ne.s32.totalorder %s4769_s19, %s4765_s18  ;;  %p44_p0 = scmp.eq.s32.totalorder %s4773_s20, 0 }
  0x1f   : > { %p4514_p3 = scmp.lt.s32.totalorder %s4773_s20, 2  ;;  %s370_s26 = sand.u32 1, %s4769_s19  }
  0x20   : > { %s4926_s1 = scalar_select %p34_p12, %s4769_s19, %s36_s25  }
  0x21   : > { %p45_p5 = por %p44_p0, %p43_p13  ;;  %p4930_p7 = por %p283_p2, %p43_p13 }
  0x22   : > { %6181 = sst [smem:[#allocation17_spill]] %s4926_s1  ;;  %s4434_s29 = sshll.u32 %s4773_s20, 7 }
  0x23   : > { %s4127_s12 = sshll.u32 %s370_s26, 7  ;;  %s380_s16 = scalar_lea.hbm %s6157_s0, %s4434_s29 }
  0x24   : > { %s381_s22 = sshll.u32 %s380_s16, 4  ;;  %s374_s13 = scalar_lea.vmem [#allocation3], %s4127_s12  ;;  %s382_s22 = int_to_ptr.hbm [resolvable:$true] %s381_s22 }
  0x25   : > { %s383_s30 = sshll.u32 %s374_s13, 4  ;;  %p4941_p9 = pnand %p4514_p3, %p45_p5  ;;  %s384_s30 = int_to_ptr.vmem [resolvable:$true] %s383_s30 }
  0x26   : > { %s371_s4 = scalar_lea.sflag [#allocation4], %s370_s26  ;;  %s4669_s1 = sshra.s32 %s382_s22, 4  ;;  %s4670_s1 = int_to_ptr.hbm [resolvable:$true] %s4669_s1 }
  0x27   : > { %s4671_s19 = scalar_lea.hbm %s4670_s1, 128  ;;  %p4673_p10 = pneg %p4941_p9 }
  0x28   : > { %p4672_p2 = scmp.ne.s32.totalorder %s4670_s1, %s4671_s19  ;;  %s4676_s14 = scalar_lea.hbm %s6157_s0, 256 }
  0x29   : > { %p4677_p0 = scmp.lt.s32.totalorder %s4670_s1, %s6157_s0  ;;  %p4678_p3 = scmp.lt.s32.totalorder %s4676_s14, %s4671_s19 }
  0x2a   : > { %p4674_p12 = pnand %p4673_p10, %p4672_p2 }
  0x2b   : > { %p4679_p5 = por %p4678_p3, %p4677_p0 }
  0x2c   : > { %p4675_p13 = pneg %p4674_p12 }
  0x2e   : > { %p4680_p11 = pnand %p4679_p5, %p4675_p13 }
  0x30   : > { %4683 = shalt.err (!%p4680_p11)
}
  0x31   : > { %s4780_s26 = smov 128   ;;  %s4781_s13 = smov 8  }
  0x32   : > { %4506 = dma.hbm_to_vmem [thread:$0]  (!%p4941_p9), %s382_s22, 2048, %s384_s30, %s371_s4, %s4780_s26, %s4780_s26, %s4781_s13  }
  0x33   : > { %395 = sbr.rel (%p4890_p8) target bundleno = 1284 (0x504), region = 64  ;;  %s4958_s29 = sand.u32 (!%p4890_p8), 1, %s4765_s18  }
  0x34   : > { %s4132_s1 = sshll.u32 (!%p4890_p8), %s4958_s29, 7  ;;  %s398_s19 = scalar_lea.sflag (!%p4890_p8), [#allocation4], %s4958_s29 }
  0x35   : > { %s4964_s12 = scalar_lea.vmem (!%p4890_p8), [#allocation3], %s4132_s1 }
  0x38   : > { %4744 = dma.done.wait (%p4877_p4), %s398_s19, 2048  }
  0x39   : > { %4746 = vsyncadd (%p4877_p4), %s398_s19, 4294965248 }
  0x3a   : > { %4748 = dma.done.wait (%p50_p1), [#allocation7], 2320  }
  0x3b   : > { %4750 = vsyncadd (%p50_p1), [#allocation7], 4294964976 }
  0x3c   : > { %4752 = dma.done.wait (%p50_p1), [#allocation10], 2304  }
  0x3d   : > { %4754 = vsyncadd (%p50_p1), [#allocation10], 4294964992  ;;  %vm459_vm0 = vcmask 261120   ;;  %vm461_vm1 = vcmask 254976   ;;  %v4782_v0 = vmov 0.0   ;;  %v4438_v1 = vld [vmem:[#allocation6 + $0x18] sm:$0xff] }
  0x3e   : > { %463 = vst.msk [vmem:[#allocation2 + $0xa0] sm:$0xff] %vm459_vm0, %v4782_v0  ;;  %v4436_v2 = vld [vmem:[#allocation6 + $0x8] sm:$0xff]  ;;  %vm471_vm2 = vcmask 253952   ;;  %v512_v3 = vld [vmem:[%s4964_s12 + $0x40] sm:$0xff]  ;;  %4473 = vmatpush.bf16.msra.mxu2 %v4438_v1  ;;  %v4437_v4 = vld [vmem:[#allocation6 + $0x10] sm:$0xff]  ;;  %691 = vmatpush.bf16.msra.mxu0 %v4438_v1  ;;  %s6070_s28 = scalar_lea.vmem [#allocation11], %s4132_s1 }
  0x3f   : > { %464 = vst.msk [vmem:[#allocation2 + $0xa8] sm:$0x3] %vm461_vm1, %v4782_v0  ;;  %4475 = vmatpush.bf16.msra.mxu3 %v4436_v2  ;;  %v4435_v5 = vld [vmem:[#allocation6] sm:$0xff]  ;;  %816 = vmatpush.bf16.msra.mxu1 %v4436_v2  ;;  %v4440_v8 = vld [vmem:[#allocation6 + $0x28] sm:$0xff]  ;;  %v4442_v21 = vld [vmem:[#allocation6 + $0x38] sm:$0xff]  ;;  %s4472_s1 = sshll.u32 %s4868_s21, 7 }
  0x40   : > { %460 = vst.msk [vmem:[#allocation2] sm:$0xff] %vm459_vm0, %v4782_v0  ;;  %v4444_v22 = vld [vmem:[#allocation6 + $0x48] sm:$0xff]  ;;  %v504_v23 = vld [vmem:[%s4964_s12] sm:$0xff]  ;;  %v514_v25 = vld [vmem:[%s4964_s12 + $0x50] sm:$0xff]  ;;  %s4015_s21 = scalar_lea.hbm %s6168_s11, %s4472_s1  ;;  %s4003_s14 = scalar_lea.sflag [#allocation5], %s4958_s29 }
  0x41   : > { %462 = vst.msk [vmem:[#allocation2 + $0x8] sm:$0x3] %vm461_vm1, %v4782_v0  ;;  %v513_v24 = vld [vmem:[%s4964_s12 + $0x48] sm:$0xff]  ;;  %v4439_v27 = vld [vmem:[#allocation6 + $0x20] sm:$0xff]  ;;  %v506_v30 = vld [vmem:[%s4964_s12 + $0x10] sm:$0xff]  ;;  %s4018_s25 = sshll.u32 %s4015_s21, 4  ;;  %s4019_s25 = int_to_ptr.hbm [resolvable:$true] %s4018_s25 }
  0x42   : > { %466 = vst.msk [vmem:[#allocation2 + $0x90] sm:$0xff] %vm459_vm0, %v4782_v0  ;;  %4474 = vmatpush.bf16.msra.mxu2 %v4437_v4  ;;  %692 = vmatpush.bf16.msra.mxu0 %v4437_v4  ;;  %v505_v26 = vld [vmem:[%s4964_s12 + $0x8] sm:$0xff]  ;;  %v515_v31 = vld [vmem:[%s4964_s12 + $0x58] sm:$0xff]  ;;  %v516_v32 = vld [vmem:[%s4964_s12 + $0x60] sm:$0xff]  ;;  %s4713_s3 = sshra.s32 %s4019_s25, 4  ;;  %s4719_s19 = scalar_lea.hbm %s6168_s11, 256  ;;  %s4714_s3 = int_to_ptr.hbm [resolvable:$true] %s4713_s3 }
  0x43   : > { %467 = vst.msk [vmem:[#allocation2 + $0x98] sm:$0x3] %vm461_vm1, %v4782_v0  ;;  %4476 = vmatpush.bf16.msra.mxu3 %v4435_v5  ;;  %817 = vmatpush.bf16.msra.mxu1 %v4435_v5  ;;  %v507_v35 = vld [vmem:[%s4964_s12 + $0x18] sm:$0xff]  ;;  %v508_v36 = vld [vmem:[%s4964_s12 + $0x20] sm:$0xff]  ;;  %v517_v60 = vld [vmem:[%s4964_s12 + $0x68] sm:$0xff]  ;;  %s4715_s16 = scalar_lea.hbm %s4714_s3, 128  ;;  %p4720_p11 = scmp.lt.s32.totalorder %s4714_s3, %s6168_s11 }
  0x44   : > { %468 = vst.msk [vmem:[#allocation2 + $0x130] sm:$0xff] %vm459_vm0, %v4782_v0  ;;  %v4441_v1 = vld [vmem:[#allocation6 + $0x30] sm:$0xff]  ;;  %v4443_v4 = vld [vmem:[#allocation6 + $0x40] sm:$0xff]  ;;  %p4716_p1 = scmp.ne.s32.totalorder %s4714_s3, %s4715_s16  ;;  %p4721_p9 = scmp.lt.s32.totalorder %s4719_s19, %s4715_s16 }
  0x45   : > { %469 = vst.msk [vmem:[#allocation2 + $0x138] sm:$0x3] %vm461_vm1, %v4782_v0  ;;  %v544_v7 = vld [vmem:[#allocation2 + $0xa0] sm:$0xff]  ;;  %v518_v5 = vld [vmem:[%s4964_s12 + $0x70] sm:$0xff] }
  0x46   : > { %528 = vst.msk [vmem:[#allocation2 + $0xb1] sm:$0xff] %vm459_vm0, %v512_v3  ;;  %v580_v6 = vld [vmem:[#allocation2 + $0xa1] sm:$0xff]  ;;  %v560_v10 = vpack.c.bf16 %v544_v7, %v544_v7  ;;  %978 = vmatpush.bf16.msrb.mxu2 %v4440_v8  ;;  %1334 = vmatpush.bf16.msrb.mxu0 %v4444_v22  ;;  %v510_v7 = vld [vmem:[%s4964_s12 + $0x30] sm:$0xff]  ;;  %p4717_p4 = pnand %p4716_p1, %p4930_p7  ;;  %p4722_p2 = por %p4721_p9, %p4720_p11 }
  0x47   : > { %480 = vst.msk [vmem:[#allocation2 + $0xb0] sm:$0x1] %vm471_vm2, %v4782_v0  ;;  %v596_v9 = vpack.c.bf16 %v580_v6, %v580_v6  ;;  %1156 = vmatpush.bf16.msrb.mxu3 %v4442_v21  ;;  %v536_v29 = vld [vmem:[#allocation2] sm:$0xff]  ;;  %v509_v6 = vld [vmem:[%s4964_s12 + $0x28] sm:$0xff] }
  0x48   : > { %472 = vst.msk [vmem:[#allocation2 + $0x10] sm:$0x1] %vm471_vm2, %v4782_v0  ;;  %v758_v16 = vunpack.c.l.b16 %v560_v10  ;;  %v572_v28 = vld [vmem:[#allocation2 + $0x1] sm:$0xff]  ;;  %v552_v34 = vpack.c.bf16 %v536_v29, %v536_v29  ;;  %p4718_p8 = pneg %p4717_p4 }
  0x49   : > { %473 = vst.msk [vmem:[#allocation2 + $0x20] sm:$0x1] %vm471_vm2, %v4782_v0  ;;  %v633_v13 = vunpack.c.l.b16 %v596_v9  ;;  %v588_v33 = vpack.c.bf16 %v572_v28, %v572_v28 }
  0x4a   : > { %474 = vst.msk [vmem:[#allocation2 + $0x30] sm:$0x1] %vm471_vm2, %v4782_v0  ;;  %979 = vmatpush.bf16.msrb.mxu2 %v4439_v27  ;;  %v750_v42 = vunpack.c.l.b16 %v552_v34  ;;  %1335 = vmatpush.bf16.msrb.mxu0 %v4443_v4  ;;  %p4723_p10 = pnand %p4722_p2, %p4718_p8 }
  0x4b   : > { %475 = vst.msk [vmem:[#allocation2 + $0x40] sm:$0x1] %vm471_vm2, %v4782_v0  ;;  %v625_v40 = vunpack.c.l.b16 %v588_v33  ;;  %1157 = vmatpush.bf16.msrb.mxu3 %v4441_v1 }
  0x4c   : > { %476 = vst.msk [vmem:[#allocation2 + $0x50] sm:$0x1] %vm471_vm2, %v4782_v0 }
  0x4d   : > { %v581_v11 = vld [vmem:[#allocation2 + $0xb1] sm:$0xff]  ;;  %477 = vst.msk [vmem:[#allocation2 + $0x60] sm:$0x1] %vm471_vm2, %v4782_v0 }
  0x4e   : > { %v597_v12 = vpack.c.bf16 %v581_v11, %v581_v11  ;;  %v545_v14 = vld [vmem:[#allocation2 + $0xb0] sm:$0xff]  ;;  %478 = vst.msk [vmem:[#allocation2 + $0x70] sm:$0x1] %vm471_vm2, %v4782_v0 }
  0x4f   : > { %v561_v15 = vpack.c.bf16 %v545_v14, %v545_v14  ;;  %479 = vst.msk [vmem:[#allocation2 + $0x80] sm:$0x1] %vm471_vm2, %v4782_v0 }
  0x50   : > { %v5014_v17 = vunpack.c.l.b16 %v597_v12  ;;  %481 = vst.msk [vmem:[#allocation2 + $0xc0] sm:$0x1] %vm471_vm2, %v4782_v0 }
  0x51   : > { %v5018_v18 = vunpack.c.l.b16 %v561_v15  ;;  %482 = vst.msk [vmem:[#allocation2 + $0xd0] sm:$0x1] %vm471_vm2, %v4782_v0 }
  0x52   : > { %v645_v19 = vpack.c.b16 %v5014_v17, %v633_v13  ;;  %483 = vst.msk [vmem:[#allocation2 + $0xe0] sm:$0x1] %vm471_vm2, %v4782_v0 }
  0x53   : > { %v770_v20 = vpack.c.b16 %v5018_v18, %v758_v16  ;;  %484 = vst.msk [vmem:[#allocation2 + $0xf0] sm:$0x1] %vm471_vm2, %v4782_v0 }
  0x54   : > { %4149 = vmatmul.msk.bf16.vlgmr.msra.gmra.mxu2 %vm459_vm0, %v645_v19  ;;  %485 = vst.msk [vmem:[#allocation2 + $0x100] sm:$0x1] %vm471_vm2, %v4782_v0 }
  0x55   : > { %4165 = vmatmul.msk.bf16.vlgmr.msra.gmra.mxu3 %vm459_vm0, %v770_v20  ;;  %486 = vst.msk [vmem:[#allocation2 + $0x110] sm:$0x1] %vm471_vm2, %v4782_v0 }
  0x56   : > { %487 = vst.msk [vmem:[#allocation2 + $0x120] sm:$0x1] %vm471_vm2, %v4782_v0 }
  0x57   : > { %488 = vst.msk [vmem:[#allocation2 + $0x19] sm:$0x1] %vm471_vm2, %v4782_v0 }
  0x58   : > { %489 = vst.msk [vmem:[#allocation2 + $0x29] sm:$0x1] %vm471_vm2, %v4782_v0 }
  0x59   : > { %490 = vst.msk [vmem:[#allocation2 + $0x39] sm:$0x1] %vm471_vm2, %v4782_v0 }
  0x5a   : > { %491 = vst.msk [vmem:[#allocation2 + $0x49] sm:$0x1] %vm471_vm2, %v4782_v0 }
  0x5b   : > { %492 = vst.msk [vmem:[#allocation2 + $0x59] sm:$0x1] %vm471_vm2, %v4782_v0 }
  0x5c   : > { %493 = vst.msk [vmem:[#allocation2 + $0x69] sm:$0x1] %vm471_vm2, %v4782_v0 }
  0x5d   : > { %494 = vst.msk [vmem:[#allocation2 + $0x79] sm:$0x1] %vm471_vm2, %v4782_v0 }
  0x5e   : > { %495 = vst.msk [vmem:[#allocation2 + $0x89] sm:$0x1] %vm471_vm2, %v4782_v0 }
  0x5f   : > { %496 = vst.msk [vmem:[#allocation2 + $0xb9] sm:$0x1] %vm471_vm2, %v4782_v0 }
  0x60   : > { %497 = vst.msk [vmem:[#allocation2 + $0xc9] sm:$0x1] %vm471_vm2, %v4782_v0 }
  0x61   : > { %498 = vst.msk [vmem:[#allocation2 + $0xd9] sm:$0x1] %vm471_vm2, %v4782_v0 }
  0x62   : > { %499 = vst.msk [vmem:[#allocation2 + $0xe9] sm:$0x1] %vm471_vm2, %v4782_v0 }
  0x63   : > { %500 = vst.msk [vmem:[#allocation2 + $0xf9] sm:$0x1] %vm471_vm2, %v4782_v0 }
  0x64   : > { %501 = vst.msk [vmem:[#allocation2 + $0x109] sm:$0x1] %vm471_vm2, %v4782_v0 }
  0x65   : > { %502 = vst.msk [vmem:[#allocation2 + $0x119] sm:$0x1] %vm471_vm2, %v4782_v0 }
  0x66   : > { %503 = vst.msk [vmem:[#allocation2 + $0x129] sm:$0x1] %vm471_vm2, %v4782_v0 }
  0x67   : > { %520 = vst.msk [vmem:[#allocation2 + $0x11] sm:$0xff] %vm459_vm0, %v504_v23 }
  0x68   : > { %529 = vst.msk [vmem:[#allocation2 + $0xc1] sm:$0xff] %vm459_vm0, %v513_v24 }
  0x69   : > { %530 = vst.msk [vmem:[#allocation2 + $0xd1] sm:$0xff] %vm459_vm0, %v514_v25 }
  0x6a   : > { %521 = vst.msk [vmem:[#allocation2 + $0x21] sm:$0xff] %vm459_vm0, %v505_v26 }
  0x6b   : > { %522 = vst.msk [vmem:[#allocation2 + $0x31] sm:$0xff] %vm459_vm0, %v506_v30 }
  0x6c   : > { %531 = vst.msk [vmem:[#allocation2 + $0xe1] sm:$0xff] %vm459_vm0, %v515_v31 }
  0x6d   : > { %532 = vst.msk [vmem:[#allocation2 + $0xf1] sm:$0xff] %vm459_vm0, %v516_v32 }
  0x6e   : > { %v573_v37 = vld [vmem:[#allocation2 + $0x11] sm:$0xff]  ;;  %523 = vst.msk [vmem:[#allocation2 + $0x41] sm:$0xff] %vm459_vm0, %v507_v35 }
  0x6f   : > { %v537_v38 = vld [vmem:[#allocation2 + $0x10] sm:$0xff]  ;;  %v589_v39 = vpack.c.bf16 %v573_v37, %v573_v37  ;;  %v582_v43 = vld [vmem:[#allocation2 + $0xc1] sm:$0xff]  ;;  %524 = vst.msk [vmem:[#allocation2 + $0x51] sm:$0xff] %vm459_vm0, %v508_v36 }
  0x70   : > { %v553_v41 = vpack.c.bf16 %v537_v38, %v537_v38  ;;  %v546_v44 = vld [vmem:[#allocation2 + $0xc0] sm:$0xff]  ;;  %v583_v45 = vld [vmem:[#allocation2 + $0xd1] sm:$0xff]  ;;  %v598_v46 = vpack.c.bf16 %v582_v43, %v582_v43  ;;  %533 = vst.msk [vmem:[#allocation2 + $0x101] sm:$0xff] %vm459_vm0, %v517_v60  ;;  %v4448_v38 = vld [vmem:[#allocation6 + $0x68] sm:$0xff] }
  0x71   : > { %v547_v47 = vld [vmem:[#allocation2 + $0xd0] sm:$0xff]  ;;  %v562_v48 = vpack.c.bf16 %v546_v44, %v546_v44  ;;  %v5086_v49 = vunpack.c.l.b16 %v589_v39  ;;  %v599_v51 = vpack.c.bf16 %v583_v45, %v583_v45  ;;  %v574_v59 = vld [vmem:[#allocation2 + $0x21] sm:$0xff]  ;;  %534 = vst.msk [vmem:[#allocation2 + $0x111] sm:$0xff] %vm459_vm0, %v518_v5  ;;  %1691 = vmatpush.bf16.msra.mxu2 %v4448_v38 }
  0x72   : > { %v5088_v50 = vunpack.c.l.b16 %v553_v41  ;;  %v563_v52 = vpack.c.bf16 %v547_v47, %v547_v47  ;;  %v5090_v53 = vunpack.c.l.b16 %v598_v46  ;;  %v575_v63 = vld [vmem:[#allocation2 + $0x31] sm:$0xff]  ;;  %v538_v0 = vld [vmem:[#allocation2 + $0x20] sm:$0xff]  ;;  %v590_v11 = vpack.c.bf16 %v574_v59, %v574_v59  ;;  %525 = vst.msk [vmem:[#allocation2 + $0x61] sm:$0xff] %vm459_vm0, %v509_v6 }
  0x73   : > { %v5092_v54 = vunpack.c.l.b16 %v562_v48  ;;  %v641_v55 = vpack.c.b16 %v5086_v49, %v625_v40  ;;  %v5096_v57 = vunpack.c.l.b16 %v599_v51  ;;  %v539_v2 = vld [vmem:[#allocation2 + $0x30] sm:$0xff]  ;;  %v584_v3 = vld [vmem:[#allocation2 + $0xe1] sm:$0xff]  ;;  %v591_v12 = vpack.c.bf16 %v575_v63, %v575_v63  ;;  %526 = vst.msk [vmem:[#allocation2 + $0x71] sm:$0xff] %vm459_vm0, %v510_v7  ;;  %v4450_v6 = vld [vmem:[#allocation6 + $0x78] sm:$0xff] }
  0x74   : > { %v766_v56 = vpack.c.b16 %v5088_v50, %v750_v42  ;;  %v5098_v58 = vunpack.c.l.b16 %v563_v52  ;;  %v585_v8 = vld [vmem:[#allocation2 + $0xf1] sm:$0xff]  ;;  %v548_v9 = vld [vmem:[#allocation2 + $0xe0] sm:$0xff]  ;;  %v554_v13 = vpack.c.bf16 %v538_v0, %v538_v0  ;;  %v555_v14 = vpack.c.bf16 %v539_v2, %v539_v2  ;;  %1869 = vmatpush.bf16.msra.mxu3 %v4450_v6 }
  0x75   : > { %4145 = vmatmul.msk.bf16.vlgmr.msra.gmra.mxu0 %vm459_vm0, %v641_v55  ;;  %v646_v61 = vpack.c.b16 %v5096_v57, %v5090_v53  ;;  %v549_v10 = vld [vmem:[#allocation2 + $0xf0] sm:$0xff]  ;;  %v600_v15 = vpack.c.bf16 %v584_v3, %v584_v3  ;;  %v601_v16 = vpack.c.bf16 %v585_v8, %v585_v8  ;;  %v564_v19 = vpack.c.bf16 %v548_v9, %v548_v9  ;;  %v576_v33 = vld [vmem:[#allocation2 + $0x41] sm:$0xff]  ;;  %v4446_v7 = vld [vmem:[#allocation6 + $0x58] sm:$0xff] }
  0x76   : > { %4161 = vmatmul.msk.bf16.vlgmr.msra.gmra.mxu1 %vm459_vm0, %v766_v56  ;;  %v771_v62 = vpack.c.b16 %v5098_v58, %v5092_v54  ;;  %v565_v20 = vpack.c.bf16 %v549_v10, %v549_v10  ;;  %v5116_v21 = vunpack.c.l.b16 %v590_v11  ;;  %v5118_v22 = vunpack.c.l.b16 %v591_v12  ;;  %v577_v34 = vld [vmem:[#allocation2 + $0x51] sm:$0xff]  ;;  %v540_v35 = vld [vmem:[#allocation2 + $0x40] sm:$0xff]  ;;  %v4452_v10 = vld [vmem:[#allocation6 + $0x88] sm:$0xff] }
  0x77   : > { %4150 = vmatmul.msk.bf16.gmra.mxu2 %vm459_vm0, %v646_v61  ;;  %v5120_v23 = vunpack.c.l.b16 %v554_v13  ;;  %v5122_v24 = vunpack.c.l.b16 %v555_v14  ;;  %v5124_v25 = vunpack.c.l.b16 %v600_v15  ;;  %v5126_v26 = vunpack.c.l.b16 %v601_v16  ;;  %v541_v36 = vld [vmem:[#allocation2 + $0x50] sm:$0xff]  ;;  %v586_v37 = vld [vmem:[#allocation2 + $0x101] sm:$0xff]  ;;  %1512 = vmatpush.bf16.msrb.mxu1 %v4446_v7 }
  0x78   : > { %4166 = vmatmul.msk.bf16.gmra.mxu3 %vm459_vm0, %v771_v62  ;;  %v5128_v27 = vunpack.c.l.b16 %v564_v19  ;;  %v5130_v28 = vunpack.c.l.b16 %v565_v20  ;;  %v5134_v29 = vpack.c.b16 %v5118_v22, %v5116_v21  ;;  %v587_v39 = vld [vmem:[#allocation2 + $0x111] sm:$0xff]  ;;  %v550_v40 = vld [vmem:[#allocation2 + $0x100] sm:$0xff]  ;;  %v592_v42 = vpack.c.bf16 %v576_v33, %v576_v33  ;;  %2047 = vmatpush.bf16.msra.mxu0 %v4452_v10 }
  0x79   : > { %v5138_v30 = vpack.c.b16 %v5122_v24, %v5120_v23  ;;  %v647_v31 = vpack.c.b16 %v5126_v26, %v5124_v25  ;;  %v551_v41 = vld [vmem:[#allocation2 + $0x110] sm:$0xff]  ;;  %v593_v43 = vpack.c.bf16 %v577_v34, %v577_v34  ;;  %v556_v44 = vpack.c.bf16 %v540_v35, %v540_v35  ;;  %v578_v4 = vld [vmem:[#allocation2 + $0x61] sm:$0xff] }
  0x7a   : > { %v772_v32 = vpack.c.b16 %v5130_v28, %v5128_v27  ;;  %v557_v45 = vpack.c.bf16 %v541_v36, %v541_v36  ;;  %v602_v46 = vpack.c.bf16 %v586_v37, %v586_v37  ;;  %v603_v47 = vpack.c.bf16 %v587_v39, %v587_v39  ;;  %v542_v5 = vld [vmem:[#allocation2 + $0x60] sm:$0xff]  ;;  %v579_v8 = vld [vmem:[#allocation2 + $0x71] sm:$0xff] }
  0x7b   : > { %v566_v48 = vpack.c.bf16 %v550_v40, %v550_v40  ;;  %v567_v51 = vpack.c.bf16 %v551_v41, %v551_v41  ;;  %v5150_v52 = vunpack.c.l.b16 %v592_v42  ;;  %v5152_v55 = vunpack.c.l.b16 %v593_v43  ;;  %v543_v9 = vld [vmem:[#allocation2 + $0x70] sm:$0xff]  ;;  %v859_v11 = vld [vmem:[#allocation2 + $0x2] sm:$0xff] }
  0x7c   : > { %v5154_v56 = vunpack.c.l.b16 %v556_v44  ;;  %v5156_v59 = vunpack.c.l.b16 %v557_v45  ;;  %v5158_v60 = vunpack.c.l.b16 %v602_v46  ;;  %v5160_v61 = vunpack.c.l.b16 %v603_v47  ;;  %v860_v12 = vld [vmem:[#allocation2 + $0x12] sm:$0xff]  ;;  %v1394_v42 = vld [vmem:[#allocation2 + $0x22] sm:$0xff] }
  0x7d   : > { %v5162_v62 = vunpack.c.l.b16 %v566_v48  ;;  %v5164_v63 = vunpack.c.l.b16 %v567_v51  ;;  %v5168_v0 = vpack.c.b16 %v5152_v55, %v5150_v52  ;;  %v4445_v13 = vld [vmem:[#allocation6 + $0x50] sm:$0xff]  ;;  %v594_v14 = vpack.c.bf16 %v578_v4, %v578_v4 }
  0x7e   : > { %v5172_v1 = vpack.c.b16 %v5156_v59, %v5154_v56  ;;  %v648_v2 = vpack.c.b16 %v5160_v61, %v5158_v60  ;;  %v595_v15 = vpack.c.bf16 %v579_v8, %v579_v8  ;;  %v558_v16 = vpack.c.bf16 %v542_v5, %v542_v5  ;;  %1513 = vmatpush.bf16.msrb.mxu1 %v4445_v13  ;;  %v862_v43 = vld [vmem:[#allocation2 + $0x32] sm:$0xff] }
  0x7f   : > { %v773_v3 = vpack.c.b16 %v5164_v63, %v5162_v62  ;;  %v559_v19 = vpack.c.bf16 %v543_v9, %v543_v9  ;;  %v875_v20 = vpack.c.bf16 %v859_v11, %v859_v11  ;;  %v1106_v41 = vpack.c.b16 %v5120_v23, %v5088_v50  ;;  %v1398_v9 = vld [vmem:[#allocation2 + $0x62] sm:$0xff]  ;;  %v866_v10 = vld [vmem:[#allocation2 + $0x72] sm:$0xff] }
  0x80   : > { %v5184_v33 = vunpack.c.l.b16 %v595_v15  ;;  %v756_v34 = vunpack.c.l.b16 %v558_v16  ;;  %v1410_v44 = vpack.c.bf16 %v1394_v42, %v1394_v42  ;;  %v878_v45 = vpack.c.bf16 %v862_v43, %v862_v43 }
  0x81   : > { %v5186_v35 = vunpack.c.l.b16 %v559_v19  ;;  %v912_v36 = vunpack.c.l.b16 %v875_v20  ;;  %v1284_v48 = vpack.c.b16 %v5116_v21, %v5086_v49  ;;  %v1107_v51 = vpack.c.b16 %v5154_v56, %v5122_v24  ;;  %v864_v49 = vld [vmem:[#allocation2 + $0x52] sm:$0xff] }
  0x82   : > { %v1447_v46 = vunpack.c.l.b16 %v1410_v44  ;;  %v915_v47 = vunpack.c.l.b16 %v878_v45  ;;  %v880_v4 = vpack.c.bf16 %v864_v49, %v864_v49  ;;  %v1285_v24 = vpack.c.b16 %v5150_v52, %v5118_v22 }
  0x83   : > { %v5192_v39 = vpack.c.b16 %v5186_v35, %v756_v34  ;;  %v1108_v8 = vpack.c.b16 %v756_v34, %v5156_v59  ;;  %v882_v13 = vpack.c.bf16 %v866_v10, %v866_v10  ;;  %v4449_v34 = vld [vmem:[#allocation6 + $0x70] sm:$0xff] }
  0x84   : > { %v5204_v23 = vpack.c.b16 %v915_v47, %v1447_v46  ;;  %v917_v6 = vunpack.c.l.b16 %v880_v4  ;;  %1870 = vmatpush.bf16.msra.mxu3 %v4449_v34  ;;  %v1402_v4 = vld [vmem:[#allocation2 + $0xc2] sm:$0xff] }
  0x85   : > { %4146 = vmatmul.msk.bf16.gmra.mxu0 %vm459_vm0, %v5134_v29 }
  0x86   : > { %4162 = vmatmul.msk.bf16.gmra.mxu1 %vm459_vm0, %v5138_v30 }
  0x87   : > { %4151 = vmatmul.msk.bf16.gmra.mxu2 %vm459_vm0, %v647_v31  ;;  %v876_v31 = vpack.c.bf16 %v860_v12, %v860_v12  ;;  %v1414_v12 = vpack.c.bf16 %v1398_v9, %v1398_v9 }
  0x88   : > { %4167 = vmatmul.msk.bf16.gmra.mxu3 %vm459_vm0, %v772_v32  ;;  %v631_v32 = vunpack.c.l.b16 %v594_v14  ;;  %v919_v14 = vunpack.c.l.b16 %v882_v13  ;;  %v519_v13 = vld [vmem:[%s4964_s12 + $0x78] sm:$0xff] }
  0x89   : > { %v913_v37 = vunpack.c.l.b16 %v876_v31  ;;  %v1451_v52 = vunpack.c.l.b16 %v1414_v12  ;;  %v4447_v31 = vld [vmem:[#allocation6 + $0x60] sm:$0xff]  ;;  %v1111_v12 = vpack.c.b16 %v5128_v27, %v5098_v58  ;;  %535 = vst.msk [vmem:[#allocation2 + $0x121] sm:$0xff] %vm459_vm0, %v519_v13 }
  0x8a   : > { %v5189_v38 = vpack.c.b16 %v5184_v33, %v631_v32  ;;  %v1286_v59 = vpack.c.b16 %v631_v32, %v5152_v55  ;;  %1692 = vmatpush.bf16.msra.mxu2 %v4447_v31  ;;  %v867_v32 = vld [vmem:[#allocation2 + $0xa2] sm:$0xff]  ;;  %v1289_v31 = vpack.c.b16 %v5124_v25, %v5096_v57  ;;  %v874_v57 = vld [vmem:[#allocation2 + $0x112] sm:$0xff] }
  0x8b   : > { %v928_v40 = vpack.c.b16 %v913_v37, %v912_v36  ;;  %v1462_v50 = vpack.c.b16 %v1447_v46, %v913_v37  ;;  %v1464_v16 = vpack.c.b16 %v1451_v52, %v917_v6  ;;  %v5228_v19 = vpack.c.b16 %v919_v14, %v1451_v52  ;;  %v4451_v46 = vld [vmem:[#allocation6 + $0x80] sm:$0xff] }
  0x8c   : > { %v883_v44 = vpack.c.bf16 %v867_v32, %v867_v32  ;;  %2048 = vmatpush.bf16.msra.mxu0 %v4451_v46 }
  0x90   : > { %v1052_v25 = vld [vmem:[#allocation2 + $0x120] sm:$0xff] }
  0x95   : > { %4147 = vmatmul.msk.bf16.gmra.mxu0 %vm459_vm0, %v5168_v0 }
  0x96   : > { %4163 = vmatmul.msk.bf16.gmra.mxu1 %vm459_vm0, %v5172_v1 }
  0x97   : > { %4152 = vmatmul.msk.bf16.gmra.mxu2 %vm459_vm0, %v648_v2  ;;  %v511_v2 = vld [vmem:[%s4964_s12 + $0x38] sm:$0xff] }
  0x98   : > { %4168 = vmatmul.msk.bf16.gmra.mxu3 %vm459_vm0, %v773_v3  ;;  %527 = vst.msk [vmem:[#allocation2 + $0x81] sm:$0xff] %vm459_vm0, %v511_v2  ;;  %v1396_v3 = vld [vmem:[#allocation2 + $0x42] sm:$0xff] }
  0x99   : > { %v1412_v21 = vpack.c.bf16 %v1396_v3, %v1396_v3 }
  0x9b   : > { %v1449_v5 = vunpack.c.l.b16 %v1412_v21  ;;  %v1110_v21 = vpack.c.b16 %v5092_v54, %v5018_v18 }
  0x9d   : > { %v1463_v56 = vpack.c.b16 %v1449_v5, %v915_v47  ;;  %v5217_v7 = vpack.c.b16 %v917_v6, %v1449_v5  ;;  %v870_v5 = vld [vmem:[#allocation2 + $0xd2] sm:$0xff]  ;;  %v1418_v6 = vpack.c.bf16 %v1402_v4, %v1402_v4 }
  0x9f   : > { %v1044_v11 = vld [vmem:[#allocation2 + $0x80] sm:$0xff] }
  0xa0   : > { %v1060_v22 = vpack.c.bf16 %v1044_v11, %v1044_v11  ;;  %v1222_v36 = vld [vmem:[#allocation2 + $0x81] sm:$0xff] }
  0xa1   : > { %v1400_v37 = vld [vmem:[#allocation2 + $0x82] sm:$0xff] }
  0xa2   : > { %v5225_v15 = vunpack.c.l.b16 %v1060_v22  ;;  %v1416_v42 = vpack.c.bf16 %v1400_v37, %v1400_v37 }
  0xa4   : > { %v1109_v20 = vpack.c.b16 %v5225_v15, %v5186_v35  ;;  %v1238_v35 = vpack.c.bf16 %v1222_v36, %v1222_v36 }
  0xa5   : > { %4148 = vmatmul.msk.bf16.gmra.mxu0 %vm459_vm0, %v5189_v38 }
  0xa6   : > { %4164 = vmatmul.msk.bf16.gmra.mxu1 %vm459_vm0, %v5192_v39  ;;  %v5239_v47 = vunpack.c.l.b16 %v1238_v35  ;;  %v1406_v35 = vld [vmem:[#allocation2 + $0x102] sm:$0xff] }
  0xa7   : > { %4177 = vmatmul.msk.bf16.vlgmr.msrb.gmra.mxu2 %vm459_vm0, %v928_v40  ;;  %v868_v40 = vld [vmem:[#allocation2 + $0xb2] sm:$0xff] }
  0xa8   : > { %4193 = vmatmul.msk.bf16.vlgmr.msrb.gmra.mxu3 %vm459_vm0, %v1106_v41  ;;  %v884_v45 = vpack.c.bf16 %v868_v40, %v868_v40  ;;  %v1287_v2 = vpack.c.b16 %v5239_v47, %v5184_v33  ;;  %v1455_v33 = vunpack.c.l.b16 %v1418_v6  ;;  %v1112_v40 = vpack.c.b16 %v5162_v62, %v5130_v28 }
  0xa9   : > { %v890_v28 = vpack.c.bf16 %v874_v57, %v874_v57  ;;  %v1068_v62 = vpack.c.bf16 %v1052_v25, %v1052_v25 }
  0xb5   : > { %4209 = vmatmul.msk.bf16.vlgmr.msrb.gmra.mxu0 %vm459_vm0, %v1284_v48  ;;  %v5241_v48 = vunpack.c.l.b16 %v1416_v42  ;;  %v1422_v42 = vpack.c.bf16 %v1406_v35, %v1406_v35 }
  0xb6   : > { %4225 = vmatmul.msk.bf16.vlgmr.msrb.gmra.mxu1 %vm459_vm0, %v1462_v50  ;;  %v920_v50 = vunpack.c.l.b16 %v883_v44 }
  0xb7   : > { %4178 = vmatmul.msk.bf16.gmra.mxu2 %vm459_vm0, %v5204_v23  ;;  %v1465_v3 = vpack.c.b16 %v5241_v48, %v919_v14 }
  0xb8   : > { %4194 = vmatmul.msk.bf16.gmra.mxu3 %vm459_vm0, %v1107_v51  ;;  %v921_v51 = vunpack.c.l.b16 %v884_v45 }
  0xba   : > { %v932_v49 = vpack.c.b16 %v921_v51, %v920_v50  ;;  %v1466_v54 = vpack.c.b16 %v1455_v33, %v921_v51  ;;  %v1459_v51 = vunpack.c.l.b16 %v1422_v42 }
  0xc5   : > { %4210 = vmatmul.msk.bf16.gmra.mxu0 %vm459_vm0, %v1285_v24  ;;  %v886_v24 = vpack.c.bf16 %v870_v5, %v870_v5 }
  0xc6   : > { %4226 = vmatmul.msk.bf16.gmra.mxu1 %vm459_vm0, %v1463_v56 }
  0xc7   : > { %4179 = vmatmul.msk.bf16.gmra.mxu2 %vm459_vm0, %v5217_v7  ;;  %v923_v56 = vunpack.c.l.b16 %v886_v24 }
  0xc8   : > { %4195 = vmatmul.msk.bf16.gmra.mxu3 %vm459_vm0, %v1108_v8  ;;  %v1288_v8 = vpack.c.b16 %v5090_v53, %v5014_v17  ;;  %v1404_v17 = vld [vmem:[#allocation2 + $0xe2] sm:$0xff]  ;;  %v872_v53 = vld [vmem:[#allocation2 + $0xf2] sm:$0xff] }
  0xc9   : > { %v5260_v11 = vpack.c.b16 %v923_v56, %v1455_v33  ;;  %v1420_v22 = vpack.c.bf16 %v1404_v17, %v1404_v17  ;;  %v888_v58 = vpack.c.bf16 %v872_v53, %v872_v53 }
  0xd5   : > { %4211 = vmatmul.msk.bf16.gmra.mxu0 %vm459_vm0, %v1286_v59 }
  0xd6   : > { %4227 = vmatmul.msk.bf16.gmra.mxu1 %vm459_vm0, %v1464_v16  ;;  %v1457_v16 = vunpack.c.l.b16 %v1420_v22 }
  0xd7   : > { %4180 = vmatmul.msk.bf16.gmra.mxu2 %vm459_vm0, %v5228_v19  ;;  %v714_v55 = vpop.f32.mrf.mxu2 }
  0xd8   : > { %4196 = vmatmul.msk.bf16.gmra.mxu3 %vm459_vm0, %v1109_v20  ;;  %v839_v41 = vpop.f32.mrf.mxu3  ;;  %v925_v20 = vunpack.c.l.b16 %v888_v58  ;;  %v1467_v34 = vpack.c.b16 %v1457_v16, %v923_v56 }
  0xd9   : > { %v5237_v43 = vadd.f32 %v839_v41, %v714_v55 }
  0xda   : > { %v5279_v32 = vpack.c.b16 %v925_v20, %v1457_v16 }
  0xdf   : > { %v5254_v9 = vpop.f32.mrf.mxu2 }
  0xe0   : > { %v5256_v18 = vpop.f32.mrf.mxu3 }
  0xe5   : > { %4212 = vmatmul.msk.bf16.gmra.mxu0 %vm459_vm0, %v1287_v2  ;;  %v927_v2 = vunpack.c.l.b16 %v890_v28 }
  0xe6   : > { %4228 = vmatmul.msk.bf16.gmra.mxu1 %vm459_vm0, %v1465_v3  ;;  %v5294_v3 = vunpack.c.l.b16 %v1068_v62 }
  0xe7   : > { %4181 = vmatmul.msk.bf16.gmra.mxu2 %vm459_vm0, %v932_v49  ;;  %v1290_v49 = vpack.c.b16 %v5158_v60, %v5126_v26  ;;  %v5300_v24 = vpack.c.b16 %v927_v2, %v1459_v51 }
  0xe8   : > { %4197 = vmatmul.msk.bf16.gmra.mxu3 %vm459_vm0, %v1110_v21  ;;  %v1468_v21 = vpack.c.b16 %v1459_v51, %v925_v20  ;;  %v1113_v33 = vpack.c.b16 %v5294_v3, %v5164_v63 }
  0xf2   : > { %v5258_v10 = vpop.f32.mrf.mxu0 }
  0xf3   : > { %v819_v26 = vpop.f32.mrf.mxu1 }
  0xf5   : > { %4213 = vmatmul.msk.bf16.gmra.mxu0 %vm459_vm0, %v1288_v8  ;;  %v1230_v8 = vld [vmem:[#allocation2 + $0x121] sm:$0xff] }
  0xf6   : > { %4229 = vmatmul.msk.bf16.gmra.mxu1 %vm459_vm0, %v1466_v54  ;;  %v1408_v54 = vld [vmem:[#allocation2 + $0x122] sm:$0xff]  ;;  %v1246_v60 = vpack.c.bf16 %v1230_v8, %v1230_v8 }
  0xf7   : > { %4182 = vmatmul.msk.bf16.gmra.mxu2 %vm459_vm0, %v5260_v11 }
  0xf8   : > { %4198 = vmatmul.msk.bf16.gmra.mxu3 %vm459_vm0, %v1111_v12  ;;  %v1424_v12 = vpack.c.bf16 %v1408_v54, %v1408_v54  ;;  %v5315_v22 = vunpack.c.l.b16 %v1246_v60 }
  0xfa   : > { %v5271_v52 = vpop.f32.mrf.mxu0  ;;  %v719_v14 = vpop.f32.mrf.mxu2 }
  0xfb   : > { %v844_v59 = vpop.f32.mrf.mxu3  ;;  %v821_v16 = vpop.f32.mrf.mxu1 }
  0xfc   : > { %v5273_v27 = vadd.f32 %v844_v59, %v719_v14  ;;  %v5317_v14 = vunpack.c.l.b16 %v1424_v12  ;;  %v1291_v59 = vpack.c.b16 %v5315_v22, %v5160_v61  ;;  %v820_v61 = vadd.f32 %v819_v26, %v5258_v10 }
  0xfe   : > { %v1469_v58 = vpack.c.b16 %v5317_v14, %v927_v2 }
 0x102   : > { %v5277_v36 = vpop.f32.mrf.mxu0  ;;  %v721_v37 = vpop.f32.mrf.mxu2 }
 0x103   : > { %v846_v55 = vpop.f32.mrf.mxu3  ;;  %v824_v25 = vpop.f32.mrf.mxu1 }
 0x104   : > { %v5283_v41 = vadd.f32 %v846_v55, %v721_v37 }
 0x105   : > { %4214 = vmatmul.msk.bf16.gmra.mxu0 %vm459_vm0, %v1289_v31 }
 0x106   : > { %4230 = vmatmul.msk.bf16.gmra.mxu1 %vm459_vm0, %v1467_v34 }
 0x107   : > { %4183 = vmatmul.msk.bf16.gmra.mxu2 %vm459_vm0, %v5279_v32 }
 0x108   : > { %4199 = vmatmul.msk.bf16.gmra.mxu3 %vm459_vm0, %v1112_v40  ;;  %v4456_v40 = vld [vmem:[#allocation9 + $0x18] sm:$0xff] }
 0x109   : > { %2333 = vmatpush.bf16.msra.mxu1 %v4456_v40 }
 0x10a   : > { %v5290_v44 = vpop.f32.mrf.mxu0  ;;  %v724_v45 = vpop.f32.mrf.mxu2 }
 0x10b   : > { %v849_v46 = vpop.f32.mrf.mxu3 }
 0x10c   : > { %v5292_v50 = vadd.f32 %v849_v46, %v724_v45  ;;  %v822_v46 = vadd.f32 %v821_v16, %v5271_v52 }
 0x112   : > { %v5298_v4 = vpop.f32.mrf.mxu0  ;;  %v726_v5 = vpop.f32.mrf.mxu2 }
 0x113   : > { %v851_v6 = vpop.f32.mrf.mxu3 }
 0x114   : > { %v5304_v56 = vadd.f32 %v851_v6, %v726_v5 }
 0x115   : > { %4215 = vmatmul.msk.bf16.gmra.mxu0 %vm459_vm0, %v1290_v49  ;;  %v825_v49 = vadd.f32 %v824_v25, %v5277_v36  ;;  %v1579_v36 = vld [vmem:[#allocation2 + $0x90] sm:$0xff] }
 0x116   : > { %4231 = vmatmul.msk.bf16.gmra.mxu1 %vm459_vm0, %v1468_v21 }
 0x117   : > { %4184 = vmatmul.msk.bf16.gmra.mxu2 %vm459_vm0, %v5300_v24 }
 0x118   : > { %4200 = vmatmul.msk.bf16.gmra.mxu3 %vm459_vm0, %v1113_v33 }
 0x11a   : > { %v5311_v13 = vpop.f32.mrf.mxu0  ;;  %v729_v17 = vpop.f32.mrf.mxu2 }
 0x11b   : > { %v854_v63 = vpop.f32.mrf.mxu3 }
 0x11c   : > { %v5313_v53 = vadd.f32 %v854_v63, %v729_v17  ;;  %v1757_v63 = vld [vmem:[#allocation2 + $0x91] sm:$0xff] }
 0x11d   : > { %v1773_v40 = vpack.c.bf16 %v1757_v63, %v1757_v63 }
 0x11f   : > { %v1810_v25 = vunpack.c.l.b16 %v1773_v40 }
 0x122   : > { %v5322_v20 = vpop.f32.mrf.mxu0  ;;  %v731_v31 = vpop.f32.mrf.mxu2 }
 0x123   : > { %v856_v34 = vpop.f32.mrf.mxu3 }
 0x124   : > { %v5324_v37 = vadd.f32 %v856_v34, %v731_v31 }
 0x125   : > { %4216 = vmatmul.msk.bf16.gmra.mxu0 %vm459_vm0, %v1291_v59 }
 0x126   : > { %4232 = vmatmul.msk.bf16.gmra.mxu1 %vm459_vm0, %v1469_v58 }
 0x127   : > { %4241 = vmatmul.msk.bf16.vlgmr.msra.gmra.mxu2 %vm459_vm0, %v5138_v30 }
 0x128   : > { %4257 = vmatmul.msk.bf16.vlgmr.msra.gmra.mxu3 %vm459_vm0, %v5134_v29  ;;  %v826_v29 = vpop.f32.mrf.mxu1 }
 0x12a   : > { %v5333_v55 = vpop.f32.mrf.mxu0  ;;  %v981_v35 = vpop.f32.mrf.mxu2 }
 0x12b   : > { %v1159_v57 = vpop.f32.mrf.mxu3  ;;  %v1021_v42 = vadd.f32 %v981_v35, %v820_v61  ;;  %v1595_v61 = vpack.c.bf16 %v1579_v36, %v1579_v36 }
 0x12d   : > { %v1199_v45 = vadd.f32 %v1159_v57, %v1021_v42  ;;  %v1632_v57 = vunpack.c.l.b16 %v1595_v61 }
 0x130   : > { %v829_v54 = vpop.f32.mrf.mxu1 }
 0x132   : > { %v1337_v28 = vpop.f32.mrf.mxu0  ;;  %v983_v30 = vpop.f32.mrf.mxu2 }
 0x133   : > { %v5336_v62 = vadd.f32 %v1337_v28, %v1199_v45  ;;  %v1161_v51 = vpop.f32.mrf.mxu3  ;;  %v1022_v2 = vadd.f32 %v983_v30, %v822_v46  ;;  %v1822_v28 = vpack.c.b16 %v1810_v25, %v5239_v47 }
 0x135   : > { %4273 = vmatmul.msk.bf16.vlgmr.msra.gmra.mxu0 %vm459_vm0, %v5204_v23  ;;  %v1200_v10 = vadd.f32 %v1161_v51, %v1022_v2  ;;  %v827_v23 = vadd.f32 %v826_v29, %v5290_v44  ;;  %v830_v44 = vadd.f32 %v829_v54, %v5298_v4  ;;  %v1644_v4 = vpack.c.b16 %v1632_v57, %v5225_v15  ;;  %v1935_v29 = vld [vmem:[#allocation2 + $0x92] sm:$0xff] }
 0x137   : > { %4242 = vmatmul.msk.bf16.gmra.mxu2 %vm459_vm0, %v5172_v1 }
 0x138   : > { %4258 = vmatmul.msk.bf16.gmra.mxu3 %vm459_vm0, %v5168_v0  ;;  %v831_v59 = vpop.f32.mrf.mxu1 }
 0x13a   : > { %v1339_v52 = vpop.f32.mrf.mxu0  ;;  %v986_v5 = vpop.f32.mrf.mxu2 }
 0x13b   : > { %v5345_v21 = vadd.f32 %v1339_v52, %v1200_v10  ;;  %v1164_v6 = vpop.f32.mrf.mxu3  ;;  %v1023_v33 = vadd.f32 %v986_v5, %v825_v49  ;;  %v1581_v10 = vld [vmem:[#allocation2 + $0xd0] sm:$0xff]  ;;  %v1758_v49 = vld [vmem:[#allocation2 + $0xc1] sm:$0xff]  ;;  %v1951_v5 = vpack.c.bf16 %v1935_v29, %v1935_v29 }
 0x13c   : > { %v1759_v52 = vld [vmem:[#allocation2 + $0xd1] sm:$0xff] }
 0x13d   : > { %v1201_v8 = vadd.f32 %v1164_v6, %v1023_v33 }
 0x140   : > { %v834_v51 = vpop.f32.mrf.mxu1 }
 0x141   : > { %v835_v15 = vadd.f32 %v834_v51, %v5322_v20 }
 0x142   : > { %v1342_v26 = vpop.f32.mrf.mxu0  ;;  %v988_v12 = vpop.f32.mrf.mxu2 }
 0x143   : > { %v5348_v60 = vadd.f32 %v1342_v26, %v1201_v8  ;;  %v1166_v1 = vpop.f32.mrf.mxu3  ;;  %v1024_v17 = vadd.f32 %v988_v12, %v827_v23  ;;  %v1774_v23 = vpack.c.bf16 %v1758_v49, %v1758_v49  ;;  %v1775_v26 = vpack.c.bf16 %v1759_v52, %v1759_v52 }
 0x145   : > { %4274 = vmatmul.msk.bf16.gmra.mxu0 %vm459_vm0, %v5217_v7  ;;  %v1202_v0 = vadd.f32 %v1166_v1, %v1024_v17  ;;  %v1988_v1 = vunpack.c.l.b16 %v1951_v5 }
 0x147   : > { %4243 = vmatmul.msk.bf16.gmra.mxu2 %vm459_vm0, %v5192_v39  ;;  %v832_v39 = vadd.f32 %v831_v59, %v5311_v13  ;;  %v1580_v13 = vld [vmem:[#allocation2 + $0xc0] sm:$0xff]  ;;  %v1812_v59 = vunpack.c.l.b16 %v1775_v26 }
 0x148   : > { %4259 = vmatmul.msk.bf16.gmra.mxu3 %vm459_vm0, %v5189_v38  ;;  %v1596_v47 = vpack.c.bf16 %v1580_v13, %v1580_v13 }
 0x14a   : > { %v1344_v58 = vpop.f32.mrf.mxu0  ;;  %v991_v31 = vpop.f32.mrf.mxu2  ;;  %v1633_v36 = vunpack.c.l.b16 %v1596_v47 }
 0x14b   : > { %v5357_v16 = vadd.f32 %v1344_v58, %v1202_v0  ;;  %v1169_v34 = vpop.f32.mrf.mxu3  ;;  %v1025_v7 = vadd.f32 %v991_v31, %v830_v44  ;;  %v836_v0 = vpop.f32.mrf.mxu1  ;;  %v1811_v44 = vunpack.c.l.b16 %v1774_v23  ;;  %v2000_v58 = vpack.c.b16 %v1988_v1, %v5241_v48  ;;  %v1760_v48 = vld [vmem:[#allocation2 + $0xe1] sm:$0xff] }
 0x14c   : > { %v837_v20 = vadd.f32 %v836_v0, %v5333_v55  ;;  %v1776_v29 = vpack.c.bf16 %v1760_v48, %v1760_v48  ;;  %v1762_v1 = vld [vmem:[#allocation2 + $0x101] sm:$0xff] }
 0x14d   : > { %v1203_v35 = vadd.f32 %v1169_v34, %v1025_v7 }
 0x152   : > { %v1347_v42 = vpop.f32.mrf.mxu0  ;;  %v993_v45 = vpop.f32.mrf.mxu2 }
 0x153   : > { %v5360_v38 = vadd.f32 %v1347_v42, %v1203_v35  ;;  %v1171_v46 = vpop.f32.mrf.mxu3  ;;  %v1026_v30 = vadd.f32 %v993_v45, %v832_v39  ;;  %v1823_v35 = vpack.c.b16 %v1812_v59, %v1811_v44  ;;  %v1582_v39 = vld [vmem:[#allocation2 + $0xe0] sm:$0xff]  ;;  %v1583_v42 = vld [vmem:[#allocation2 + $0xf0] sm:$0xff] }
 0x154   : > { %v1761_v45 = vld [vmem:[#allocation2 + $0xf1] sm:$0xff] }
 0x155   : > { %4275 = vmatmul.msk.bf16.gmra.mxu0 %vm459_vm0, %v5228_v19  ;;  %v1204_v2 = vadd.f32 %v1171_v46, %v1026_v30  ;;  %v1597_v19 = vpack.c.bf16 %v1581_v10, %v1581_v10  ;;  %v1598_v46 = vpack.c.bf16 %v1582_v39, %v1582_v39  ;;  %v1777_v13 = vpack.c.bf16 %v1761_v45, %v1761_v45 }
 0x157   : > { %4244 = vmatmul.msk.bf16.gmra.mxu2 %vm459_vm0, %v1644_v4  ;;  %v1634_v63 = vunpack.c.l.b16 %v1597_v19  ;;  %v4455_v4 = vld [vmem:[#allocation9 + $0x10] sm:$0xff]  ;;  %v1635_v52 = vunpack.c.l.b16 %v1598_v46  ;;  %v1765_v46 = vld [vmem:[#allocation2 + $0x131] sm:$0xff] }
 0x158   : > { %4260 = vmatmul.msk.bf16.gmra.mxu3 %vm459_vm0, %v1822_v28  ;;  %2334 = vmatpush.bf16.msra.mxu1 %v4455_v4 }
 0x159   : > { %v1645_v7 = vpack.c.b16 %v1634_v63, %v1633_v36 }
 0x15a   : > { %v1349_v6 = vpop.f32.mrf.mxu0  ;;  %v996_v8 = vpop.f32.mrf.mxu2 }
 0x15b   : > { %v5369_v33 = vadd.f32 %v1349_v6, %v1204_v2  ;;  %v1174_v54 = vpop.f32.mrf.mxu3  ;;  %v1027_v12 = vadd.f32 %v996_v8, %v835_v15  ;;  %v1599_v2 = vpack.c.bf16 %v1583_v42, %v1583_v42  ;;  %v1813_v15 = vunpack.c.l.b16 %v1776_v29 }
 0x15c   : > { %v1814_v6 = vunpack.c.l.b16 %v1777_v13  ;;  %v1781_v29 = vpack.c.bf16 %v1765_v46, %v1765_v46  ;;  %v4460_v46 = vld [vmem:[#allocation9 + $0x38] sm:$0xff] }
 0x15d   : > { %v1205_v17 = vadd.f32 %v1174_v54, %v1027_v12  ;;  %v1636_v5 = vunpack.c.l.b16 %v1599_v2  ;;  %v1585_v12 = vld [vmem:[#allocation2 + $0x110] sm:$0xff]  ;;  %2798 = vmatpush.bf16.msrb.mxu0 %v4460_v46 }
 0x15e   : > { %v1824_v26 = vpack.c.b16 %v1814_v6, %v1813_v15  ;;  %v1601_v59 = vpack.c.bf16 %v1585_v12, %v1585_v12 }
 0x15f   : > { %v1646_v23 = vpack.c.b16 %v1636_v5, %v1635_v52  ;;  %v1818_v52 = vunpack.c.l.b16 %v1781_v29 }
 0x162   : > { %v1352_v31 = vpop.f32.mrf.mxu0  ;;  %v998_v61 = vpop.f32.mrf.mxu2 }
 0x163   : > { %v5373_v34 = vadd.f32 %v1352_v31, %v1205_v17  ;;  %v1176_v40 = vpop.f32.mrf.mxu3  ;;  %v1028_v57 = vadd.f32 %v998_v61, %v837_v20  ;;  %v1763_v17 = vld [vmem:[#allocation2 + $0x111] sm:$0xff] }
 0x164   : > { %v1779_v20 = vpack.c.bf16 %v1763_v17, %v1763_v17 }
 0x165   : > { %4276 = vmatmul.msk.bf16.gmra.mxu0 %vm459_vm0, %v2000_v58  ;;  %v1206_v25 = vadd.f32 %v1176_v40, %v1028_v57  ;;  %v1778_v58 = vpack.c.bf16 %v1762_v1, %v1762_v1  ;;  %v1638_v40 = vunpack.c.l.b16 %v1601_v59 }
 0x167   : > { %4245 = vmatmul.msk.bf16.gmra.mxu2 %vm459_vm0, %v1645_v7  ;;  %v1815_v7 = vunpack.c.l.b16 %v1778_v58 }
 0x168   : > { %4261 = vmatmul.msk.bf16.gmra.mxu3 %vm459_vm0, %v1823_v35  ;;  %v1816_v35 = vunpack.c.l.b16 %v1779_v20 }
 0x16a   : > { %v1354_v55 = vpop.f32.mrf.mxu0  ;;  %v1001_v30 = vpop.f32.mrf.mxu2  ;;  %v1825_v45 = vpack.c.b16 %v1816_v35, %v1815_v7 }
 0x16b   : > { %v5378_v28 = vadd.f32 %v1354_v55, %v1206_v25  ;;  %v1179_v51 = vpop.f32.mrf.mxu3  ;;  %v1029_v10 = vadd.f32 %v1001_v30, %v5237_v43  ;;  %v1584_v43 = vld [vmem:[#allocation2 + $0x100] sm:$0xff]  ;;  %v1587_v55 = vld [vmem:[#allocation2 + $0x130] sm:$0xff] }
 0x16c   : > { %v1600_v44 = vpack.c.bf16 %v1584_v43, %v1584_v43  ;;  %v1603_v2 = vpack.c.bf16 %v1587_v55, %v1587_v55  ;;  %v1943_v43 = vld [vmem:[#allocation2 + $0x132] sm:$0xff] }
 0x16d   : > { %v1207_v49 = vadd.f32 %v1179_v51, %v1029_v10 }
 0x172   : > { %v1357_v47 = vpop.f32.mrf.mxu0  ;;  %v5383_v54 = vpop.f32.mrf.mxu2 }
 0x173   : > { %v5381_v8 = vadd.f32 %v1357_v47, %v1207_v49  ;;  %v5385_v19 = vpop.f32.mrf.mxu3  ;;  %v1640_v49 = vunpack.c.l.b16 %v1603_v2  ;;  %v5441_v2 = vld [vmem:[#allocation8] ss:$0 sm:$0xff] }
 0x175   : > { %4277 = vmatmul.msk.bf16.gmra.mxu0 %vm459_vm0, %v5260_v11  ;;  %v1637_v11 = vunpack.c.l.b16 %v1600_v44 }
 0x177   : > { %4246 = vmatmul.msk.bf16.gmra.mxu2 %vm459_vm0, %v1646_v23  ;;  %v1647_v48 = vpack.c.b16 %v1638_v40, %v1637_v11  ;;  %v1648_v23 = vpack.c.b16 %v1640_v49, %v5294_v3  ;;  %v4458_v11 = vld [vmem:[#allocation9 + $0x28] sm:$0xff] }
 0x178   : > { %4262 = vmatmul.msk.bf16.gmra.mxu3 %vm459_vm0, %v1824_v26  ;;  %v1826_v26 = vpack.c.b16 %v1818_v52, %v5315_v22  ;;  %v4459_v52 = vld [vmem:[#allocation9 + $0x30] sm:$0xff] }
 0x179   : > { %2620 = vmatpush.bf16.msrb.mxu3 %v4458_v11  ;;  %2799 = vmatpush.bf16.msrb.mxu0 %v4459_v52 }
 0x17a   : > { %v5391_v0 = vpop.f32.mrf.mxu0  ;;  %v1006_v36 = vpop.f32.mrf.mxu2 }
 0x17b   : > { %v1184_v63 = vpop.f32.mrf.mxu3  ;;  %v1031_v31 = vadd.f32 %v1006_v36, %v5273_v27  ;;  %v1515_v27 = vpop.f32.mrf.mxu1 }
 0x17c   : > { %v1555_v40 = vadd.f32 %v1515_v27, %v5336_v62 }
 0x17d   : > { %v1209_v61 = vadd.f32 %v1184_v63, %v1031_v31  ;;  %v4454_v31 = vld [vmem:[#allocation9 + $0x8] sm:$0xff] }
 0x17e   : > { %2458 = vmatpush.bf16.msrb.mxu2 %v4454_v31 }
 0x182   : > { %v1362_v57 = vpop.f32.mrf.mxu0  ;;  %v5396_v39 = vpop.f32.mrf.mxu2 }
 0x183   : > { %v5394_v25 = vadd.f32 %v1362_v57, %v1209_v61  ;;  %v5398_v42 = vpop.f32.mrf.mxu3  ;;  %v1517_v5 = vpop.f32.mrf.mxu1  ;;  %v4453_v57 = vld [vmem:[#allocation9] sm:$0xff] }
 0x184   : > { %2459 = vmatpush.bf16.msrb.mxu2 %v4453_v57  ;;  %v1556_v62 = vadd.f32 %v1517_v5, %v5345_v21 }
 0x185   : > { %4278 = vmatmul.msk.bf16.gmra.mxu0 %vm459_vm0, %v5279_v32 }
 0x187   : > { %4247 = vmatmul.msk.bf16.gmra.mxu2 %vm459_vm0, %v1647_v48  ;;  %v4457_v48 = vld [vmem:[#allocation9 + $0x20] sm:$0xff] }
 0x188   : > { %4263 = vmatmul.msk.bf16.gmra.mxu3 %vm459_vm0, %v1825_v45 }
 0x189   : > { %2621 = vmatpush.bf16.msrb.mxu3 %v4457_v48 }
 0x18a   : > { %v5404_v4 = vpop.f32.mrf.mxu0  ;;  %v1011_v30 = vpop.f32.mrf.mxu2 }
 0x18b   : > { %v1189_v51 = vpop.f32.mrf.mxu3  ;;  %v1033_v13 = vadd.f32 %v1011_v30, %v5292_v50  ;;  %v1959_v50 = vpack.c.bf16 %v1943_v43, %v1943_v43  ;;  %v1520_v36 = vpop.f32.mrf.mxu1  ;;  %v5438_v30 = vld [vmem:[%s6159_s2] ss:$0 sm:$0xff] }
 0x18c   : > { %v1557_v21 = vadd.f32 %v1520_v36, %v5348_v60 }
 0x18d   : > { %v1211_v10 = vadd.f32 %v1189_v51, %v1033_v13  ;;  %v1996_v44 = vunpack.c.l.b16 %v1959_v50 }
 0x18f   : > { %v2004_v22 = vpack.c.b16 %v1996_v44, %v5317_v14  ;;  %v2214_v44 = vld [vmem:[#allocation2 + $0x1] sm:$0xff] }
 0x190   : > { %v2230_v11 = vpack.c.bf16 %v2214_v44, %v2214_v44 }
 0x192   : > { %v1367_v32 = vpop.f32.mrf.mxu0  ;;  %v5409_v6 = vpop.f32.mrf.mxu2 }
 0x193   : > { %v5407_v15 = vadd.f32 %v1367_v32, %v1211_v10  ;;  %v5411_v47 = vpop.f32.mrf.mxu3  ;;  %v1522_v61 = vpop.f32.mrf.mxu1  ;;  %v4462_v10 = vld [vmem:[#allocation9 + $0x48] sm:$0xff] }
 0x194   : > { %2976 = vmatpush.bf16.msrb.mxu1 %v4462_v10 }
 0x195   : > { %4279 = vmatmul.msk.bf16.gmra.mxu0 %vm459_vm0, %v5300_v24 }
 0x197   : > { %4248 = vmatmul.msk.bf16.gmra.mxu2 %vm459_vm0, %v1648_v23 }
 0x198   : > { %4264 = vmatmul.msk.bf16.gmra.mxu3 %vm459_vm0, %v1826_v26 }
 0x19a   : > { %v5419_v12 = vpop.f32.mrf.mxu0  ;;  %v1016_v1 = vpop.f32.mrf.mxu2 }
 0x19b   : > { %v1194_v17 = vpop.f32.mrf.mxu3  ;;  %v1035_v63 = vadd.f32 %v1016_v1, %v5313_v53  ;;  %v5433_v55 = vpop.f32.mrf.mxu1 }
 0x19d   : > { %v1213_v3 = vadd.f32 %v1194_v17, %v1035_v63 }
 0x1a2   : > { %v1372_v59 = vpop.f32.mrf.mxu0  ;;  %v5425_v24 = vpop.f32.mrf.mxu2 }
 0x1a3   : > { %v5423_v58 = vadd.f32 %v1372_v59, %v1213_v3  ;;  %v5427_v20 = vpop.f32.mrf.mxu3  ;;  %v5446_v5 = vpop.f32.mrf.mxu1  ;;  %v2178_v3 = vld [vmem:[#allocation2] sm:$0xff] }
 0x1a5   : > { %4280 = vmatmul.msk.bf16.gmra.mxu0 %vm459_vm0, %v2004_v22  ;;  %v2501_v22 = vld [vmem:[#allocation2 + $0x2] sm:$0xff] }
 0x1aa   : > { %v5431_v53 = vpop.f32.mrf.mxu0  ;;  %v1694_v7 = vpop.f32.mrf.mxu2 }
 0x1ab   : > { %v1872_v14 = vpop.f32.mrf.mxu3  ;;  %v1734_v35 = vadd.f32 %v1694_v7, %v1555_v40  ;;  %v2194_v40 = vpack.c.bf16 %v2178_v3, %v2178_v3  ;;  %v2517_v7 = vpack.c.bf16 %v2501_v22, %v2501_v22  ;;  %v1559_v22 = vadd.f32 %v5433_v55, %v5360_v38 }
 0x1ad   : > { %v1912_v45 = vadd.f32 %v1872_v14, %v1734_v35  ;;  %v1558_v35 = vadd.f32 %v1522_v61, %v5357_v16 }
 0x1b2   : > { %v2050_v27 = vpop.f32.mrf.mxu0  ;;  %v1696_v29 = vpop.f32.mrf.mxu2 }
 0x1b3   : > { %v2090_v51 = vadd.f32 %v2050_v27, %v1912_v45  ;;  %v1874_v13 = vpop.f32.mrf.mxu3  ;;  %v1735_v49 = vadd.f32 %v1696_v29, %v1556_v62  ;;  %v2267_v45 = vunpack.c.l.b16 %v2230_v11  ;;  %v2392_v62 = vunpack.c.l.b16 %v2194_v40 }
 0x1b5   : > { %v2110_v32 = vmul.f32 %v5438_v30, %v2090_v51  ;;  %v1913_v26 = vadd.f32 %v1874_v13, %v1735_v49  ;;  %v2554_v51 = vunpack.c.l.b16 %v2517_v7 }
 0x1b7   : > { %v2130_v23 = vadd.f32 %v5441_v2, %v2110_v32 }
 0x1b9   : > { %v2146_v43 = vmax.f32 %v2130_v23, 0.0  ;;  %v5453_v23 = vpop.f32.mrf.mxu1 }
 0x1ba   : > { %v2052_v50 = vpop.f32.mrf.mxu0  ;;  %v1699_v17 = vpop.f32.mrf.mxu2 }
 0x1bb   : > { %2162 = vst.msk [vmem:[#allocation2 + $0x11] sm:$0xff] %vm459_vm0, %v2146_v43  ;;  %v2091_v1 = vadd.f32 %v2052_v50, %v1913_v26  ;;  %v1877_v63 = vpop.f32.mrf.mxu3  ;;  %v1736_v59 = vadd.f32 %v1699_v17, %v1557_v21 }
 0x1bd   : > { %v2111_v31 = vmul.f32 %v5438_v30, %v2091_v1  ;;  %v1914_v60 = vadd.f32 %v1877_v63, %v1736_v59 }
 0x1bf   : > { %v2131_v14 = vadd.f32 %v5441_v2, %v2111_v31 }
 0x1c1   : > { %v2147_v36 = vmax.f32 %v2131_v14, 0.0  ;;  %v1532_v55 = vpop.f32.mrf.mxu1 }
 0x1c2   : > { %v2055_v57 = vpop.f32.mrf.mxu0  ;;  %v2215_v48 = vld [vmem:[#allocation2 + $0x11] sm:$0xff]  ;;  %v1701_v13 = vpop.f32.mrf.mxu2 }
 0x1c3   : > { %v2179_v46 = vld [vmem:[#allocation2 + $0x10] sm:$0xff]  ;;  %2163 = vst.msk [vmem:[#allocation2 + $0x21] sm:$0xff] %vm459_vm0, %v2147_v36  ;;  %v2092_v29 = vadd.f32 %v2055_v57, %v1914_v60  ;;  %v1879_v10 = vpop.f32.mrf.mxu3  ;;  %v2231_v49 = vpack.c.bf16 %v2215_v48, %v2215_v48  ;;  %v1737_v26 = vadd.f32 %v1701_v13, %v1558_v35 }
 0x1c4   : > { %v2502_v27 = vld [vmem:[#allocation2 + $0x12] sm:$0xff]  ;;  %v2195_v52 = vpack.c.bf16 %v2179_v46, %v2179_v46 }
 0x1c5   : > { %v2518_v32 = vpack.c.bf16 %v2502_v27, %v2502_v27  ;;  %v2112_v16 = vmul.f32 %v5438_v30, %v2092_v29  ;;  %v5456_v61 = vunpack.c.l.b16 %v2231_v49  ;;  %v1915_v50 = vadd.f32 %v1879_v10, %v1737_v26 }
 0x1c6   : > { %v2393_v43 = vunpack.c.l.b16 %v2195_v52  ;;  %v1560_v52 = vadd.f32 %v5446_v5, %v5369_v33 }
 0x1c7   : > { %v5458_v21 = vunpack.c.l.b16 %v2518_v32  ;;  %v2132_v1 = vadd.f32 %v5441_v2, %v2112_v16  ;;  %v2283_v17 = vpack.c.b16 %v5456_v61, %v2267_v45 }
 0x1c8   : > { %v2408_v63 = vpack.c.b16 %v2393_v43, %v2392_v62 }
 0x1c9   : > { %v2570_v44 = vpack.c.b16 %v5458_v21, %v2554_v51  ;;  %v2148_v3 = vmax.f32 %v2132_v1, 0.0  ;;  %4289 = vmatmul.msk.bf16.vlgmr.msra.gmra.mxu1 %vm459_vm0, %v2283_v17 }
 0x1ca   : > { %4305 = vmatmul.msk.bf16.vlgmr.msrb.gmra.mxu2 %vm459_vm0, %v2408_v63  ;;  %v2057_v59 = vpop.f32.mrf.mxu0  ;;  %v2680_v31 = vld [vmem:[#allocation2 + $0x20] sm:$0xff]  ;;  %v1704_v14 = vpop.f32.mrf.mxu2 }
 0x1cb   : > { %4321 = vmatmul.msk.bf16.vlgmr.msrb.gmra.mxu3 %vm459_vm0, %v2570_v44  ;;  %v2216_v11 = vld [vmem:[#allocation2 + $0x21] sm:$0xff]  ;;  %2164 = vst.msk [vmem:[#allocation2 + $0x31] sm:$0xff] %vm459_vm0, %v2148_v3  ;;  %v2093_v7 = vadd.f32 %v2057_v59, %v1915_v50  ;;  %v1882_v60 = vpop.f32.mrf.mxu3  ;;  %v2696_v36 = vpack.c.bf16 %v2680_v31, %v2680_v31  ;;  %v1738_v48 = vadd.f32 %v1704_v14, %v1559_v22 }
 0x1cc   : > { %v2503_v40 = vld [vmem:[#allocation2 + $0x22] sm:$0xff]  ;;  %v2232_v35 = vpack.c.bf16 %v2216_v11, %v2216_v11 }
 0x1cd   : > { %v2519_v57 = vpack.c.bf16 %v2503_v40, %v2503_v40  ;;  %v2113_v45 = vmul.f32 %v5438_v30, %v2093_v7  ;;  %v2733_v46 = vunpack.c.l.b16 %v2696_v36  ;;  %v1916_v27 = vadd.f32 %v1882_v60, %v1738_v48  ;;  %v1535_v36 = vpop.f32.mrf.mxu1 }
 0x1ce   : > { %v5470_v62 = vunpack.c.l.b16 %v2232_v35 }
 0x1cf   : > { %v5472_v38 = vunpack.c.l.b16 %v2519_v57  ;;  %v2133_v51 = vadd.f32 %v5441_v2, %v2113_v45  ;;  %v2748_v29 = vpack.c.b16 %v2733_v46, %v2393_v43  ;;  %v1561_v57 = vadd.f32 %v5453_v23, %v5373_v34 }
 0x1d0   : > { %v2926_v13 = vpack.c.b16 %v5470_v62, %v5456_v61 }
 0x1d1   : > { %v3104_v10 = vpack.c.b16 %v5472_v38, %v5458_v21  ;;  %v2149_v49 = vmax.f32 %v2133_v51, 0.0  ;;  %4337 = vmatmul.msk.bf16.vlgmr.msrb.gmra.mxu0 %vm459_vm0, %v2748_v29 }
 0x1d2   : > { %v2060_v32 = vpop.f32.mrf.mxu0  ;;  %v2217_v26 = vld [vmem:[#allocation2 + $0x31] sm:$0xff]  ;;  %v1706_v43 = vpop.f32.mrf.mxu2 }
 0x1d3   : > { %v2181_v16 = vld [vmem:[#allocation2 + $0x30] sm:$0xff]  ;;  %2165 = vst.msk [vmem:[#allocation2 + $0x41] sm:$0xff] %vm459_vm0, %v2149_v49  ;;  %v2094_v1 = vadd.f32 %v2060_v32, %v1916_v27  ;;  %v1884_v17 = vpop.f32.mrf.mxu3  ;;  %v2233_v63 = vpack.c.bf16 %v2217_v26, %v2217_v26  ;;  %v1739_v22 = vadd.f32 %v1706_v43, %v1560_v52 }
 0x1d4   : > { %v2504_v50 = vld [vmem:[#allocation2 + $0x32] sm:$0xff]  ;;  %v2197_v44 = vpack.c.bf16 %v2181_v16, %v2181_v16 }
 0x1d5   : > { %v2520_v3 = vpack.c.bf16 %v2504_v50, %v2504_v50  ;;  %v2114_v59 = vmul.f32 %v5438_v30, %v2094_v1  ;;  %v5484_v31 = vunpack.c.l.b16 %v2233_v63  ;;  %v1917_v33 = vadd.f32 %v1884_v17, %v1739_v22 }
 0x1d6   : > { %v2395_v11 = vunpack.c.l.b16 %v2197_v44 }
 0x1d7   : > { %v5486_v40 = vunpack.c.l.b16 %v2520_v3  ;;  %v2134_v5 = vadd.f32 %v5441_v2, %v2114_v59  ;;  %v5491_v7 = vpack.c.b16 %v5484_v31, %v5470_v62  ;;  %v1562_v59 = vadd.f32 %v1532_v55, %v5378_v28 }
 0x1d8   : > { %v5493_v14 = vpack.c.b16 %v2395_v11, %v2733_v46 }
 0x1d9   : > { %v2571_v60 = vpack.c.b16 %v5486_v40, %v5472_v38  ;;  %v2150_v35 = vmax.f32 %v2134_v5, 0.0  ;;  %4290 = vmatmul.msk.bf16.gmra.mxu1 %vm459_vm0, %v5491_v7 }
 0x1da   : > { %4306 = vmatmul.msk.bf16.gmra.mxu2 %vm459_vm0, %v5493_v14  ;;  %v2062_v48 = vpop.f32.mrf.mxu0  ;;  %v2682_v45 = vld [vmem:[#allocation2 + $0x40] sm:$0xff]  ;;  %v1709_v29 = vpop.f32.mrf.mxu2 }
 0x1db   : > { %4322 = vmatmul.msk.bf16.gmra.mxu3 %vm459_vm0, %v2571_v60  ;;  %v2218_v46 = vld [vmem:[#allocation2 + $0x41] sm:$0xff]  ;;  %2166 = vst.msk [vmem:[#allocation2 + $0x51] sm:$0xff] %vm459_vm0, %v2150_v35  ;;  %v2095_v51 = vadd.f32 %v2062_v48, %v1917_v33  ;;  %v1887_v49 = vpop.f32.mrf.mxu3  ;;  %v2698_v52 = vpack.c.bf16 %v2682_v45, %v2682_v45  ;;  %v1740_v16 = vadd.f32 %v1709_v29, %v1561_v57  ;;  %v1537_v33 = vpop.f32.mrf.mxu1 }
 0x1dc   : > { %v2505_v27 = vld [vmem:[#allocation2 + $0x42] sm:$0xff]  ;;  %v2234_v32 = vpack.c.bf16 %v2218_v46, %v2218_v46  ;;  %v842_v29 = vadd.f32 %v5256_v18, %v5254_v9 }
 0x1dd   : > { %v2521_v26 = vpack.c.bf16 %v2505_v27, %v2505_v27  ;;  %v2115_v50 = vmul.f32 %v5438_v30, %v2095_v51  ;;  %v2735_v1 = vunpack.c.l.b16 %v2698_v52  ;;  %v1918_v23 = vadd.f32 %v1887_v49, %v1740_v16 }
 0x1de   : > { %v5506_v43 = vunpack.c.l.b16 %v2234_v32 }
 0x1df   : > { %v5508_v34 = vunpack.c.l.b16 %v2521_v26  ;;  %v2135_v17 = vadd.f32 %v5441_v2, %v2115_v50  ;;  %v2749_v63 = vpack.c.b16 %v2735_v1, %v2395_v11  ;;  %v1030_v26 = vadd.f32 %v5383_v54, %v842_v29 }
 0x1e0   : > { %v2927_v44 = vpack.c.b16 %v5506_v43, %v5484_v31  ;;  %v1563_v54 = vadd.f32 %v1535_v36, %v5381_v8 }
 0x1e1   : > { %v3105_v3 = vpack.c.b16 %v5508_v34, %v5486_v40  ;;  %v2151_v22 = vmax.f32 %v2135_v17, 0.0  ;;  %4338 = vmatmul.msk.bf16.gmra.mxu0 %vm459_vm0, %v2749_v63  ;;  %v1208_v63 = vadd.f32 %v5385_v19, %v1030_v26 }
 0x1e2   : > { %v2065_v5 = vpop.f32.mrf.mxu0  ;;  %v2219_v60 = vld [vmem:[#allocation2 + $0x51] sm:$0xff]  ;;  %v1711_v11 = vpop.f32.mrf.mxu2 }
 0x1e3   : > { %v2183_v35 = vld [vmem:[#allocation2 + $0x50] sm:$0xff]  ;;  %2167 = vst.msk [vmem:[#allocation2 + $0x61] sm:$0xff] %vm459_vm0, %v2151_v22  ;;  %v2096_v48 = vadd.f32 %v2065_v5, %v1918_v23  ;;  %v1889_v45 = vpop.f32.mrf.mxu3  ;;  %v2235_v46 = vpack.c.bf16 %v2219_v60, %v2219_v60  ;;  %v1741_v49 = vadd.f32 %v1711_v11, %v1562_v59  ;;  %v1386_v29 = vadd.f32 %v5391_v0, %v1208_v63 }
 0x1e4   : > { %v2506_v57 = vld [vmem:[#allocation2 + $0x52] sm:$0xff]  ;;  %v2199_v27 = vpack.c.bf16 %v2183_v35, %v2183_v35 }
 0x1e5   : > { %v2522_v51 = vpack.c.bf16 %v2506_v57, %v2506_v57  ;;  %v2116_v52 = vmul.f32 %v5438_v30, %v2096_v48  ;;  %v5521_v28 = vunpack.c.l.b16 %v2235_v46  ;;  %v1919_v16 = vadd.f32 %v1889_v45, %v1741_v49  ;;  %v1540_v46 = vpop.f32.mrf.mxu1 }
 0x1e6   : > { %v2397_v55 = vunpack.c.l.b16 %v2199_v27 }
 0x1e7   : > { %v5523_v32 = vunpack.c.l.b16 %v2522_v51  ;;  %v2136_v50 = vadd.f32 %v5441_v2, %v2116_v52  ;;  %v5529_v23 = vpack.c.b16 %v5521_v28, %v5506_v43 }
 0x1e8   : > { %v5531_v17 = vpack.c.b16 %v2397_v55, %v2735_v1 }
 0x1e9   : > { %v2572_v9 = vpack.c.b16 %v5523_v32, %v5508_v34  ;;  %v2152_v18 = vmax.f32 %v2136_v50, 0.0  ;;  %4291 = vmatmul.msk.bf16.gmra.mxu1 %vm459_vm0, %v5529_v23 }
 0x1ea   : > { %4307 = vmatmul.msk.bf16.gmra.mxu2 %vm459_vm0, %v5531_v17  ;;  %v2067_v22 = vpop.f32.mrf.mxu0  ;;  %v2684_v59 = vld [vmem:[#allocation2 + $0x60] sm:$0xff]  ;;  %v1714_v35 = vpop.f32.mrf.mxu2 }
 0x1eb   : > { %4323 = vmatmul.msk.bf16.gmra.mxu3 %vm459_vm0, %v2572_v9  ;;  %v2220_v1 = vld [vmem:[#allocation2 + $0x61] sm:$0xff]  ;;  %2168 = vst.msk [vmem:[#allocation2 + $0x71] sm:$0xff] %vm459_vm0, %v2152_v18  ;;  %v2097_v60 = vadd.f32 %v2067_v22, %v1919_v16  ;;  %v1892_v57 = vpop.f32.mrf.mxu3  ;;  %v2700_v48 = vpack.c.bf16 %v2684_v59, %v2684_v59  ;;  %v1742_v27 = vadd.f32 %v1714_v35, %v1563_v54 }
 0x1ec   : > { %v2507_v5 = vld [vmem:[#allocation2 + $0x62] sm:$0xff]  ;;  %v2236_v11 = vpack.c.bf16 %v2220_v1, %v2220_v1  ;;  %v1564_v18 = vadd.f32 %v1537_v33, %v1386_v29 }
 0x1ed   : > { %v2523_v45 = vpack.c.bf16 %v2507_v5, %v2507_v5  ;;  %v2117_v8 = vmul.f32 %v5438_v30, %v2097_v60  ;;  %v2737_v36 = vunpack.c.l.b16 %v2700_v48  ;;  %v1920_v49 = vadd.f32 %v1892_v57, %v1742_v27  ;;  %v4461_v57 = vld [vmem:[#allocation9 + $0x40] sm:$0xff]  ;;  %v1542_v29 = vpop.f32.mrf.mxu1 }
 0x1ee   : > { %v5544_v19 = vunpack.c.l.b16 %v2236_v11  ;;  %2977 = vmatpush.bf16.msrb.mxu1 %v4461_v57 }
 0x1ef   : > { %v5546_v51 = vunpack.c.l.b16 %v2523_v45  ;;  %v2137_v52 = vadd.f32 %v5441_v2, %v2117_v8  ;;  %v2750_v26 = vpack.c.b16 %v2737_v36, %v2397_v55  ;;  %v1032_v8 = vadd.f32 %v5396_v39, %v5283_v41 }
 0x1f0   : > { %v2928_v16 = vpack.c.b16 %v5544_v19, %v5521_v28  ;;  %v1565_v41 = vadd.f32 %v1540_v46, %v5394_v25 }
 0x1f1   : > { %v2153_v9 = vmax.f32 %v2137_v52, 0.0  ;;  %4339 = vmatmul.msk.bf16.gmra.mxu0 %vm459_vm0, %v2750_v26  ;;  %v1210_v39 = vadd.f32 %v5398_v42, %v1032_v8 }
 0x1f2   : > { %v2070_v54 = vpop.f32.mrf.mxu0  ;;  %v2221_v22 = vld [vmem:[#allocation2 + $0x71] sm:$0xff]  ;;  %v1716_v63 = vpop.f32.mrf.mxu2 }
 0x1f3   : > { %v2185_v59 = vld [vmem:[#allocation2 + $0x70] sm:$0xff]  ;;  %2169 = vst.msk [vmem:[#allocation2 + $0x81] sm:$0xff] %vm459_vm0, %v2153_v9  ;;  %v2098_v0 = vadd.f32 %v2070_v54, %v1920_v49  ;;  %v1894_v5 = vpop.f32.mrf.mxu3  ;;  %v2237_v55 = vpack.c.bf16 %v2221_v22, %v2221_v22  ;;  %v1743_v48 = vadd.f32 %v1716_v63, %v1564_v18  ;;  %v1388_v25 = vadd.f32 %v5404_v4, %v1210_v39 }
 0x1f4   : > { %v2508_v1 = vld [vmem:[#allocation2 + $0x72] sm:$0xff]  ;;  %v2201_v60 = vpack.c.bf16 %v2185_v59, %v2185_v59 }
 0x1f5   : > { %v2524_v35 = vpack.c.bf16 %v2508_v1, %v2508_v1  ;;  %v2118_v11 = vmul.f32 %v5438_v30, %v2098_v0  ;;  %v5557_v45 = vunpack.c.l.b16 %v2237_v55  ;;  %v1921_v49 = vadd.f32 %v1894_v5, %v1743_v48  ;;  %v2222_v5 = vld [vmem:[#allocation2 + $0xa1] sm:$0xff] }
 0x1f6   : > { %v2399_v27 = vunpack.c.l.b16 %v2201_v60  ;;  %v2186_v55 = vld [vmem:[#allocation2 + $0xa0] sm:$0xff]  ;;  %v2238_v42 = vpack.c.bf16 %v2222_v5, %v2222_v5 }
 0x1f7   : > { %v5559_v33 = vunpack.c.l.b16 %v2524_v35  ;;  %v2138_v52 = vadd.f32 %v5441_v2, %v2118_v11  ;;  %v5566_v26 = vpack.c.b16 %v5557_v45, %v5544_v19  ;;  %v2509_v60 = vld [vmem:[#allocation2 + $0xa2] sm:$0xff]  ;;  %v2202_v46 = vpack.c.bf16 %v2186_v55, %v2186_v55 }
 0x1f8   : > { %v5568_v9 = vpack.c.b16 %v2399_v27, %v2737_v36  ;;  %v2525_v11 = vpack.c.bf16 %v2509_v60, %v2509_v60 }
 0x1f9   : > { %v2573_v18 = vpack.c.b16 %v5559_v33, %v5546_v51  ;;  %v2154_v54 = vmax.f32 %v2138_v52, 0.0  ;;  %4292 = vmatmul.msk.bf16.gmra.mxu1 %vm459_vm0, %v5566_v26 }
 0x1fa   : > { %4308 = vmatmul.msk.bf16.gmra.mxu2 %vm459_vm0, %v5568_v9  ;;  %v2072_v22 = vpop.f32.mrf.mxu0  ;;  %v2686_v59 = vld [vmem:[#allocation2 + $0x80] sm:$0xff]  ;;  %v1719_v1 = vpop.f32.mrf.mxu2  ;;  %v2562_v4 = vunpack.c.l.b16 %v2525_v11 }
 0x1fb   : > { %4324 = vmatmul.msk.bf16.gmra.mxu3 %vm459_vm0, %v2573_v18  ;;  %2170 = vst.msk [vmem:[#allocation2 + $0xb1] sm:$0xff] %vm459_vm0, %v2154_v54  ;;  %v2099_v36 = vadd.f32 %v2072_v22, %v1921_v49  ;;  %v1897_v0 = vpop.f32.mrf.mxu3  ;;  %v2702_v63 = vpack.c.bf16 %v2686_v59, %v2686_v59  ;;  %v1744_v35 = vadd.f32 %v1719_v1, %v1565_v41  ;;  %v1545_v18 = vpop.f32.mrf.mxu1 }
 0x1fc   : > { %v1566_v22 = vadd.f32 %v1542_v29, %v1388_v25 }
 0x1fd   : > { %v2119_v57 = vmul.f32 %v5438_v30, %v2099_v36  ;;  %v5581_v48 = vunpack.c.l.b16 %v2702_v63  ;;  %v1922_v52 = vadd.f32 %v1897_v0, %v1744_v35  ;;  %v2275_v36 = vunpack.c.l.b16 %v2238_v42 }
 0x1fe   : > { %v2400_v63 = vunpack.c.l.b16 %v2202_v46  ;;  %v1034_v42 = vadd.f32 %v5409_v6, %v5304_v56 }
 0x1ff   : > { %v2139_v8 = vadd.f32 %v5441_v2, %v2119_v57  ;;  %v2751_v49 = vpack.c.b16 %v5581_v48, %v2399_v27 }
 0x201   : > { %v2155_v54 = vmax.f32 %v2139_v8, 0.0  ;;  %4340 = vmatmul.msk.bf16.gmra.mxu0 %vm459_vm0, %v2751_v49 }
 0x202   : > { %v2075_v41 = vpop.f32.mrf.mxu0  ;;  %v2223_v59 = vld [vmem:[#allocation2 + $0xb1] sm:$0xff]  ;;  %v1721_v5 = vpop.f32.mrf.mxu2 }
 0x203   : > { %v2187_v1 = vld [vmem:[#allocation2 + $0xb0] sm:$0xff]  ;;  %2171 = vst.msk [vmem:[#allocation2 + $0xc1] sm:$0xff] %vm459_vm0, %v2155_v54  ;;  %v2100_v39 = vadd.f32 %v2075_v41, %v1922_v52  ;;  %v1899_v55 = vpop.f32.mrf.mxu3  ;;  %v2239_v0 = vpack.c.bf16 %v2223_v59, %v2223_v59  ;;  %v1745_v35 = vadd.f32 %v1721_v5, %v1566_v22  ;;  %v1567_v22 = vadd.f32 %v1545_v18, %v5407_v15  ;;  %v1547_v59 = vpop.f32.mrf.mxu1 }
 0x204   : > { %v2510_v50 = vld [vmem:[#allocation2 + $0xb2] sm:$0xff]  ;;  %v2203_v60 = vpack.c.bf16 %v2187_v1, %v2187_v1  ;;  %v1212_v41 = vadd.f32 %v5411_v47, %v1034_v42 }
 0x205   : > { %v2526_v27 = vpack.c.bf16 %v2510_v50, %v2510_v50  ;;  %v2120_v57 = vmul.f32 %v5438_v30, %v2100_v39  ;;  %v5589_v8 = vunpack.c.l.b16 %v2239_v0  ;;  %v1923_v46 = vadd.f32 %v1899_v55, %v1745_v35 }
 0x206   : > { %v2401_v29 = vunpack.c.l.b16 %v2203_v60  ;;  %v1390_v35 = vadd.f32 %v5419_v12, %v1212_v41 }
 0x207   : > { %v5591_v25 = vunpack.c.l.b16 %v2526_v27  ;;  %v2140_v11 = vadd.f32 %v5441_v2, %v2120_v57  ;;  %v2287_v52 = vpack.c.b16 %v5589_v8, %v2275_v36 }
 0x208   : > { %v2412_v49 = vpack.c.b16 %v2401_v29, %v2400_v63 }
 0x209   : > { %v2574_v54 = vpack.c.b16 %v5591_v25, %v2562_v4  ;;  %v2156_v50 = vmax.f32 %v2140_v11, 0.0  ;;  %4293 = vmatmul.msk.bf16.gmra.mxu1 %vm459_vm0, %v2287_v52 }
 0x20a   : > { %4309 = vmatmul.msk.bf16.gmra.mxu2 %vm459_vm0, %v2412_v49  ;;  %v2077_v1 = vpop.f32.mrf.mxu0  ;;  %v2688_v56 = vld [vmem:[#allocation2 + $0xc0] sm:$0xff]  ;;  %v1724_v63 = vpop.f32.mrf.mxu2 }
 0x20b   : > { %4325 = vmatmul.msk.bf16.gmra.mxu3 %vm459_vm0, %v2574_v54  ;;  %v2224_v6 = vld [vmem:[#allocation2 + $0xc1] sm:$0xff]  ;;  %2172 = vst.msk [vmem:[#allocation2 + $0xd1] sm:$0xff] %vm459_vm0, %v2156_v50  ;;  %v2101_v36 = vadd.f32 %v2077_v1, %v1923_v46  ;;  %v1902_v4 = vpop.f32.mrf.mxu3  ;;  %v2704_v5 = vpack.c.bf16 %v2688_v56, %v2688_v56  ;;  %v1746_v60 = vadd.f32 %v1724_v63, %v1567_v22 }
 0x20c   : > { %v2511_v39 = vld [vmem:[#allocation2 + $0xc2] sm:$0xff]  ;;  %v2240_v55 = vpack.c.bf16 %v2224_v6, %v2224_v6  ;;  %v1568_v54 = vadd.f32 %v1547_v59, %v1390_v35 }
 0x20d   : > { %v2527_v0 = vpack.c.bf16 %v2511_v39, %v2511_v39  ;;  %v2121_v15 = vmul.f32 %v5438_v30, %v2101_v36  ;;  %v2741_v18 = vunpack.c.l.b16 %v2704_v5  ;;  %v1924_v57 = vadd.f32 %v1902_v4, %v1746_v60  ;;  %v1550_v4 = vpop.f32.mrf.mxu1 }
 0x20e   : > { %v5605_v47 = vunpack.c.l.b16 %v2240_v55  ;;  %v1036_v60 = vadd.f32 %v5425_v24, %v5324_v37  ;;  %v1569_v37 = vadd.f32 %v1550_v4, %v5423_v58 }
 0x20f   : > { %v5607_v27 = vunpack.c.l.b16 %v2527_v0  ;;  %v2141_v42 = vadd.f32 %v5441_v2, %v2121_v15  ;;  %v2752_v11 = vpack.c.b16 %v2741_v18, %v2401_v29 }
 0x210   : > { %v2930_v46 = vpack.c.b16 %v5605_v47, %v5589_v8  ;;  %v1214_v24 = vadd.f32 %v5427_v20, %v1036_v60 }
 0x211   : > { %v3108_v52 = vpack.c.b16 %v5607_v27, %v5591_v25  ;;  %v2157_v49 = vmax.f32 %v2141_v42, 0.0  ;;  %4341 = vmatmul.msk.bf16.gmra.mxu0 %vm459_vm0, %v2752_v11 }
 0x212   : > { %v2080_v50 = vpop.f32.mrf.mxu0  ;;  %v2225_v22 = vld [vmem:[#allocation2 + $0xd1] sm:$0xff]  ;;  %v1726_v41 = vpop.f32.mrf.mxu2  ;;  %v1392_v60 = vadd.f32 %v5431_v53, %v1214_v24 }
 0x213   : > { %v2189_v1 = vld [vmem:[#allocation2 + $0xd0] sm:$0xff]  ;;  %2173 = vst.msk [vmem:[#allocation2 + $0xe1] sm:$0xff] %vm459_vm0, %v2157_v49  ;;  %v2102_v12 = vadd.f32 %v2080_v50, %v1924_v57  ;;  %v1904_v6 = vpop.f32.mrf.mxu3  ;;  %v2241_v29 = vpack.c.bf16 %v2225_v22, %v2225_v22  ;;  %v1747_v63 = vadd.f32 %v1726_v41, %v1568_v54 }
 0x214   : > { %v2512_v56 = vld [vmem:[#allocation2 + $0xd2] sm:$0xff]  ;;  %v2205_v39 = vpack.c.bf16 %v2189_v1, %v2189_v1 }
 0x215   : > { %v2528_v36 = vpack.c.bf16 %v2512_v56, %v2512_v56  ;;  %v2122_v5 = vmul.f32 %v5438_v30, %v2102_v12  ;;  %v5618_v55 = vunpack.c.l.b16 %v2241_v29  ;;  %v1925_v15 = vadd.f32 %v1904_v6, %v1747_v63 }
 0x216   : > { %v2403_v0 = vunpack.c.l.b16 %v2205_v39  ;;  %v4464_v39 = vld [vmem:[#allocation9 + $0x58] sm:$0xff] }
 0x217   : > { %v5620_v59 = vunpack.c.l.b16 %v2528_v36  ;;  %v2142_v35 = vadd.f32 %v5441_v2, %v2122_v5  ;;  %v5627_v57 = vpack.c.b16 %v5618_v55, %v5605_v47  ;;  %v4466_v36 = vld [vmem:[#allocation9 + $0x68] sm:$0xff]  ;;  %3154 = vmatpush.bf16.msra.mxu2 %v4464_v39 }
 0x218   : > { %v5629_v42 = vpack.c.b16 %v2403_v0, %v2741_v18  ;;  %3332 = vmatpush.bf16.msra.mxu3 %v4466_v36 }
 0x219   : > { %v2575_v11 = vpack.c.b16 %v5620_v59, %v5607_v27  ;;  %v2158_v49 = vmax.f32 %v2142_v35, 0.0  ;;  %4294 = vmatmul.msk.bf16.gmra.mxu1 %vm459_vm0, %v5627_v57  ;;  %v1552_v35 = vpop.f32.mrf.mxu1 }
 0x21a   : > { %4310 = vmatmul.msk.bf16.gmra.mxu2 %vm459_vm0, %v5629_v42  ;;  %v2082_v54 = vpop.f32.mrf.mxu0  ;;  %v2690_v50 = vld [vmem:[#allocation2 + $0xe0] sm:$0xff]  ;;  %v1729_v56 = vpop.f32.mrf.mxu2 }
 0x21b   : > { %4326 = vmatmul.msk.bf16.gmra.mxu3 %vm459_vm0, %v2575_v11  ;;  %v2226_v18 = vld [vmem:[#allocation2 + $0xe1] sm:$0xff]  ;;  %2174 = vst.msk [vmem:[#allocation2 + $0xf1] sm:$0xff] %vm459_vm0, %v2158_v49  ;;  %v2103_v1 = vadd.f32 %v2082_v54, %v1925_v15  ;;  %v1907_v12 = vpop.f32.mrf.mxu3  ;;  %v2706_v41 = vpack.c.bf16 %v2690_v50, %v2690_v50  ;;  %v1748_v63 = vadd.f32 %v1729_v56, %v1569_v37  ;;  %v4468_v37 = vld [vmem:[#allocation9 + $0x78] sm:$0xff] }
 0x21c   : > { %v2513_v22 = vld [vmem:[#allocation2 + $0xe2] sm:$0xff]  ;;  %v2242_v6 = vpack.c.bf16 %v2226_v18, %v2226_v18  ;;  %v1570_v18 = vadd.f32 %v1552_v35, %v1392_v60  ;;  %3510 = vmatpush.bf16.msra.mxu0 %v4468_v37 }
 0x21d   : > { %v2529_v29 = vpack.c.bf16 %v2513_v22, %v2513_v22  ;;  %v2123_v58 = vmul.f32 %v5438_v30, %v2103_v1  ;;  %v2743_v20 = vunpack.c.l.b16 %v2706_v41  ;;  %v1926_v15 = vadd.f32 %v1907_v12, %v1748_v63  ;;  %v4463_v35 = vld [vmem:[#allocation9 + $0x50] sm:$0xff] }
 0x21e   : > { %v5642_v4 = vunpack.c.l.b16 %v2242_v6  ;;  %3155 = vmatpush.bf16.msra.mxu2 %v4463_v35 }
 0x21f   : > { %v5644_v5 = vunpack.c.l.b16 %v2529_v29  ;;  %v2143_v11 = vadd.f32 %v5441_v2, %v2123_v58  ;;  %v2753_v49 = vpack.c.b16 %v2743_v20, %v2403_v0 }
 0x220   : > { %v2931_v54 = vpack.c.b16 %v5642_v4, %v5618_v55 }
 0x221   : > { %v2159_v50 = vmax.f32 %v2143_v11, 0.0  ;;  %4342 = vmatmul.msk.bf16.gmra.mxu0 %vm459_vm0, %v2753_v49  ;;  %v4465_v49 = vld [vmem:[#allocation9 + $0x60] sm:$0xff] }
 0x222   : > { %v2085_v22 = vpop.f32.mrf.mxu0  ;;  %v2227_v1 = vld [vmem:[#allocation2 + $0xf1] sm:$0xff]  ;;  %v1731_v24 = vpop.f32.mrf.mxu2  ;;  %3333 = vmatpush.bf16.msra.mxu3 %v4465_v49 }
 0x223   : > { %v2191_v56 = vld [vmem:[#allocation2 + $0xf0] sm:$0xff]  ;;  %2175 = vst.msk [vmem:[#allocation2 + $0x101] sm:$0xff] %vm459_vm0, %v2159_v50  ;;  %v2104_v53 = vadd.f32 %v2085_v22, %v1926_v15  ;;  %v2243_v12 = vpack.c.bf16 %v2227_v1, %v2227_v1  ;;  %v1749_v29 = vadd.f32 %v1731_v24, %v1570_v18  ;;  %v1909_v36 = vpop.f32.mrf.mxu3 }
 0x224   : > { %v2514_v41 = vld [vmem:[#allocation2 + $0xf2] sm:$0xff]  ;;  %v2207_v0 = vpack.c.bf16 %v2191_v56, %v2191_v56 }
 0x225   : > { %v2530_v6 = vpack.c.bf16 %v2514_v41, %v2514_v41  ;;  %v2124_v39 = vmul.f32 %v5438_v30, %v2104_v53  ;;  %v5655_v63 = vunpack.c.l.b16 %v2243_v12  ;;  %v1927_v60 = vadd.f32 %v1909_v36, %v1749_v29  ;;  %v4470_v29 = vld [vmem:[#allocation9 + $0x88] sm:$0xff] }
 0x226   : > { %v2405_v58 = vunpack.c.l.b16 %v2207_v0  ;;  %3688 = vmatpush.bf16.msra.mxu1 %v4470_v29 }
 0x227   : > { %v5657_v11 = vunpack.c.l.b16 %v2530_v6  ;;  %v2144_v50 = vadd.f32 %v5441_v2, %v2124_v39  ;;  %v5662_v15 = vpack.c.b16 %v5655_v63, %v5642_v4 }
 0x228   : > { %v5664_v22 = vpack.c.b16 %v2405_v58, %v2743_v20 }
 0x229   : > { %v2576_v18 = vpack.c.b16 %v5657_v11, %v5644_v5  ;;  %v2160_v1 = vmax.f32 %v2144_v50, 0.0  ;;  %4295 = vmatmul.msk.bf16.gmra.mxu1 %vm459_vm0, %v5662_v15 }
 0x22a   : > { %4311 = vmatmul.msk.bf16.gmra.mxu2 %vm459_vm0, %v5664_v22  ;;  %v2087_v56 = vpop.f32.mrf.mxu0  ;;  %v2692_v41 = vld [vmem:[#allocation2 + $0x100] sm:$0xff] }
 0x22b   : > { %4327 = vmatmul.msk.bf16.gmra.mxu3 %vm459_vm0, %v2576_v18  ;;  %v2228_v53 = vld [vmem:[#allocation2 + $0x101] sm:$0xff]  ;;  %2176 = vst.msk [vmem:[#allocation2 + $0x111] sm:$0xff] %vm459_vm0, %v2160_v1  ;;  %v2105_v20 = vadd.f32 %v2087_v56, %v1927_v60  ;;  %v2708_v12 = vpack.c.bf16 %v2692_v41, %v2692_v41 }
 0x22c   : > { %v2515_v24 = vld [vmem:[#allocation2 + $0x102] sm:$0xff]  ;;  %v2244_v0 = vpack.c.bf16 %v2228_v53, %v2228_v53 }
 0x22d   : > { %v2531_v6 = vpack.c.bf16 %v2515_v24, %v2515_v24  ;;  %v2125_v39 = vmul.f32 %v5438_v30, %v2105_v20  ;;  %v2745_v36 = vunpack.c.l.b16 %v2708_v12  ;;  %v4467_v56 = vld [vmem:[#allocation9 + $0x70] sm:$0xff] }
 0x22e   : > { %v5675_v35 = vunpack.c.l.b16 %v2244_v0  ;;  %3511 = vmatpush.bf16.msra.mxu0 %v4467_v56 }
 0x22f   : > { %v5677_v49 = vunpack.c.l.b16 %v2531_v6  ;;  %v2145_v50 = vadd.f32 %v5441_v2, %v2125_v39  ;;  %v2754_v18 = vpack.c.b16 %v2745_v36, %v2405_v58 }
 0x230   : > { %v2932_v37 = vpack.c.b16 %v5675_v35, %v5655_v63 }
 0x231   : > { %v3110_v60 = vpack.c.b16 %v5677_v49, %v5657_v11  ;;  %v2161_v1 = vmax.f32 %v2145_v50, 0.0  ;;  %4343 = vmatmul.msk.bf16.gmra.mxu0 %vm459_vm0, %v2754_v18 }
 0x232   : > { %v2229_v30 = vld [vmem:[#allocation2 + $0x111] sm:$0xff] }
 0x233   : > { %v2193_v41 = vld [vmem:[#allocation2 + $0x110] sm:$0xff]  ;;  %2177 = vst.msk [vmem:[#allocation2 + $0x121] sm:$0xff] %vm459_vm0, %v2161_v1  ;;  %v2245_v24 = vpack.c.bf16 %v2229_v30, %v2229_v30 }
 0x234   : > { %v2516_v53 = vld [vmem:[#allocation2 + $0x112] sm:$0xff]  ;;  %v2209_v20 = vpack.c.bf16 %v2193_v41, %v2193_v41 }
 0x235   : > { %v2532_v12 = vpack.c.bf16 %v2516_v53, %v2516_v53  ;;  %v5686_v2 = vunpack.c.l.b16 %v2245_v24 }
 0x236   : > { %v2407_v58 = vunpack.c.l.b16 %v2209_v20 }
 0x237   : > { %v5688_v0 = vunpack.c.l.b16 %v2532_v12  ;;  %v5692_v6 = vpack.c.b16 %v5686_v2, %v5675_v35 }
 0x238   : > { %v5694_v29 = vpack.c.b16 %v2407_v58, %v2745_v36 }
 0x239   : > { %v2577_v39 = vpack.c.b16 %v5688_v0, %v5677_v49  ;;  %4296 = vmatmul.msk.bf16.gmra.mxu1 %vm459_vm0, %v5692_v6 }
 0x23a   : > { %4312 = vmatmul.msk.bf16.gmra.mxu2 %vm459_vm0, %v5694_v29  ;;  %v2694_v50 = vld [vmem:[#allocation2 + $0x120] sm:$0xff] }
 0x23b   : > { %4328 = vmatmul.msk.bf16.gmra.mxu3 %vm459_vm0, %v2577_v39  ;;  %v2710_v18 = vpack.c.bf16 %v2694_v50, %v2694_v50 }
 0x23d   : > { %v5703_v1 = vunpack.c.l.b16 %v2710_v18 }
 0x23f   : > { %v2755_v56 = vpack.c.b16 %v5703_v1, %v2407_v58 }
 0x241   : > { %4344 = vmatmul.msk.bf16.gmra.mxu0 %vm459_vm0, %v2755_v56 }
 0x246   : > { %v2336_v36 = vpop.f32.mrf.mxu1 }
 0x249   : > { %4353 = vmatmul.msk.bf16.vlgmr.msrb.gmra.mxu1 %vm459_vm0, %v2926_v13 }
 0x24a   : > { %4369 = vmatmul.msk.bf16.vlgmr.msra.gmra.mxu2 %vm459_vm0, %v3104_v10 }
 0x24b   : > { %4385 = vmatmul.msk.bf16.vlgmr.msra.gmra.mxu3 %vm459_vm0, %v5493_v14 }
 0x24d   : > { %v2461_v30 = vpop.f32.mrf.mxu2 }
 0x24e   : > { %v2462_v41 = vadd.f32 %v2461_v30, %v2336_v36  ;;  %v2623_v53 = vpop.f32.mrf.mxu3  ;;  %v2338_v24 = vpop.f32.mrf.mxu1 }
 0x24f   : > { %v2801_v20 = vpop.f32.mrf.mxu0 }
 0x250   : > { %v2663_v12 = vadd.f32 %v2623_v53, %v2462_v41 }
 0x251   : > { %4401 = vmatmul.msk.bf16.vlgmr.msra.gmra.mxu0 %vm459_vm0, %v5491_v7 }
 0x252   : > { %v5717_v58 = vadd.f32 %v2801_v20, %v2663_v12  ;;  %v3042_v20 = vld [vmem:[#allocation2 + $0x82] sm:$0xff] }
 0x255   : > { %v2463_v61 = vpop.f32.mrf.mxu2 }
 0x256   : > { %v2464_v62 = vadd.f32 %v2463_v61, %v2338_v24  ;;  %v2625_v13 = vpop.f32.mrf.mxu3  ;;  %v2341_v21 = vpop.f32.mrf.mxu1  ;;  %v2864_v24 = vld [vmem:[#allocation2 + $0x81] sm:$0xff] }
 0x257   : > { %v2803_v38 = vpop.f32.mrf.mxu0 }
 0x258   : > { %v2664_v10 = vadd.f32 %v2625_v13, %v2464_v62  ;;  %v3220_v62 = vld [vmem:[#allocation2 + $0x90] sm:$0xff] }
 0x259   : > { %4354 = vmatmul.msk.bf16.gmra.mxu1 %vm459_vm0, %v2927_v44 }
 0x25a   : > { %v5721_v39 = vadd.f32 %v2803_v38, %v2664_v10  ;;  %4370 = vmatmul.msk.bf16.gmra.mxu2 %vm459_vm0, %v3105_v3  ;;  %v3236_v38 = vpack.c.bf16 %v3220_v62, %v3220_v62 }
 0x25b   : > { %4386 = vmatmul.msk.bf16.gmra.mxu3 %vm459_vm0, %v5531_v17  ;;  %v6184_v17 = vpack.c.b16 %v5546_v51, %v5523_v32 }
 0x25d   : > { %v2466_v7 = vpop.f32.mrf.mxu2 }
 0x25e   : > { %v2467_v14 = vadd.f32 %v2466_v7, %v2341_v21  ;;  %v2628_v50 = vpop.f32.mrf.mxu3  ;;  %v2343_v18 = vpop.f32.mrf.mxu1  ;;  %v3058_v21 = vpack.c.bf16 %v3042_v20, %v3042_v20  ;;  %v3273_v7 = vunpack.c.l.b16 %v3236_v38 }
 0x25f   : > { %v2806_v56 = vpop.f32.mrf.mxu0 }
 0x260   : > { %v2665_v36 = vadd.f32 %v2628_v50, %v2467_v14  ;;  %v3398_v14 = vld [vmem:[#allocation2 + $0x91] sm:$0xff] }
 0x261   : > { %4402 = vmatmul.msk.bf16.gmra.mxu0 %vm459_vm0, %v5529_v23  ;;  %v4469_v23 = vld [vmem:[#allocation9 + $0x80] sm:$0xff] }
 0x262   : > { %v5733_v30 = vadd.f32 %v2806_v56, %v2665_v36  ;;  %3689 = vmatpush.bf16.msra.mxu1 %v4469_v23 }
 0x265   : > { %v2468_v31 = vpop.f32.mrf.mxu2 }
 0x266   : > { %v2469_v43 = vadd.f32 %v2468_v31, %v2343_v18  ;;  %v2630_v44 = vpop.f32.mrf.mxu3  ;;  %v2346_v40 = vpop.f32.mrf.mxu1 }
 0x267   : > { %v2808_v34 = vpop.f32.mrf.mxu0 }
 0x268   : > { %v2666_v3 = vadd.f32 %v2630_v44, %v2469_v43 }
 0x269   : > { %4355 = vmatmul.msk.bf16.gmra.mxu1 %vm459_vm0, %v2928_v16  ;;  %v2880_v16 = vpack.c.bf16 %v2864_v24, %v2864_v24 }
 0x26a   : > { %v5737_v41 = vadd.f32 %v2808_v34, %v2666_v3  ;;  %4371 = vmatmul.msk.bf16.gmra.mxu2 %vm459_vm0, %v6184_v17  ;;  %v3285_v34 = vpack.c.b16 %v3273_v7, %v5581_v48 }
 0x26b   : > { %4387 = vmatmul.msk.bf16.gmra.mxu3 %vm459_vm0, %v5568_v9  ;;  %v2917_v51 = vunpack.c.l.b16 %v2880_v16  ;;  %v5753_v9 = vunpack.c.l.b16 %v3058_v21 }
 0x26d   : > { %v2471_v53 = vpop.f32.mrf.mxu2  ;;  %v2929_v43 = vpack.c.b16 %v2917_v51, %v5557_v45  ;;  %v3107_v44 = vpack.c.b16 %v5753_v9, %v5559_v33 }
 0x26e   : > { %v2472_v12 = vadd.f32 %v2471_v53, %v2346_v40  ;;  %v2633_v61 = vpop.f32.mrf.mxu3  ;;  %v2348_v13 = vpop.f32.mrf.mxu1  ;;  %v3414_v40 = vpack.c.bf16 %v3398_v14, %v3398_v14 }
 0x26f   : > { %v2811_v28 = vpop.f32.mrf.mxu0 }
 0x270   : > { %v2667_v19 = vadd.f32 %v2633_v61, %v2472_v12  ;;  %v3451_v3 = vunpack.c.l.b16 %v3414_v40 }
 0x271   : > { %4403 = vmatmul.msk.bf16.gmra.mxu0 %vm459_vm0, %v5566_v26 }
 0x272   : > { %v5749_v32 = vadd.f32 %v2811_v28, %v2667_v19  ;;  %v3463_v12 = vpack.c.b16 %v3451_v3, %v2917_v51 }
 0x275   : > { %v2473_v10 = vpop.f32.mrf.mxu2 }
 0x276   : > { %v2474_v50 = vadd.f32 %v2473_v10, %v2348_v13  ;;  %v2635_v18 = vpop.f32.mrf.mxu3  ;;  %v2351_v56 = vpop.f32.mrf.mxu1 }
 0x277   : > { %v2813_v36 = vpop.f32.mrf.mxu0 }
 0x278   : > { %v2668_v31 = vadd.f32 %v2635_v18, %v2474_v50 }
 0x279   : > { %4356 = vmatmul.msk.bf16.gmra.mxu1 %vm459_vm0, %v2929_v43 }
 0x27a   : > { %v5759_v26 = vadd.f32 %v2813_v36, %v2668_v31  ;;  %4372 = vmatmul.msk.bf16.gmra.mxu2 %vm459_vm0, %v3107_v44 }
 0x27b   : > { %4388 = vmatmul.msk.bf16.gmra.mxu3 %vm459_vm0, %v3285_v34 }
 0x27d   : > { %v2476_v17 = vpop.f32.mrf.mxu2 }
 0x27e   : > { %v2477_v23 = vadd.f32 %v2476_v17, %v2351_v56  ;;  %v2638_v53 = vpop.f32.mrf.mxu3  ;;  %v2353_v24 = vpop.f32.mrf.mxu1  ;;  %v3050_v17 = vld [vmem:[#allocation2 + $0x122] sm:$0xff] }
 0x27f   : > { %v2816_v45 = vpop.f32.mrf.mxu0  ;;  %v3066_v35 = vpack.c.bf16 %v3050_v17, %v3050_v17 }
 0x280   : > { %v2669_v20 = vadd.f32 %v2638_v53, %v2477_v23 }
 0x281   : > { %4404 = vmatmul.msk.bf16.gmra.mxu0 %vm459_vm0, %v3463_v12  ;;  %v5815_v49 = vunpack.c.l.b16 %v3066_v35 }
 0x282   : > { %v5764_v33 = vadd.f32 %v2816_v45, %v2669_v20 }
 0x285   : > { %v2478_v48 = vpop.f32.mrf.mxu2 }
 0x286   : > { %v2479_v61 = vadd.f32 %v2478_v48, %v2353_v24  ;;  %v2640_v62 = vpop.f32.mrf.mxu3  ;;  %v2356_v13 = vpop.f32.mrf.mxu1  ;;  %v3228_v24 = vld [vmem:[#allocation2 + $0x130] sm:$0xff] }
 0x287   : > { %v2818_v28 = vpop.f32.mrf.mxu0 }
 0x288   : > { %v2670_v19 = vadd.f32 %v2640_v62, %v2479_v61  ;;  %v3406_v61 = vld [vmem:[#allocation2 + $0x131] sm:$0xff] }
 0x289   : > { %4357 = vmatmul.msk.bf16.gmra.mxu1 %vm459_vm0, %v2930_v46 }
 0x28a   : > { %v5767_v16 = vadd.f32 %v2818_v28, %v2670_v19  ;;  %4373 = vmatmul.msk.bf16.gmra.mxu2 %vm459_vm0, %v3108_v52 }
 0x28b   : > { %4389 = vmatmul.msk.bf16.gmra.mxu3 %vm459_vm0, %v5629_v42  ;;  %v6185_v42 = vpack.c.b16 %v5644_v5, %v5620_v59 }
 0x28d   : > { %v2481_v21 = vpop.f32.mrf.mxu2 }
 0x28e   : > { %v2482_v38 = vadd.f32 %v2481_v21, %v2356_v13  ;;  %v2643_v51 = vpop.f32.mrf.mxu3  ;;  %v2358_v10 = vpop.f32.mrf.mxu1 }
 0x28f   : > { %v2821_v7 = vpop.f32.mrf.mxu0 }
 0x290   : > { %v2671_v14 = vadd.f32 %v2643_v51, %v2482_v38  ;;  %v3111_v51 = vpack.c.b16 %v5815_v49, %v5688_v0 }
 0x291   : > { %4405 = vmatmul.msk.bf16.gmra.mxu0 %vm459_vm0, %v5627_v57 }
 0x292   : > { %v5779_v50 = vadd.f32 %v2821_v7, %v2671_v14 }
 0x295   : > { %v2483_v8 = vpop.f32.mrf.mxu2 }
 0x296   : > { %v2484_v47 = vadd.f32 %v2483_v8, %v2358_v10  ;;  %v2645_v46 = vpop.f32.mrf.mxu3  ;;  %v2361_v25 = vpop.f32.mrf.mxu1  ;;  %v3422_v10 = vpack.c.bf16 %v3406_v61, %v3406_v61 }
 0x297   : > { %v2823_v27 = vpop.f32.mrf.mxu0 }
 0x298   : > { %v2672_v52 = vadd.f32 %v2645_v46, %v2484_v47  ;;  %v3459_v14 = vunpack.c.l.b16 %v3422_v10  ;;  %v3570_v47 = vld [vmem:[#allocation2 + $0x32] sm:$0xff] }
 0x299   : > { %4358 = vmatmul.msk.bf16.gmra.mxu1 %vm459_vm0, %v2931_v54 }
 0x29a   : > { %v5783_v18 = vadd.f32 %v2823_v27, %v2672_v52  ;;  %4374 = vmatmul.msk.bf16.gmra.mxu2 %vm459_vm0, %v6185_v42  ;;  %v3569_v52 = vld [vmem:[#allocation2 + $0x22] sm:$0xff] }
 0x29b   : > { %4390 = vmatmul.msk.bf16.gmra.mxu3 %vm459_vm0, %v5664_v22  ;;  %v2872_v22 = vld [vmem:[#allocation2 + $0x121] sm:$0xff] }
 0x29c   : > { %v2888_v63 = vpack.c.bf16 %v2872_v22, %v2872_v22  ;;  %v3572_v22 = vld [vmem:[#allocation2 + $0x52] sm:$0xff] }
 0x29d   : > { %v2486_v57 = vpop.f32.mrf.mxu2 }
 0x29e   : > { %v2487_v56 = vadd.f32 %v2486_v57, %v2361_v25  ;;  %v2648_v36 = vpop.f32.mrf.mxu3  ;;  %v2363_v31 = vpop.f32.mrf.mxu1  ;;  %v2925_v11 = vunpack.c.l.b16 %v2888_v63  ;;  %v3586_v57 = vpack.c.bf16 %v3570_v47, %v3570_v47 }
 0x29f   : > { %v2826_v43 = vpop.f32.mrf.mxu0 }
 0x2a0   : > { %v2673_v44 = vadd.f32 %v2648_v36, %v2487_v56  ;;  %v2933_v38 = vpack.c.b16 %v2925_v11, %v5686_v2  ;;  %v3467_v42 = vpack.c.b16 %v3459_v14, %v2925_v11  ;;  %v3585_v56 = vpack.c.bf16 %v3569_v52, %v3569_v52 }
 0x2a1   : > { %4406 = vmatmul.msk.bf16.gmra.mxu0 %vm459_vm0, %v5662_v15  ;;  %v3623_v36 = vunpack.c.l.b16 %v3586_v57 }
 0x2a2   : > { %v5795_v40 = vadd.f32 %v2826_v43, %v2673_v44  ;;  %v3622_v44 = vunpack.c.l.b16 %v3585_v56  ;;  %v3579_v56 = vld [vmem:[#allocation2 + $0xe2] sm:$0xff] }
 0x2a5   : > { %v2488_v55 = vpop.f32.mrf.mxu2 }
 0x2a6   : > { %v2489_v4 = vadd.f32 %v2488_v55, %v2363_v31  ;;  %v2650_v54 = vpop.f32.mrf.mxu3  ;;  %v2366_v59 = vpop.f32.mrf.mxu1 }
 0x2a7   : > { %v2828_v5 = vpop.f32.mrf.mxu0 }
 0x2a8   : > { %v2674_v34 = vadd.f32 %v2650_v54, %v2489_v4 }
 0x2a9   : > { %4359 = vmatmul.msk.bf16.gmra.mxu1 %vm459_vm0, %v2932_v37  ;;  %v3244_v37 = vpack.c.bf16 %v3228_v24, %v3228_v24  ;;  %v3588_v24 = vpack.c.bf16 %v3572_v22, %v3572_v22  ;;  %v3581_v22 = vld [vmem:[#allocation2 + $0x102] sm:$0xff] }
 0x2aa   : > { %v5799_v3 = vadd.f32 %v2828_v5, %v2674_v34  ;;  %4375 = vmatmul.msk.bf16.gmra.mxu2 %vm459_vm0, %v3110_v60  ;;  %v3638_v5 = vpack.c.b16 %v3623_v36, %v3622_v44 }
 0x2ab   : > { %4391 = vmatmul.msk.bf16.gmra.mxu3 %vm459_vm0, %v5694_v29  ;;  %v3281_v29 = vunpack.c.l.b16 %v3244_v37  ;;  %v3574_v37 = vld [vmem:[#allocation2 + $0x72] sm:$0xff] }
 0x2ac   : > { %v3590_v61 = vpack.c.bf16 %v3574_v37, %v3574_v37 }
 0x2ad   : > { %v2491_v15 = vpop.f32.mrf.mxu2  ;;  %v3289_v7 = vpack.c.b16 %v3281_v29, %v5703_v1 }
 0x2ae   : > { %v2492_v23 = vadd.f32 %v2491_v15, %v2366_v59  ;;  %v2653_v53 = vpop.f32.mrf.mxu3  ;;  %v2368_v45 = vpop.f32.mrf.mxu1 }
 0x2af   : > { %v2831_v20 = vpop.f32.mrf.mxu0 }
 0x2b0   : > { %v2675_v12 = vadd.f32 %v2653_v53, %v2492_v23  ;;  %v3571_v23 = vld [vmem:[#allocation2 + $0x42] sm:$0xff] }
 0x2b1   : > { %4407 = vmatmul.msk.bf16.gmra.mxu0 %vm459_vm0, %v5692_v6 }
 0x2b2   : > { %v5811_v48 = vadd.f32 %v2831_v20, %v2675_v12  ;;  %v3625_v20 = vunpack.c.l.b16 %v3588_v24  ;;  %v3597_v24 = vpack.c.bf16 %v3581_v22, %v3581_v22 }
 0x2b5   : > { %v2493_v60 = vpop.f32.mrf.mxu2 }
 0x2b6   : > { %v2494_v62 = vadd.f32 %v2493_v60, %v2368_v45  ;;  %v2655_v13 = vpop.f32.mrf.mxu3  ;;  %v2371_v28 = vpop.f32.mrf.mxu1  ;;  %v3587_v45 = vpack.c.bf16 %v3571_v23, %v3571_v23  ;;  %v3573_v60 = vld [vmem:[#allocation2 + $0x62] sm:$0xff] }
 0x2b7   : > { %v2833_v19 = vpop.f32.mrf.mxu0 }
 0x2b8   : > { %v2676_v21 = vadd.f32 %v2655_v13, %v2494_v62  ;;  %v3624_v12 = vunpack.c.l.b16 %v3587_v45  ;;  %v3627_v62 = vunpack.c.l.b16 %v3590_v61 }
 0x2b9   : > { %4360 = vmatmul.msk.bf16.gmra.mxu1 %vm459_vm0, %v2933_v38 }
 0x2ba   : > { %v5821_v6 = vadd.f32 %v2833_v19, %v2676_v21  ;;  %4376 = vmatmul.msk.bf16.gmra.mxu2 %vm459_vm0, %v3111_v51  ;;  %v3639_v35 = vpack.c.b16 %v3625_v20, %v3624_v12  ;;  %v3634_v12 = vunpack.c.l.b16 %v3597_v24 }
 0x2bb   : > { %4392 = vmatmul.msk.bf16.gmra.mxu3 %vm459_vm0, %v3289_v7 }
 0x2bd   : > { %v2496_v8 = vpop.f32.mrf.mxu2 }
 0x2be   : > { %v2497_v46 = vadd.f32 %v2496_v8, %v2371_v28  ;;  %v2658_v25 = vpop.f32.mrf.mxu3  ;;  %v2373_v2 = vpop.f32.mrf.mxu1 }
 0x2bf   : > { %v2836_v27 = vpop.f32.mrf.mxu0 }
 0x2c0   : > { %v2677_v0 = vadd.f32 %v2658_v25, %v2497_v46  ;;  %v3577_v46 = vld [vmem:[#allocation2 + $0xc2] sm:$0xff] }
 0x2c1   : > { %4408 = vmatmul.msk.bf16.gmra.mxu0 %vm459_vm0, %v3467_v42 }
 0x2c2   : > { %v5826_v1 = vadd.f32 %v2836_v27, %v2677_v0  ;;  %v3593_v27 = vpack.c.bf16 %v3577_v46, %v3577_v46 }
 0x2c4   : > { %v3630_v52 = vunpack.c.l.b16 %v3593_v27 }
 0x2c5   : > { %v2498_v31 = vpop.f32.mrf.mxu2 }
 0x2c6   : > { %v2499_v43 = vadd.f32 %v2498_v31, %v2373_v2  ;;  %v2660_v55 = vpop.f32.mrf.mxu3  ;;  %v2979_v4 = vpop.f32.mrf.mxu1 }
 0x2c7   : > { %v5830_v59 = vadd.f32 %v2979_v4, %v5717_v58  ;;  %v2838_v34 = vpop.f32.mrf.mxu0 }
 0x2c8   : > { %v2678_v54 = vadd.f32 %v2660_v55, %v2499_v43 }
 0x2c9   : > { %4417 = vmatmul.msk.bf16.vlgmr.msra.gmra.mxu1 %vm459_vm0, %v3638_v5  ;;  %v3582_v5 = vld [vmem:[#allocation2 + $0x112] sm:$0xff] }
 0x2ca   : > { %v5832_v15 = vadd.f32 %v2838_v34, %v2678_v54 }
 0x2ce   : > { %v2981_v17 = vpop.f32.mrf.mxu1  ;;  %v3335_v23 = vpop.f32.mrf.mxu3 }
 0x2cf   : > { %v5836_v53 = vadd.f32 %v2981_v17, %v5721_v39  ;;  %v3589_v39 = vpack.c.bf16 %v3573_v60, %v3573_v60  ;;  %v3584_v60 = vld [vmem:[#allocation2 + $0x132] sm:$0xff] }
 0x2d1   : > { %v3626_v13 = vunpack.c.l.b16 %v3589_v39 }
 0x2d3   : > { %v3640_v21 = vpack.c.b16 %v3627_v62, %v3626_v13  ;;  %v3600_v62 = vpack.c.bf16 %v3584_v60, %v3584_v60 }
 0x2d6   : > { %v2984_v63 = vpop.f32.mrf.mxu1 }
 0x2d7   : > { %v5839_v58 = vadd.f32 %v2984_v63, %v5733_v30  ;;  %v3576_v30 = vld [vmem:[#allocation2 + $0x92] sm:$0xff]  ;;  %v3513_v63 = vpop.f32.mrf.mxu0 }
 0x2d8   : > { %v3592_v10 = vpack.c.bf16 %v3576_v30, %v3576_v30 }
 0x2d9   : > { %4418 = vmatmul.msk.bf16.gmra.mxu1 %vm459_vm0, %v3639_v35 }
 0x2da   : > { %v3629_v7 = vunpack.c.l.b16 %v3592_v10 }
 0x2dc   : > { %v3641_v8 = vpack.c.b16 %v3629_v7, %v5753_v9  ;;  %v3580_v9 = vld [vmem:[#allocation2 + $0xf2] sm:$0xff] }
 0x2dd   : > { %v3596_v31 = vpack.c.bf16 %v3580_v9, %v3580_v9 }
 0x2de   : > { %v2986_v11 = vpop.f32.mrf.mxu1 }
 0x2df   : > { %v5843_v29 = vadd.f32 %v2986_v11, %v5737_v41  ;;  %v3633_v43 = vunpack.c.l.b16 %v3596_v31  ;;  %v3337_v11 = vpop.f32.mrf.mxu3  ;;  %v3515_v13 = vpop.f32.mrf.mxu0 }
 0x2e6   : > { %v2989_v28 = vpop.f32.mrf.mxu1 }
 0x2e7   : > { %v5846_v19 = vadd.f32 %v2989_v28, %v5749_v32  ;;  %v3578_v32 = vld [vmem:[#allocation2 + $0xd2] sm:$0xff]  ;;  %v3637_v28 = vunpack.c.l.b16 %v3600_v62  ;;  %v3518_v7 = vpop.f32.mrf.mxu0 }
 0x2e8   : > { %v3594_v2 = vpack.c.bf16 %v3578_v32, %v3578_v32 }
 0x2e9   : > { %4419 = vmatmul.msk.bf16.gmra.mxu1 %vm459_vm0, %v3640_v21  ;;  %v3340_v21 = vpop.f32.mrf.mxu3 }
 0x2ee   : > { %v2991_v38 = vpop.f32.mrf.mxu1 }
 0x2ef   : > { %v5850_v51 = vadd.f32 %v2991_v38, %v5759_v26  ;;  %v3631_v26 = vunpack.c.l.b16 %v3594_v2 }
 0x2f6   : > { %v2994_v41 = vpop.f32.mrf.mxu1 }
 0x2f7   : > { %v5853_v14 = vadd.f32 %v2994_v41, %v5764_v33  ;;  %v3642_v33 = vpack.c.b16 %v3631_v26, %v3630_v52 }
 0x2f9   : > { %4420 = vmatmul.msk.bf16.gmra.mxu1 %vm459_vm0, %v3641_v8  ;;  %v3342_v8 = vpop.f32.mrf.mxu3 }
 0x2fe   : > { %v2996_v47 = vpop.f32.mrf.mxu1 }
 0x2ff   : > { %v5858_v25 = vadd.f32 %v2996_v47, %v5767_v16  ;;  %v3595_v16 = vpack.c.bf16 %v3579_v56, %v3579_v56  ;;  %v3520_v47 = vpop.f32.mrf.mxu0 }
 0x301   : > { %v3632_v44 = vunpack.c.l.b16 %v3595_v16  ;;  %v3345_v2 = vpop.f32.mrf.mxu3 }
 0x303   : > { %v3643_v54 = vpack.c.b16 %v3633_v43, %v3632_v44 }
 0x306   : > { %v2999_v0 = vpop.f32.mrf.mxu1 }
 0x307   : > { %v5861_v42 = vadd.f32 %v2999_v0, %v5779_v50  ;;  %v3157_v50 = vpop.f32.mrf.mxu2  ;;  %v3523_v26 = vpop.f32.mrf.mxu0 }
 0x309   : > { %4421 = vmatmul.msk.bf16.gmra.mxu1 %vm459_vm0, %v3642_v33 }
 0x30e   : > { %v3001_v57 = vpop.f32.mrf.mxu1 }
 0x30f   : > { %v5865_v36 = vadd.f32 %v3001_v57, %v5783_v18  ;;  %v3598_v18 = vpack.c.bf16 %v3582_v5, %v3582_v5  ;;  %v3159_v20 = vpop.f32.mrf.mxu2 }
 0x310   : > { %v3198_v56 = vadd.f32 %v3159_v20, %v5836_v53 }
 0x311   : > { %v3635_v45 = vunpack.c.l.b16 %v3598_v18 }
 0x312   : > { %v3376_v44 = vadd.f32 %v3337_v11, %v3198_v56 }
 0x313   : > { %v3644_v37 = vpack.c.b16 %v3635_v45, %v3634_v12 }
 0x314   : > { %v3554_v24 = vadd.f32 %v3515_v13, %v3376_v44 }
 0x316   : > { %v3004_v55 = vpop.f32.mrf.mxu1 }
 0x317   : > { %v5868_v4 = vadd.f32 %v3004_v55, %v5795_v40  ;;  %v3162_v39 = vpop.f32.mrf.mxu2 }
 0x318   : > { %v3199_v43 = vadd.f32 %v3162_v39, %v5839_v58 }
 0x319   : > { %4422 = vmatmul.msk.bf16.gmra.mxu1 %vm459_vm0, %v3643_v54 }
 0x31e   : > { %v3006_v34 = vpop.f32.mrf.mxu1 }
 0x31f   : > { %v5872_v17 = vadd.f32 %v3006_v34, %v5799_v3  ;;  %v3164_v10 = vpop.f32.mrf.mxu2  ;;  %v3377_v34 = vadd.f32 %v3340_v21, %v3199_v43  ;;  %v5910_v21 = vld [vmem:[%s6163_s6] ss:$0 sm:$0xff] }
 0x320   : > { %v3200_v55 = vadd.f32 %v3164_v10, %v5843_v29 }
 0x321   : > { %v3555_v20 = vadd.f32 %v3518_v7, %v3377_v34 }
 0x322   : > { %v3378_v45 = vadd.f32 %v3342_v8, %v3200_v55 }
 0x324   : > { %v3556_v29 = vadd.f32 %v3520_v47, %v3378_v45 }
 0x326   : > { %v3009_v35 = vpop.f32.mrf.mxu1 }
 0x327   : > { %v5875_v40 = vadd.f32 %v3009_v35, %v5811_v48  ;;  %v3645_v48 = vpack.c.b16 %v3637_v28, %v5815_v49  ;;  %v3525_v49 = vpop.f32.mrf.mxu0 }
 0x329   : > { %4423 = vmatmul.msk.bf16.gmra.mxu1 %vm459_vm0, %v3644_v37 }
 0x32e   : > { %v3011_v61 = vpop.f32.mrf.mxu1 }
 0x32f   : > { %v5879_v3 = vadd.f32 %v3011_v61, %v5821_v6  ;;  %v3167_v6 = vpop.f32.mrf.mxu2  ;;  %v3528_v16 = vpop.f32.mrf.mxu0 }
 0x330   : > { %v3201_v22 = vadd.f32 %v3167_v6, %v5846_v19  ;;  %v5901_v19 = vld [vmem:[%s6162_s5] ss:$0 sm:$0xff] }
 0x332   : > { %v3379_v35 = vadd.f32 %v3345_v2, %v3201_v22 }
 0x336   : > { %v3014_v30 = vpop.f32.mrf.mxu1 }
 0x337   : > { %v5882_v38 = vadd.f32 %v3014_v30, %v5826_v1  ;;  %v3169_v27 = vpop.f32.mrf.mxu2  ;;  %v3347_v1 = vpop.f32.mrf.mxu3 }
 0x338   : > { %v3202_v12 = vadd.f32 %v3169_v27, %v5850_v51  ;;  %v3557_v51 = vadd.f32 %v3523_v26, %v3379_v35 }
 0x339   : > { %4424 = vmatmul.msk.bf16.gmra.mxu1 %vm459_vm0, %v3645_v48 }
 0x33a   : > { %v3380_v11 = vadd.f32 %v3347_v1, %v3202_v12 }
 0x33c   : > { %v3558_v13 = vadd.f32 %v3525_v49, %v3380_v11 }
 0x33e   : > { %v3016_v41 = vpop.f32.mrf.mxu1 }
 0x33f   : > { %v5887_v32 = vadd.f32 %v3016_v41, %v5832_v15  ;;  %v3172_v33 = vpop.f32.mrf.mxu2  ;;  %v3350_v9 = vpop.f32.mrf.mxu3  ;;  %v3197_v15 = vadd.f32 %v3157_v50, %v5830_v59 }
 0x340   : > { %v3203_v58 = vadd.f32 %v3172_v33, %v5853_v14  ;;  %v3530_v50 = vpop.f32.mrf.mxu0 }
 0x341   : > { %v3375_v5 = vadd.f32 %v3335_v23, %v3197_v15 }
 0x342   : > { %v3381_v62 = vadd.f32 %v3350_v9, %v3203_v58  ;;  %v4783_v9 = vmov 64.0  }
 0x343   : > { %v3553_v53 = vadd.f32 %v3513_v63, %v3375_v5  ;;  %4569 = vrcp.f32 %v4783_v9  ;;  %v5968_v9 = vld [vmem:[%s6164_s7] sm:$0x3] }
 0x344   : > { %v3559_v8 = vadd.f32 %v3528_v16, %v3381_v62 }
 0x346   : > { %v3691_v46 = vpop.f32.mrf.mxu1 }
 0x347   : > { %v3174_v31 = vpop.f32.mrf.mxu2  ;;  %v3352_v18 = vpop.f32.mrf.mxu3  ;;  %v3731_v23 = vadd.f32 %v3691_v46, %v3553_v53 }
 0x348   : > { %v3204_v6 = vadd.f32 %v3174_v31, %v5858_v25  ;;  %v5927_v26 = vpop.f32.mrf.mxu0 }
 0x349   : > { %v3751_v14 = vmul.f32 %v5901_v19, %v3731_v23 }
 0x34a   : > { %v3382_v49 = vadd.f32 %v3352_v18, %v3204_v6  ;;  %v4570_v18 = vpop.eup %4569 }
 0x34b   : > { %v5921_v46 = vadd.f32 %v5910_v21, %v3751_v14  ;;  %vm3834_vm3 = vweird.f32 %v4570_v18 }
 0x34c   : > { %v3560_v5 = vadd.f32 %v3530_v50, %v3382_v49 }
 0x34e   : > { %v3693_v52 = vpop.f32.mrf.mxu1 }
 0x34f   : > { %v5895_v37 = vpop.f32.mrf.mxu2  ;;  %v3732_v59 = vadd.f32 %v3693_v52, %v3554_v24  ;;  %v5904_v28 = vpop.f32.mrf.mxu3 }
 0x350   : > { %v3535_v35 = vpop.f32.mrf.mxu0 }
 0x351   : > { %v3752_v63 = vmul.f32 %v5901_v19, %v3732_v59 }
 0x353   : > { %v5914_v10 = vadd.f32 %v5910_v21, %v3752_v63 }
 0x355   : > { %v3788_v1 = vsel %vm459_vm0, %v5914_v10, 0.0 }
 0x356   : > { %v3696_v0 = vpop.f32.mrf.mxu1 }
 0x357   : > { %v3733_v60 = vadd.f32 %v3696_v0, %v3555_v20  ;;  %v5918_v47 = vpop.f32.mrf.mxu2  ;;  %v3357_v43 = vpop.f32.mrf.mxu3 }
 0x359   : > { %v3753_v30 = vmul.f32 %v5901_v19, %v3733_v60 }
 0x35b   : > { %v5924_v2 = vadd.f32 %v5910_v21, %v3753_v30 }
 0x35d   : > { %v3790_v56 = vsel %vm459_vm0, %v5924_v2, 0.0 }
 0x35e   : > { %v3698_v57 = vpop.f32.mrf.mxu1 }
 0x35f   : > { %v3734_v39 = vadd.f32 %v3698_v57, %v3556_v29  ;;  %v3787_v57 = vsel %vm459_vm0, %v5921_v46, 0.0  ;;  %v3182_v12 = vpop.f32.mrf.mxu2  ;;  %v3830_v29 = vmul.f32 64.0, %v4570_v18 }
 0x360   : > { %v3789_v15 = vadd.f32 %v3788_v1, %v3787_v57 }
 0x361   : > { %v3754_v7 = vmul.f32 %v5901_v19, %v3734_v39  ;;  %v3831_v63 = vsub.f32 1.0, %v3830_v29 }
 0x363   : > { %v5932_v0 = vadd.f32 %v5910_v21, %v3754_v7  ;;  %v3832_v30 = vmul.f32 %v4570_v18, %v3831_v63 }
 0x365   : > { %v3792_v44 = vsel %vm459_vm0, %v5932_v0, 0.0 }
 0x366   : > { %v3701_v54 = vpop.f32.mrf.mxu1 }
 0x367   : > { %v3735_v48 = vadd.f32 %v3701_v54, %v3557_v51  ;;  %v3791_v54 = vadd.f32 %v3790_v56, %v3789_v15  ;;  %v3184_v14 = vpop.f32.mrf.mxu2 }
 0x369   : > { %v3755_v27 = vmul.f32 %v5901_v19, %v3735_v48  ;;  %v3793_v24 = vadd.f32 %v3792_v44, %v3791_v54  ;;  %v3538_v48 = vpop.f32.mrf.mxu0 }
 0x36b   : > { %v5940_v31 = vadd.f32 %v5910_v21, %v3755_v27 }
 0x36d   : > { %v3794_v34 = vsel %vm459_vm0, %v5940_v31, 0.0 }
 0x36e   : > { %v3703_v61 = vpop.f32.mrf.mxu1  ;;  %v3795_v59 = vadd.f32 %v3794_v34, %v3793_v24  ;;  %v3206_v24 = vadd.f32 %v5918_v47, %v5865_v36 }
 0x36f   : > { %v3736_v41 = vadd.f32 %v3703_v61, %v3558_v13  ;;  %v3360_v61 = vpop.f32.mrf.mxu3  ;;  %v3187_v49 = vpop.f32.mrf.mxu2 }
 0x371   : > { %v3756_v25 = vmul.f32 %v5901_v19, %v3736_v41  ;;  %v3540_v57 = vpop.f32.mrf.mxu0 }
 0x373   : > { %v5946_v55 = vadd.f32 %v5910_v21, %v3756_v25 }
 0x375   : > { %v3796_v53 = vsel %vm459_vm0, %v5946_v55, 0.0 }
 0x376   : > { %v3706_v52 = vpop.f32.mrf.mxu1  ;;  %v3797_v11 = vadd.f32 %v3796_v53, %v3795_v59  ;;  %v3207_v53 = vadd.f32 %v3182_v12, %v5868_v4  ;;  %v3384_v59 = vadd.f32 %v3357_v43, %v3206_v24 }
 0x377   : > { %v3737_v33 = vadd.f32 %v3706_v52, %v3559_v8  ;;  %v3833_v8 = vadd.f32 %v4570_v18, %v3832_v30  ;;  %v3362_v52 = vpop.f32.mrf.mxu3 }
 0x378   : > { %v3562_v36 = vadd.f32 %v3535_v35, %v3384_v59 }
 0x379   : > { %v3757_v16 = vmul.f32 %v5901_v19, %v3737_v33  ;;  %v5963_v25 = vsel %vm3834_vm3, %v4570_v18, %v3833_v8  ;;  %v3543_v34 = vpop.f32.mrf.mxu0 }
 0x37b   : > { %v5951_v22 = vadd.f32 %v5910_v21, %v3757_v16 }
 0x37d   : > { %v3798_v58 = vsel %vm459_vm0, %v5951_v22, 0.0 }
 0x37e   : > { %v3708_v45 = vpop.f32.mrf.mxu1  ;;  %v3799_v60 = vadd.f32 %v3798_v58, %v3797_v11  ;;  %v3208_v58 = vadd.f32 %v3184_v14, %v5872_v17  ;;  %v3385_v11 = vadd.f32 %v3360_v61, %v3207_v53 }
 0x37f   : > { %v3738_v20 = vadd.f32 %v3708_v45, %v3560_v5  ;;  %v3365_v54 = vpop.f32.mrf.mxu3  ;;  %v3189_v5 = vpop.f32.mrf.mxu2  ;;  %v3205_v45 = vadd.f32 %v5895_v37, %v5861_v42 }
 0x380   : > { %v3210_v63 = vadd.f32 %v3189_v5, %v5879_v3  ;;  %v3386_v47 = vadd.f32 %v3362_v52, %v3208_v58  ;;  %v3563_v37 = vadd.f32 %v3538_v48, %v3385_v11 }
 0x381   : > { %v3758_v50 = vmul.f32 %v5901_v19, %v3738_v20  ;;  %v3383_v29 = vadd.f32 %v5904_v28, %v3205_v45 }
 0x383   : > { %v5959_v23 = vadd.f32 %v5910_v21, %v3758_v50  ;;  %v3561_v42 = vadd.f32 %v5927_v26, %v3383_v29 }
 0x385   : > { %v3800_v51 = vsel %vm459_vm0, %v5959_v23, 0.0 }
 0x386   : > { %v3801_v39 = vadd.f32 %v3800_v51, %v3799_v60  ;;  %v3711_v62 = vpop.f32.mrf.mxu1  ;;  %v3209_v60 = vadd.f32 %v3187_v49, %v5875_v40 }
 0x387   : > { %v3367_v20 = vpop.f32.mrf.mxu3  ;;  %v3192_v51 = vpop.f32.mrf.mxu2  ;;  %v3739_v28 = vadd.f32 %v3711_v62, %v3561_v42 }
 0x388   : > { %v3802_v13 = vrot.slane %v3801_v39, 4  ;;  %v3387_v4 = vadd.f32 %v3365_v54, %v3209_v60  ;;  %v3388_v43 = vadd.f32 %v3367_v20, %v3210_v63  ;;  %v3211_v17 = vadd.f32 %v3192_v51, %v5882_v38 }
 0x389   : > { %v3759_v26 = vmul.f32 %v5901_v19, %v3739_v28 }
 0x38a   : > { %v3803_v7 = vadd.f32 %v3802_v13, %v3801_v39  ;;  %v3545_v39 = vpop.f32.mrf.mxu0  ;;  %v3564_v13 = vadd.f32 %v3540_v57, %v3386_v47  ;;  %v3565_v40 = vadd.f32 %v3543_v34, %v3387_v4 }
 0x38b   : > { %v5993_v49 = vadd.f32 %v5910_v21, %v3759_v26 }
 0x38c   : > { %v3804_v41 = vrot.slane %v3803_v7, 2 }
 0x38e   : > { %v3713_v6 = vpop.f32.mrf.mxu1  ;;  %v3805_v27 = vadd.f32 %v3804_v41, %v3803_v7  ;;  %v3566_v41 = vadd.f32 %v3545_v39, %v3388_v43 }
 0x38f   : > { %v3740_v12 = vadd.f32 %v3713_v6, %v3562_v36  ;;  %v3370_v14 = vpop.f32.mrf.mxu3  ;;  %v3194_v8 = vpop.f32.mrf.mxu2 }
 0x390   : > { %v3806_v1 = vrot.slane %v3805_v27, 1  ;;  %v3389_v35 = vadd.f32 %v3370_v14, %v3211_v17 }
 0x391   : > { %v3760_v7 = vmul.f32 %v5901_v19, %v3740_v12 }
 0x392   : > { %v3807_v33 = vadd.f32 %v3806_v1, %v3805_v27  ;;  %v3548_v27 = vpop.f32.mrf.mxu0  ;;  %v3212_v1 = vadd.f32 %v3194_v8, %v5887_v32  ;;  %v3847_v8 = vld [vmem:[%s6165_s8] sm:$0x3] }
 0x393   : > { %v5988_v52 = vadd.f32 %v5910_v21, %v3760_v7 }
 0x394   : > { %v3836_v56 = vmul.f32 %v5963_v25, %v3807_v33  ;;  %v3567_v33 = vadd.f32 %v3548_v27, %v3389_v35 }
 0x396   : > { %v3716_v16 = vpop.f32.mrf.mxu1  ;;  %v3839_v15 = vmul.f32 %v5968_v9, %v3836_v56 }
 0x397   : > { %v3741_v61 = vadd.f32 %v3716_v16, %v3563_v37 }
 0x398   : > { %v3841_v44 = vsel %vm461_vm1, %v3839_v15, 0.0  ;;  %v3372_v15 = vpop.f32.mrf.mxu3 }
 0x399   : > { %3842 = vadd.xlane.f32.xlu0 %v3841_v44  ;;  %v3761_v48 = vmul.f32 %v5901_v19, %v3741_v61  ;;  %v3809_v44 = vsel %vm459_vm0, %v5988_v52, 0.0  ;;  %v3390_v34 = vadd.f32 %v3372_v15, %v3212_v1 }
 0x39b   : > { %v5996_v57 = vadd.f32 %v5910_v21, %v3761_v48 }
 0x39d   : > { %v3811_v24 = vsel %vm459_vm0, %v5996_v57, 0.0 }
 0x39e   : > { %v3718_v18 = vpop.f32.mrf.mxu1 }
 0x39f   : > { %v3742_v3 = vadd.f32 %v3718_v18, %v3564_v13  ;;  %v3808_v18 = vsel %vm459_vm0, %v5993_v49, 0.0 }
 0x3a0   : > { %v3810_v20 = vadd.f32 %v3809_v44, %v3808_v18 }
 0x3a1   : > { %v3762_v38 = vmul.f32 %v5901_v19, %v3742_v3 }
 0x3a2   : > { %v3812_v29 = vadd.f32 %v3811_v24, %v3810_v20 }
 0x3a3   : > { %v6002_v54 = vadd.f32 %v5910_v21, %v3762_v38 }
 0x3a5   : > { %v3813_v59 = vsel %vm459_vm0, %v6002_v54, 0.0 }
 0x3a6   : > { %v3721_v50 = vpop.f32.mrf.mxu1  ;;  %v3814_v63 = vadd.f32 %v3813_v59, %v3812_v29 }
 0x3a7   : > { %v3743_v6 = vadd.f32 %v3721_v50, %v3565_v40  ;;  %v3550_v50 = vpop.f32.mrf.mxu0 }
 0x3a8   : > { %v3568_v11 = vadd.f32 %v3550_v50, %v3390_v34 }
 0x3a9   : > { %v3763_v56 = vmul.f32 %v5901_v19, %v3743_v6 }
 0x3ab   : > { %v6010_v45 = vadd.f32 %v5910_v21, %v3763_v56 }
 0x3ad   : > { %v3815_v60 = vsel %vm459_vm0, %v6010_v45, 0.0 }
 0x3ae   : > { %v3723_v30 = vpop.f32.mrf.mxu1  ;;  %v3816_v42 = vadd.f32 %v3815_v60, %v3814_v63 }
 0x3af   : > { %v3744_v62 = vadd.f32 %v3723_v30, %v3566_v41 }
 0x3b1   : > { %v3764_v5 = vmul.f32 %v5901_v19, %v3744_v62 }
 0x3b3   : > { %v6016_v58 = vadd.f32 %v5910_v21, %v3764_v5 }
 0x3b5   : > { %v3817_v36 = vsel %vm459_vm0, %v6016_v58, 0.0 }
 0x3b6   : > { %v3726_v16 = vpop.f32.mrf.mxu1  ;;  %v3818_v12 = vadd.f32 %v3817_v36, %v3816_v42 }
 0x3b7   : > { %v3745_v32 = vadd.f32 %v3726_v16, %v3567_v33 }
 0x3b9   : > { %v3765_v53 = vmul.f32 %v5901_v19, %v3745_v32  ;;  %v6049_v32 = vld [vmem:[%s6167_s10] sm:$0x1] }
 0x3bb   : > { %v6021_v51 = vadd.f32 %v5910_v21, %v3765_v53 }
 0x3bd   : > { %v3819_v37 = vsel %vm459_vm0, %v6021_v51, 0.0 }
 0x3be   : > { %v3728_v39 = vpop.f32.mrf.mxu1  ;;  %v3820_v13 = vadd.f32 %v3819_v37, %v3818_v12  ;;  %v3938_v37 = vld [vmem:[%s4964_s12] sm:$0xff]  ;;  %v3939_v12 = vld [vmem:[%s4964_s12 + $0x8] sm:$0xff] }
 0x3bf   : > { %v3746_v47 = vadd.f32 %v3728_v39, %v3568_v11 }
 0x3c1   : > { %v3766_v4 = vmul.f32 %v5901_v19, %v3746_v47 }
 0x3c3   : > { %v6029_v43 = vadd.f32 %v5910_v21, %v3766_v4  ;;  %v4784_v21 = vmov 0  }
 0x3c4   : > { %4563 = vset.pattern.permute.xlu1 %v4784_v21  ;;  %4564 = vset.pattern.permute.xlu0 %v4784_v21 }
 0x3c5   : > { %v3821_v17 = vsel %vm459_vm0, %v6029_v43, 0.0 }
 0x3c6   : > { %v3822_v14 = vadd.f32 %v3821_v17, %v3820_v13  ;;  %v3940_v13 = vld [vmem:[%s4964_s12 + $0x10] sm:$0xff]  ;;  %v3941_v17 = vld [vmem:[%s4964_s12 + $0x18] sm:$0xff] }
 0x3c8   : > { %v3823_v28 = vrot.slane %v3822_v14, 4 }
 0x3ca   : > { %v3824_v61 = vadd.f32 %v3823_v28, %v3822_v14  ;;  %v3942_v14 = vld [vmem:[%s4964_s12 + $0x20] sm:$0xff]  ;;  %v3943_v28 = vld [vmem:[%s4964_s12 + $0x28] sm:$0xff] }
 0x3cc   : > { %v3825_v30 = vrot.slane %v3824_v61, 2 }
 0x3ce   : > { %v3826_v40 = vadd.f32 %v3825_v30, %v3824_v61 }
 0x3d0   : > { %v3827_v7 = vrot.slane %v3826_v40, 1 }
 0x3d2   : > { %v3828_v3 = vadd.f32 %v3827_v7, %v3826_v40 }
 0x3d4   : > { %v3837_v41 = vmul.f32 %v5963_v25, %v3828_v3  ;;  %v6042_v25 = vld [vmem:[%s6166_s9] sm:$0x3]  ;;  %v3944_v3 = vld [vmem:[%s4964_s12 + $0x30] sm:$0xff] }
 0x3d6   : > { %v3840_v35 = vmul.f32 %v5968_v9, %v3837_v41 }
 0x3d8   : > { %v3844_v19 = vsel %vm461_vm1, %v3840_v35, 0.0 }
 0x3d9   : > { %3845 = vadd.xlane.f32.xlu0 %v3844_v19 }
 0x40c   : > { %v3843_v26 = vpop.xlane.xlu0 %3842 }
 0x40d   : > { %v3848_v48 = vadd.f32 %v3847_v8, %v3843_v26 }
 0x40f   : > { %v3850_v6 = vmax.f32 %v3848_v48, 0.0 }
 0x411   : > { %3855 = vperm.xlu1 %4563, %v3850_v6  }
 0x44c   : > { %v3846_v27 = vpop.xlane.xlu0 %3845 }
 0x44d   : > { %v3849_v38 = vadd.f32 %v3847_v8, %v3846_v27  ;;  %v3945_v8 = vld [vmem:[%s4964_s12 + $0x38] sm:$0xff] }
 0x44f   : > { %v3851_v62 = vmax.f32 %v3849_v38, 0.0 }
 0x451   : > { %3860 = vperm.xlu1 %4563, %v3851_v62  }
 0x483   : > { %v3856_v9 = vpop.permute.xlu1 %3855 }
 0x484   : > { %v3863_v1 = vmul.f32 %v3856_v9, %v6042_v25 }
 0x486   : > { %v3865_v33 = vsel %vm461_vm1, %v3863_v1, 0.0 }
 0x487   : > { %v3866_v56 = vrot.slane %v3865_v33, 4 }
 0x489   : > { %v3867_v16 = vadd.f32 %v3866_v56, %v3865_v33 }
 0x48b   : > { %v3868_v15 = vrot.slane %v3867_v16, 2 }
 0x48d   : > { %v3869_v44 = vadd.f32 %v3868_v15, %v3867_v16 }
 0x48f   : > { %v3870_v5 = vrot.slane %v3869_v44, 1 }
 0x491   : > { %v3871_v34 = vadd.f32 %v3870_v5, %v3869_v44 }
 0x493   : > { %v3880_v18 = vadd.f32 %v6049_v32, %v3871_v34 }
 0x495   : > { %v4425_v24 = vmul.f32 -1.442695, %v3880_v18 }
 0x497   : > { %4571 = vpow2.f32 %v4425_v24 }
 0x49d   : > { %v4572_v53 = vpop.eup %4571 }
 0x49e   : > { %v3888_v20 = vadd.f32 1.0, %v4572_v53 }
 0x4a0   : > { %4573 = vrcp.f32 %v3888_v20  ;;  %v3901_v11 = vand.u32 2147483648, %v3888_v20  ;;  %v3899_v63 = vand.u32 2147483647, %v3888_v20  ;;  %vm3895_vm5 = vweird.f32 %v3888_v20 }
 0x4a2   : > { %v3902_v36 = vor.u32 1.1754944e-38, %v3901_v11  ;;  %vm3900_vm7 = vcmp.eq.f32.partialorder %v3899_v63, 8.507059e+37 }
 0x4a6   : > { %v4574_v59 = vpop.eup %4573 }
 0x4a7   : > { %v3891_v50 = vmul.f32 %v4574_v59, %v3888_v20  ;;  %vm3896_vm4 = vweird.f32 %v4574_v59 }
 0x4a8   : > { %vm3897_vm6 = vmor %vm3895_vm5, %vm3896_vm4 }
 0x4a9   : > { %v3892_v29 = vsub.f32 1.0, %v3891_v50 }
 0x4ab   : > { %v3893_v60 = vmul.f32 %v4574_v59, %v3892_v29 }
 0x4ad   : > { %v3894_v39 = vadd.f32 %v4574_v59, %v3893_v60 }
 0x4af   : > { %v3898_v47 = vsel %vm3897_vm6, %v4574_v59, %v3894_v39 }
 0x4b0   : > { %v3903_v42 = vsel %vm3900_vm7, %v3902_v36, %v3898_v47 }
 0x4b1   : > { %v3920_v4 = vperm.slane %v3903_v42, 0 }
 0x4b3   : > { %v3922_v61 = vmul.f32 %v3920_v4, %v5921_v46  ;;  %v3923_v30 = vmul.f32 %v3920_v4, %v5914_v10  ;;  %v3924_v40 = vmul.f32 %v3920_v4, %v5924_v2  ;;  %v3925_v7 = vmul.f32 %v3920_v4, %v5932_v0 }
 0x4b4   : > { %v3926_v41 = vmul.f32 %v3920_v4, %v5940_v31  ;;  %v3927_v35 = vmul.f32 %v3920_v4, %v5946_v55  ;;  %v3928_v19 = vmul.f32 %v3920_v4, %v5951_v22  ;;  %v3929_v21 = vmul.f32 %v3920_v4, %v5959_v23 }
 0x4b5   : > { %v3954_v26 = vadd.f32 %v3938_v37, %v3922_v61  ;;  %v3955_v48 = vadd.f32 %v3939_v12, %v3923_v30  ;;  %v3956_v46 = vadd.f32 %v3940_v13, %v3924_v40  ;;  %v3957_v6 = vadd.f32 %v3941_v17, %v3925_v7  ;;  %v3946_v37 = vld [vmem:[%s4964_s12 + $0x40] sm:$0xff]  ;;  %v3947_v12 = vld [vmem:[%s4964_s12 + $0x48] sm:$0xff]  ;;  %v3948_v13 = vld [vmem:[%s4964_s12 + $0x50] sm:$0xff] }
 0x4b6   : > { %v3958_v10 = vadd.f32 %v3942_v14, %v3926_v41  ;;  %v3959_v27 = vadd.f32 %v3943_v28, %v3927_v35  ;;  %v3960_v2 = vadd.f32 %v3944_v3, %v3928_v19  ;;  %v3961_v9 = vadd.f32 %v3945_v8, %v3929_v21  ;;  %v3949_v17 = vld [vmem:[%s4964_s12 + $0x58] sm:$0xff]  ;;  %v3950_v14 = vld [vmem:[%s4964_s12 + $0x60] sm:$0xff]  ;;  %v3951_v28 = vld [vmem:[%s4964_s12 + $0x68] sm:$0xff] }
 0x4b7   : > { %v3970_v38 = vmax.f32 %v3954_v26, 0.0  ;;  %v3971_v0 = vmax.f32 %v3955_v48, 0.0  ;;  %v3972_v62 = vmax.f32 %v3956_v46, 0.0  ;;  %v3973_v31 = vmax.f32 %v3957_v6, 0.0  ;;  %v3952_v3 = vld [vmem:[%s4964_s12 + $0x70] sm:$0xff]  ;;  %v3953_v8 = vld [vmem:[%s4964_s12 + $0x78] sm:$0xff] }
 0x4b8   : > { %v3974_v1 = vmax.f32 %v3958_v10, 0.0  ;;  %v3975_v55 = vmax.f32 %v3959_v27, 0.0  ;;  %v3976_v22 = vmax.f32 %v3960_v2, 0.0  ;;  %v3977_v23 = vmax.f32 %v3961_v9, 0.0  ;;  %s4016_s12 = sshll.u32 %s6070_s28, 4  ;;  %s4017_s12 = int_to_ptr.vmem [resolvable:$true] %s4016_s12 }
 0x4b9   : > { %3986 = vst.msk [vmem:[%s6070_s28] sm:$0xff] %vm459_vm0, %v3970_v38 }
 0x4ba   : > { %3987 = vst.msk [vmem:[%s6070_s28 + $0x8] sm:$0xff] %vm459_vm0, %v3971_v0 }
 0x4bb   : > { %3988 = vst.msk [vmem:[%s6070_s28 + $0x10] sm:$0xff] %vm459_vm0, %v3972_v62 }
 0x4bc   : > { %3989 = vst.msk [vmem:[%s6070_s28 + $0x18] sm:$0xff] %vm459_vm0, %v3973_v31 }
 0x4bd   : > { %3990 = vst.msk [vmem:[%s6070_s28 + $0x20] sm:$0xff] %vm459_vm0, %v3974_v1 }
 0x4be   : > { %3991 = vst.msk [vmem:[%s6070_s28 + $0x28] sm:$0xff] %vm459_vm0, %v3975_v55 }
 0x4bf   : > { %3992 = vst.msk [vmem:[%s6070_s28 + $0x30] sm:$0xff] %vm459_vm0, %v3976_v22 }
 0x4c0   : > { %3993 = vst.msk [vmem:[%s6070_s28 + $0x38] sm:$0xff] %vm459_vm0, %v3977_v23 }
 0x4c3   : > { %v3861_v33 = vpop.permute.xlu1 %3860 }
 0x4c4   : > { %v3864_v56 = vmul.f32 %v3861_v33, %v6042_v25 }
 0x4c6   : > { %v3872_v16 = vsel %vm461_vm1, %v3864_v56, 0.0 }
 0x4c7   : > { %v3873_v15 = vrot.slane %v3872_v16, 4 }
 0x4c9   : > { %v3874_v44 = vadd.f32 %v3873_v15, %v3872_v16 }
 0x4cb   : > { %v3875_v5 = vrot.slane %v3874_v44, 2 }
 0x4cd   : > { %v3876_v34 = vadd.f32 %v3875_v5, %v3874_v44 }
 0x4cf   : > { %v3877_v18 = vrot.slane %v3876_v34, 1 }
 0x4d1   : > { %v3878_v24 = vadd.f32 %v3877_v18, %v3876_v34 }
 0x4d3   : > { %v3881_v53 = vadd.f32 %v6049_v32, %v3878_v24 }
 0x4d5   : > { %v4426_v20 = vmul.f32 -1.442695, %v3881_v53 }
 0x4d7   : > { %4575 = vpow2.f32 %v4426_v20 }
 0x4dd   : > { %v4576_v59 = vpop.eup %4575 }
 0x4de   : > { %v3889_v50 = vadd.f32 1.0, %v4576_v59 }
 0x4e0   : > { %4577 = vrcp.f32 %v3889_v50  ;;  %v3916_v60 = vand.u32 2147483648, %v3889_v50  ;;  %v3914_v39 = vand.u32 2147483647, %v3889_v50  ;;  %vm3910_vm9 = vweird.f32 %v3889_v50 }
 0x4e2   : > { %v3917_v32 = vor.u32 1.1754944e-38, %v3916_v60  ;;  %vm3915_vm11 = vcmp.eq.f32.partialorder %v3914_v39, 8.507059e+37 }
 0x4e6   : > { %v4578_v29 = vpop.eup %4577 }
 0x4e7   : > { %v3906_v11 = vmul.f32 %v4578_v29, %v3889_v50  ;;  %vm3911_vm8 = vweird.f32 %v4578_v29 }
 0x4e8   : > { %vm3912_vm10 = vmor %vm3910_vm9, %vm3911_vm8 }
 0x4e9   : > { %v3907_v25 = vsub.f32 1.0, %v3906_v11 }
 0x4eb   : > { %v3908_v63 = vmul.f32 %v4578_v29, %v3907_v25 }
 0x4ed   : > { %v3909_v36 = vadd.f32 %v4578_v29, %v3908_v63 }
 0x4ef   : > { %v3913_v47 = vsel %vm3912_vm10, %v4578_v29, %v3909_v36 }
 0x4f0   : > { %v3918_v42 = vsel %vm3915_vm11, %v3917_v32, %v3913_v47 }
 0x4f1   : > { %v3921_v4 = vperm.slane %v3918_v42, 0 }
 0x4f3   : > { %v3930_v61 = vmul.f32 %v3921_v4, %v5993_v49  ;;  %v3931_v30 = vmul.f32 %v3921_v4, %v5988_v52  ;;  %v3932_v40 = vmul.f32 %v3921_v4, %v5996_v57  ;;  %v3933_v7 = vmul.f32 %v3921_v4, %v6002_v54 }
 0x4f4   : > { %v3934_v41 = vmul.f32 %v3921_v4, %v6010_v45  ;;  %v3935_v35 = vmul.f32 %v3921_v4, %v6016_v58  ;;  %v3936_v19 = vmul.f32 %v3921_v4, %v6021_v51  ;;  %v3937_v21 = vmul.f32 %v3921_v4, %v6029_v43 }
 0x4f5   : > { %v3962_v26 = vadd.f32 %v3946_v37, %v3930_v61  ;;  %v3963_v49 = vadd.f32 %v3947_v12, %v3931_v30  ;;  %v3964_v52 = vadd.f32 %v3948_v13, %v3932_v40  ;;  %v3965_v57 = vadd.f32 %v3949_v17, %v3933_v7 }
 0x4f6   : > { %v3966_v48 = vadd.f32 %v3950_v14, %v3934_v41  ;;  %v3967_v54 = vadd.f32 %v3951_v28, %v3935_v35  ;;  %v3968_v46 = vadd.f32 %v3952_v3, %v3936_v19  ;;  %v3969_v43 = vadd.f32 %v3953_v8, %v3937_v21 }
 0x4f7   : > { %v3978_v45 = vmax.f32 %v3962_v26, 0.0  ;;  %v3979_v58 = vmax.f32 %v3963_v49, 0.0  ;;  %v3980_v51 = vmax.f32 %v3964_v52, 0.0  ;;  %v3981_v6 = vmax.f32 %v3965_v57, 0.0 }
 0x4f8   : > { %v3982_v10 = vmax.f32 %v3966_v48, 0.0  ;;  %v3983_v27 = vmax.f32 %v3967_v54, 0.0  ;;  %v3984_v2 = vmax.f32 %v3968_v46, 0.0  ;;  %v3985_v38 = vmax.f32 %v3969_v43, 0.0 }
 0x4f9   : > { %3994 = vst.msk [vmem:[%s6070_s28 + $0x40] sm:$0xff] %vm459_vm0, %v3978_v45 }
 0x4fa   : > { %3995 = vst.msk [vmem:[%s6070_s28 + $0x48] sm:$0xff] %vm459_vm0, %v3979_v58 }
 0x4fb   : > { %3996 = vst.msk [vmem:[%s6070_s28 + $0x50] sm:$0xff] %vm459_vm0, %v3980_v51 }
 0x4fc   : > { %3997 = vst.msk [vmem:[%s6070_s28 + $0x58] sm:$0xff] %vm459_vm0, %v3981_v6 }
 0x4fd   : > { %3998 = vst.msk [vmem:[%s6070_s28 + $0x60] sm:$0xff] %vm459_vm0, %v3982_v10 }
 0x4fe   : > { %3999 = vst.msk [vmem:[%s6070_s28 + $0x68] sm:$0xff] %vm459_vm0, %v3983_v27 }
 0x4ff   : > { %4000 = vst.msk [vmem:[%s6070_s28 + $0x70] sm:$0xff] %vm459_vm0, %v3984_v2 }
 0x500   : > { %4001 = vst.msk [vmem:[%s6070_s28 + $0x78] sm:$0xff] %vm459_vm0, %v3985_v38 }
 0x501   : > { %4726 = shalt.err (!%p4723_p10)
}
 0x502   : > { %s4785_s29 = smov 128   ;;  %s4786_s28 = smov 8  }
 0x503   : > { %4491 = dma.vmem_to_hbm [thread:$0]  (%p4930_p7), %s4017_s12, 2048, %s4019_s25, %s4003_s14, %s4785_s29, %s4785_s29, %s4786_s28  }
 0x504 PF: > { %s4033_s1 = sand.u32 1, %s4761_s17   ;;  %p6186_p12 = scmp.ge.s32.totalorder %s4773_s20, 2 }
 0x505   : > { %s4034_s22 = scalar_lea.sflag [#allocation5], %s4033_s1 }
 0x506   : > { %p4508_p13 = pnand %p6186_p12, %p4882_p6 }
 0x508   : > { %p4509_p0 = pneg %p4508_p13 }
 0x50a   : > { %4756 = dma.done.wait (%p4509_p0), %s4034_s22, 2048  }
 0x50b   : > { %4758 = vsyncadd (%p4509_p0), %s4034_s22, 4294965248  ;;  %s6187_s30 = sld [smem:[#allocation16_spill]]  ;;  %p26_p3 = scmp.ge.s32.totalorder %s4914_s27, 4  }
 0x50c   : > { %s6188_s19 = sld [smem:[#allocation17_spill]]  ;;  %s6189_s17 = smov %s4765_s18 }
 0x50d   : > { %s6191_s20 = smov %s4914_s27  ;;  %28 = sbr.rel (!%p26_p3) target bundleno = 11 (0xb), region = 140 }
 0x511   : > { %s6190_s18 = smov %s6187_s30 }
 0x512   :  { %4040 = vsyncpa [#allocation4], 1 }
 0x513   :  { %4042 = vsyncpa [#allocation4 + $0x1], 1 }
 0x514   :  { %4043 = vsyncpa [#allocation7], 1 }
 0x515   :  { %4044 = vsyncpa [#allocation10], 1 }
 0x516   :  { %4045 = vsyncpa [#allocation5], 1 }
 0x517   :  { %4047 = vsyncpa [#allocation5 + $0x1], 1 }

</bundles_post_ra>
